<compile_context>
chip_gen: v6e
topology: v6e:2x2x1
jax: 0.10.0
libtpu: 0.0.40
codegen_flags: <defaults>
</compile_context>

<pallas_src>
import functools

import jax
import jax.numpy as jnp
import numpy as np
from jax.experimental import pallas as pl
from jax.experimental.pallas import tpu as pltpu

HIDDEN = 512
LN_EPS = 1e-5   # torch.nn.LayerNorm default
LANES = 128


def _round_up(x, m):
    return (x + m - 1) // m * m


def _tpu_config():
    """(elementwise dtype, VMEM cap) chosen from the local TPU generation."""
    kind = ""
    try:
        kind = jax.devices()[0].device_kind.lower()
    except Exception:
        pass
    old_gen = any(t in kind for t in ("v2", "v3", "v4", "v5"))
    eltwise_dtype = jnp.float32 if old_gen else jnp.bfloat16  # bf16 VPU/EUP on v6e/v7x
    is_v7 = ("v7" in kind) or ("7x" in kind)
    vmem_cap = (56 << 20) if is_v7 else (100 << 20)           # v7x has 64 MiB VMEM/TC
    return eltwise_dtype, vmem_cap


def _ln_silu(x, gamma, beta, eltwise_dtype):
    """Fused LayerNorm (over last dim) + SiLU.

    Reductions and scale/shift derivation stay in f32 (avoids cancellation);
    variance is E[x^2] - mu^2 so x is touched once; normalize+affine collapse
    to one FMA per element; SiLU runs in `eltwise_dtype` and the result is
    returned as bf16, ready to feed the next MXU matmul.
    """
    mu = jnp.mean(x, axis=-1, keepdims=True)
    var = jnp.mean(x * x, axis=-1, keepdims=True) - mu * mu
    var = jnp.maximum(var, 0.0)
    rstd = jax.lax.rsqrt(var + LN_EPS)
    scale = gamma * rstd                       # (bt, H) f32
    shift = beta - mu * scale                  # (bt, H) f32
    y = (x * scale + shift).astype(eltwise_dtype)
    y = y * jax.nn.sigmoid(y)                  # SiLU (EUP sigmoid + VPU mul)
    return y.astype(jnp.bfloat16)


def gencoder_kernel(g_ref, w1_ref, wh_ref, wo_ref, b_ref, ga_ref, be_ref, bo_ref,
                    out_ref, *, eltwise_dtype):
    # First layer: bf16 input tile @ bf16 W1, f32 accumulation.
    h = jnp.dot(g_ref[...], w1_ref[...],
                preferred_element_type=jnp.float32) + b_ref[0:1, :]
    x = _ln_silu(h, ga_ref[0:1, :], be_ref[0:1, :], eltwise_dtype)

    # Hidden layers fc2..fc4 (weights stacked along axis 0, static indexing).
    for l in range(3):
        h = jnp.dot(x, wh_ref[l],
                    preferred_element_type=jnp.float32) + b_ref[l + 1:l + 2, :]
        x = _ln_silu(h, ga_ref[l + 1:l + 2, :], be_ref[l + 1:l + 2, :], eltwise_dtype)

    # Output projection (no norm / activation).
    out_ref[...] = (jnp.dot(x, wo_ref[...], preferred_element_type=jnp.float32)
                    + bo_ref[...]).astype(out_ref.dtype)


def prepare_params(params):
    """One-time: pad to lane multiples, cast matmul weights to bf16, stack the
    small per-layer vectors.  Hoisted out of the per-call path."""
    input_size = params["w1"].shape[0]
    rep_size = params["wo"].shape[1]
    in_pad = _round_up(input_size, LANES)
    rep_pad = _round_up(rep_size, LANES)

    w1 = jnp.zeros((in_pad, HIDDEN), jnp.bfloat16)
    w1 = w1.at[:input_size, :].set(params["w1"].astype(jnp.bfloat16))
    wh = jnp.stack([params[f"w{i}"].astype(jnp.bfloat16) for i in ("2", "3", "4")])
    wo = jnp.zeros((HIDDEN, rep_pad), jnp.bfloat16)
    wo = wo.at[:, :rep_size].set(params["wo"].astype(jnp.bfloat16))

    bias = jnp.concatenate([params[f"b{i}"] for i in ("1", "2", "3", "4")], axis=0)
    gamma = jnp.concatenate([params[f"ga{i}"] for i in ("1", "2", "3", "4")], axis=0)
    beta = jnp.concatenate([params[f"be{i}"] for i in ("1", "2", "3", "4")], axis=0)
    bo = jnp.zeros((1, rep_pad), jnp.float32).at[:, :rep_size].set(params["bo"])

    return dict(w1=w1, wh=wh, wo=wo, bias=bias, gamma=gamma, beta=beta, bo=bo,
                input_size=input_size, rep_size=rep_size,
                in_pad=in_pad, rep_pad=rep_pad)


def _choose_tile(B, batch_tile):
    """Balanced batch tiling; grid >= 2 when B >= 256 (v7x megacore)."""
    if B < 256:
        return _round_up(max(B, 8), 8)
    n_tiles = max(2, pl.cdiv(B, batch_tile))
    return _round_up(pl.cdiv(B, n_tiles), LANES)


def gencoder_forward(g, prep, *, batch_tile=1024):
    """Fused GEncoder forward.  g: (B, input_size) f32 -> (B, rep_size) f32."""
    B, input_size = g.shape
    assert input_size == prep["input_size"]
    in_pad, rep_pad = prep["in_pad"], prep["rep_pad"]
    rep_size = prep["rep_size"]

    bt = _choose_tile(B, batch_tile)
    B_pad = _round_up(B, bt)
    grid = (B_pad // bt,)

    # Pad + cast input to bf16 in one shot (MXU operand dtype).
    g_p = jnp.zeros((B_pad, in_pad), jnp.bfloat16)
    g_p = g_p.at[:B, :input_size].set(g.astype(jnp.bfloat16))

    ordered = [prep["w1"], prep["wh"], prep["wo"],
               prep["bias"], prep["gamma"], prep["beta"], prep["bo"]]

    eltwise_dtype, vmem_cap = _tpu_config()

    # --- cost estimate & VMEM sizing ----------------------------------------
    flops = 2 * B_pad * (in_pad * HIDDEN + 3 * HIDDEN * HIDDEN + HIDDEN * rep_pad)
    transcendentals = B_pad * (4 * HIDDEN + 4)   # 4x sigmoid/elem + 4x rsqrt/row
    param_bytes = sum(int(a.size) * a.dtype.itemsize for a in ordered)
    bytes_accessed = int(g_p.size * 2 + param_bytes + B_pad * rep_pad * 4)

    vmem_need = (
        2 * param_bytes              # conservative: params possibly double-buffered
        + 2 * bt * in_pad * 2        # bf16 input tile, double buffered
        + 2 * bt * rep_pad * 4       # f32 output tile, double buffered
        + 8 * bt * HIDDEN * 4        # live f32/bf16 intermediates + headroom
    )
    vmem_limit = int(min(vmem_cap, vmem_need + (16 << 20)))

    kernel = functools.partial(gencoder_kernel, eltwise_dtype=eltwise_dtype)

    def build(single_buffer_params):
        def pspec(shape):
            nd = len(shape)
            idx = lambda i, _nd=nd: (0,) * _nd
            if single_buffer_params:
                # Grid-invariant params: single VMEM buffer is enough.
                return pl.BlockSpec(shape, idx, pipeline_mode=pl.Buffered(1))
            return pl.BlockSpec(shape, idx)

        in_specs = [pl.BlockSpec((bt, in_pad), lambda i: (i, 0))]
        in_specs += [pspec(a.shape) for a in ordered]
        out_spec = pl.BlockSpec((bt, rep_pad), lambda i: (i, 0))

        return pl.pallas_call(
            kernel,
            out_shape=jax.ShapeDtypeStruct((B_pad, rep_pad), jnp.float32),
            grid_spec=pltpu.PrefetchScalarGridSpec(
                num_scalar_prefetch=0,
                grid=grid,
                in_specs=in_specs,
                out_specs=out_spec,
            ),
            compiler_params=pltpu.CompilerParams(
                dimension_semantics=("parallel",),
                vmem_limit_bytes=vmem_limit,
            ),
            cost_estimate=pl.CostEstimate(
                flops=flops,
                transcendentals=transcendentals,
                bytes_accessed=bytes_accessed,
            ),
        )

    try:
        out = build(True)(g_p, *ordered)
    except Exception:
        # Fallback if single-buffered pipeline_mode is rejected by this jax build.
        out = build(False)(g_p, *ordered)

    return out[:B, :rep_size]


def init_params(key, input_size, rep_size):
    """Deterministic init mimicking torch.nn.Linear default (uniform +-1/sqrt(fan_in)).
    Weights are stored transposed: (in_features, out_features)."""
    params = {}
    dims = [
        ("1", input_size, HIDDEN),
        ("2", HIDDEN, HIDDEN),
        ("3", HIDDEN, HIDDEN),
        ("4", HIDDEN, HIDDEN),
        ("o", HIDDEN, rep_size),
    ]
    keys = jax.random.split(key, 2 * len(dims))
    for idx, (name, in_f, out_f) in enumerate(dims):
        bound = 1.0 / np.sqrt(in_f)
        params[f"w{name}"] = jax.random.uniform(
            keys[2 * idx], (in_f, out_f), jnp.float32, -bound, bound)
        params[f"b{name}"] = jax.random.uniform(
            keys[2 * idx + 1], (1, out_f), jnp.float32, -bound, bound)
        if name != "o":
            # torch.nn.LayerNorm default: weight=1, bias=0
            params[f"ga{name}"] = jnp.ones((1, out_f), jnp.float32)
            params[f"be{name}"] = jnp.zeros((1, out_f), jnp.float32)
    return params


# ----------------------------- references ----------------------------------

def gencoder_ref_f32(g, params):
    """Pure-JAX f32 reference (matches the PyTorch module semantics)."""
    x = g
    for l in ("1", "2", "3", "4"):
        x = x @ params[f"w{l}"] + params[f"b{l}"]
        mu = jnp.mean(x, axis=-1, keepdims=True)
        var = jnp.mean((x - mu) ** 2, axis=-1, keepdims=True)
        x = (x - mu) / jnp.sqrt(var + LN_EPS)
        x = x * params[f"ga{l}"] + params[f"be{l}"]
        x = x * jax.nn.sigmoid(x)
    return x @ params["wo"] + params["bo"]


def gencoder_ref_matched(g, params, eltwise_dtype):
    """Reference following the kernel's numerics (bf16 matmul operands, f32
    accumulation/LN, fused scale-shift, SiLU in eltwise_dtype)."""
    def dot(x, w):
        return jnp.dot(x, w.astype(jnp.bfloat16), preferred_element_type=jnp.float32)

    x = g.astype(jnp.bfloat16)
    for l in ("1", "2", "3", "4"):
        h = dot(x, params[f"w{l}"]) + params[f"b{l}"]
        mu = jnp.mean(h, axis=-1, keepdims=True)
        var = jnp.maximum(jnp.mean(h * h, axis=-1, keepdims=True) - mu * mu, 0.0)
        rstd = jax.lax.rsqrt(var + LN_EPS)
        scale = params[f"ga{l}"] * rstd
        shift = params[f"be{l}"] - mu * scale
        y = (h * scale + shift).astype(eltwise_dtype)
        y = y * jax.nn.sigmoid(y)
        x = y.astype(jnp.bfloat16)
    return dot(x, params["wo"]) + params["bo"]


if __name__ == "__main__":
    B, INPUT_SIZE, REP_SIZE = 8, 32, 32

    key = jax.random.PRNGKey(0)
    kg, kp = jax.random.split(key)
    g = jax.random.normal(kg, (B, INPUT_SIZE), jnp.float32)
    params = init_params(kp, INPUT_SIZE, REP_SIZE)
    prep = prepare_params(params)

    out = jax.block_until_ready(gencoder_forward(g, prep))

    # Numerics-matched reference (bf16 matmuls, fused-LN form).
    eltwise_dtype, _ = _tpu_config()
    ref_m = jax.block_until_ready(gencoder_ref_matched(g, params, eltwise_dtype))
    np.testing.assert_allclose(np.asarray(out), np.asarray(ref_m),
                               rtol=2e-2, atol=2e-2)

    # Semantic sanity check against the full-f32 PyTorch-equivalent reference.
    ref_f32 = jax.block_until_ready(gencoder_ref_f32(g, params))
    np.testing.assert_allclose(np.asarray(out), np.asarray(ref_f32),
                               rtol=6e-2, atol=6e-2)

    print("KERNEL_OK")
</pallas_src>

<mosaic_0001>
module attributes {stable_mosaic.version = 11 : i64} {
  func.func @gencoder_kernel(%arg0: i32, %arg1: memref<8x128xbf16, #tpu.memory_space<vmem>>, %arg2: memref<128x512xbf16, #tpu.memory_space<vmem>>, %arg3: memref<3x512x512xbf16, #tpu.memory_space<vmem>>, %arg4: memref<512x128xbf16, #tpu.memory_space<vmem>>, %arg5: memref<4x512xf32, #tpu.memory_space<vmem>>, %arg6: memref<4x512xf32, #tpu.memory_space<vmem>>, %arg7: memref<4x512xf32, #tpu.memory_space<vmem>>, %arg8: memref<1x128xf32, #tpu.memory_space<vmem>>, %arg9: memref<8x128xf32, #tpu.memory_space<vmem>>) attributes {dimension_semantics = [#tpu.dimension_semantics<parallel>], iteration_bounds = array<i64: 1>, scalar_prefetch = 0 : i64, scratch_operands = 0 : i64, tpu.core_type = #tpu.core_type<tc>, window_params = [{transform_indices = @transform_0, window_bounds = array<i64: 8, 128>}, {pipeline_mode = #tpu.pipeline_mode<synchronous>, transform_indices = @transform_1, window_bounds = array<i64: 128, 512>}, {pipeline_mode = #tpu.pipeline_mode<synchronous>, transform_indices = @transform_2, window_bounds = array<i64: 3, 512, 512>}, {pipeline_mode = #tpu.pipeline_mode<synchronous>, transform_indices = @transform_3, window_bounds = array<i64: 512, 128>}, {pipeline_mode = #tpu.pipeline_mode<synchronous>, transform_indices = @transform_4, window_bounds = array<i64: 4, 512>}, {pipeline_mode = #tpu.pipeline_mode<synchronous>, transform_indices = @transform_5, window_bounds = array<i64: 4, 512>}, {pipeline_mode = #tpu.pipeline_mode<synchronous>, transform_indices = @transform_6, window_bounds = array<i64: 4, 512>}, {pipeline_mode = #tpu.pipeline_mode<synchronous>, transform_indices = @transform_7, window_bounds = array<i64: 1, 128>}, {transform_indices = @transform_8, window_bounds = array<i64: 8, 128>}]} {
    %c0 = arith.constant 0 : index
    %c0_0 = arith.constant 0 : index
    %0 = vector.load %arg1[%c0, %c0_0] : memref<8x128xbf16, #tpu.memory_space<vmem>>, vector<8x128xbf16>
    %c0_1 = arith.constant 0 : index
    %c0_2 = arith.constant 0 : index
    %1 = vector.load %arg2[%c0_1, %c0_2] : memref<128x512xbf16, #tpu.memory_space<vmem>>, vector<128x512xbf16>
    %cst = arith.constant dense<0.000000e+00> : vector<8x512xf32>
    %2 = tpu.matmul %0, %1, %cst {dimension_numbers = #tpu.dot_dimension_numbers<[1], [0], [0], [1], [0, 0, 1, 1], [], []>} : vector<8x128xbf16>, vector<128x512xbf16>, vector<8x512xf32> -> vector<8x512xf32>
    %c0_3 = arith.constant 0 : index
    %c0_4 = arith.constant 0 : index
    %3 = vector.load %arg5[%c0_3, %c0_4] : memref<4x512xf32, #tpu.memory_space<vmem>>, vector<1x512xf32>
    %4 = vector.broadcast %3 : vector<1x512xf32> to vector<8x512xf32>
    %5 = arith.addf %2, %4 : vector<8x512xf32>
    %c0_5 = arith.constant 0 : index
    %c0_6 = arith.constant 0 : index
    %6 = vector.load %arg6[%c0_5, %c0_6] : memref<4x512xf32, #tpu.memory_space<vmem>>, vector<1x512xf32>
    %c0_7 = arith.constant 0 : index
    %c0_8 = arith.constant 0 : index
    %7 = vector.load %arg7[%c0_7, %c0_8] : memref<4x512xf32, #tpu.memory_space<vmem>>, vector<1x512xf32>
    %cst_9 = arith.constant dense<0.000000e+00> : vector<8xf32>
    %8 = vector.multi_reduction <add>, %5, %cst_9 [1] : vector<8x512xf32> to vector<8xf32>
    %9 = vector.shape_cast %8 : vector<8xf32> to vector<8x1xf32>
    %cst_10 = arith.constant 5.120000e+02 : f32
    %10 = vector.broadcast %cst_10 : f32 to vector<8x1xf32>
    %11 = arith.divf %9, %10 : vector<8x1xf32>
    %12 = arith.mulf %5, %5 : vector<8x512xf32>
    %cst_11 = arith.constant dense<0.000000e+00> : vector<8xf32>
    %13 = vector.multi_reduction <add>, %12, %cst_11 [1] : vector<8x512xf32> to vector<8xf32>
    %14 = vector.shape_cast %13 : vector<8xf32> to vector<8x1xf32>
    %cst_12 = arith.constant 5.120000e+02 : f32
    %15 = vector.broadcast %cst_12 : f32 to vector<8x1xf32>
    %16 = arith.divf %14, %15 : vector<8x1xf32>
    %17 = arith.mulf %11, %11 : vector<8x1xf32>
    %18 = arith.subf %16, %17 : vector<8x1xf32>
    %cst_13 = arith.constant 0.000000e+00 : f32
    %19 = vector.broadcast %cst_13 : f32 to vector<8x1xf32>
    %20 = arith.maximumf %18, %19 : vector<8x1xf32>
    %cst_14 = arith.constant 9.99999974E-6 : f32
    %21 = vector.broadcast %cst_14 : f32 to vector<8x1xf32>
    %22 = arith.addf %20, %21 : vector<8x1xf32>
    %23 = math.rsqrt %22 : vector<8x1xf32>
    %24 = vector.broadcast %6 : vector<1x512xf32> to vector<8x512xf32>
    %25 = vector.broadcast %23 : vector<8x1xf32> to vector<8x512xf32>
    %26 = arith.mulf %24, %25 : vector<8x512xf32>
    %27 = vector.broadcast %11 : vector<8x1xf32> to vector<8x512xf32>
    %28 = arith.mulf %27, %26 : vector<8x512xf32>
    %29 = vector.broadcast %7 : vector<1x512xf32> to vector<8x512xf32>
    %30 = arith.subf %29, %28 : vector<8x512xf32>
    %31 = arith.mulf %5, %26 : vector<8x512xf32>
    %32 = arith.addf %31, %30 : vector<8x512xf32>
    %33 = arith.truncf %32 : vector<8x512xf32> to vector<8x512xbf16>
    %34 = arith.negf %33 : vector<8x512xbf16>
    %35 = math.exp %34 : vector<8x512xbf16>
    %cst_15 = arith.constant 1.000000e+00 : bf16
    %36 = vector.broadcast %cst_15 : bf16 to vector<8x512xbf16>
    %37 = arith.addf %36, %35 : vector<8x512xbf16>
    %38 = arith.divf %36, %37 : vector<8x512xbf16>
    %39 = arith.mulf %33, %38 : vector<8x512xbf16>
    %c0_16 = arith.constant 0 : index
    %c0_17 = arith.constant 0 : index
    %c0_18 = arith.constant 0 : index
    %40 = vector.load %arg3[%c0_16, %c0_17, %c0_18] : memref<3x512x512xbf16, #tpu.memory_space<vmem>>, vector<1x512x512xbf16>
    %41 = vector.shape_cast %40 : vector<1x512x512xbf16> to vector<512x512xbf16>
    %cst_19 = arith.constant dense<0.000000e+00> : vector<8x512xf32>
    %42 = tpu.matmul %39, %41, %cst_19 {dimension_numbers = #tpu.dot_dimension_numbers<[1], [0], [0], [1], [0, 0, 1, 1], [], []>} : vector<8x512xbf16>, vector<512x512xbf16>, vector<8x512xf32> -> vector<8x512xf32>
    %c1 = arith.constant 1 : index
    %c0_20 = arith.constant 0 : index
    %43 = vector.load %arg5[%c1, %c0_20] : memref<4x512xf32, #tpu.memory_space<vmem>>, vector<1x512xf32>
    %44 = vector.broadcast %43 : vector<1x512xf32> to vector<8x512xf32>
    %45 = arith.addf %42, %44 : vector<8x512xf32>
    %c1_21 = arith.constant 1 : index
    %c0_22 = arith.constant 0 : index
    %46 = vector.load %arg6[%c1_21, %c0_22] : memref<4x512xf32, #tpu.memory_space<vmem>>, vector<1x512xf32>
    %c1_23 = arith.constant 1 : index
    %c0_24 = arith.constant 0 : index
    %47 = vector.load %arg7[%c1_23, %c0_24] : memref<4x512xf32, #tpu.memory_space<vmem>>, vector<1x512xf32>
    %cst_25 = arith.constant dense<0.000000e+00> : vector<8xf32>
    %48 = vector.multi_reduction <add>, %45, %cst_25 [1] : vector<8x512xf32> to vector<8xf32>
    %49 = vector.shape_cast %48 : vector<8xf32> to vector<8x1xf32>
    %cst_26 = arith.constant 5.120000e+02 : f32
    %50 = vector.broadcast %cst_26 : f32 to vector<8x1xf32>
    %51 = arith.divf %49, %50 : vector<8x1xf32>
    %52 = arith.mulf %45, %45 : vector<8x512xf32>
    %cst_27 = arith.constant dense<0.000000e+00> : vector<8xf32>
    %53 = vector.multi_reduction <add>, %52, %cst_27 [1] : vector<8x512xf32> to vector<8xf32>
    %54 = vector.shape_cast %53 : vector<8xf32> to vector<8x1xf32>
    %cst_28 = arith.constant 5.120000e+02 : f32
    %55 = vector.broadcast %cst_28 : f32 to vector<8x1xf32>
    %56 = arith.divf %54, %55 : vector<8x1xf32>
    %57 = arith.mulf %51, %51 : vector<8x1xf32>
    %58 = arith.subf %56, %57 : vector<8x1xf32>
    %cst_29 = arith.constant 0.000000e+00 : f32
    %59 = vector.broadcast %cst_29 : f32 to vector<8x1xf32>
    %60 = arith.maximumf %58, %59 : vector<8x1xf32>
    %cst_30 = arith.constant 9.99999974E-6 : f32
    %61 = vector.broadcast %cst_30 : f32 to vector<8x1xf32>
    %62 = arith.addf %60, %61 : vector<8x1xf32>
    %63 = math.rsqrt %62 : vector<8x1xf32>
    %64 = vector.broadcast %46 : vector<1x512xf32> to vector<8x512xf32>
    %65 = vector.broadcast %63 : vector<8x1xf32> to vector<8x512xf32>
    %66 = arith.mulf %64, %65 : vector<8x512xf32>
    %67 = vector.broadcast %51 : vector<8x1xf32> to vector<8x512xf32>
    %68 = arith.mulf %67, %66 : vector<8x512xf32>
    %69 = vector.broadcast %47 : vector<1x512xf32> to vector<8x512xf32>
    %70 = arith.subf %69, %68 : vector<8x512xf32>
    %71 = arith.mulf %45, %66 : vector<8x512xf32>
    %72 = arith.addf %71, %70 : vector<8x512xf32>
    %73 = arith.truncf %72 : vector<8x512xf32> to vector<8x512xbf16>
    %74 = arith.negf %73 : vector<8x512xbf16>
    %75 = math.exp %74 : vector<8x512xbf16>
    %cst_31 = arith.constant 1.000000e+00 : bf16
    %76 = vector.broadcast %cst_31 : bf16 to vector<8x512xbf16>
    %77 = arith.addf %76, %75 : vector<8x512xbf16>
    %78 = arith.divf %76, %77 : vector<8x512xbf16>
    %79 = arith.mulf %73, %78 : vector<8x512xbf16>
    %c1_32 = arith.constant 1 : index
    %c0_33 = arith.constant 0 : index
    %c0_34 = arith.constant 0 : index
    %80 = vector.load %arg3[%c1_32, %c0_33, %c0_34] : memref<3x512x512xbf16, #tpu.memory_space<vmem>>, vector<1x512x512xbf16>
    %81 = vector.shape_cast %80 : vector<1x512x512xbf16> to vector<512x512xbf16>
    %cst_35 = arith.constant dense<0.000000e+00> : vector<8x512xf32>
    %82 = tpu.matmul %79, %81, %cst_35 {dimension_numbers = #tpu.dot_dimension_numbers<[1], [0], [0], [1], [0, 0, 1, 1], [], []>} : vector<8x512xbf16>, vector<512x512xbf16>, vector<8x512xf32> -> vector<8x512xf32>
    %c2 = arith.constant 2 : index
    %c0_36 = arith.constant 0 : index
    %83 = vector.load %arg5[%c2, %c0_36] : memref<4x512xf32, #tpu.memory_space<vmem>>, vector<1x512xf32>
    %84 = vector.broadcast %83 : vector<1x512xf32> to vector<8x512xf32>
    %85 = arith.addf %82, %84 : vector<8x512xf32>
    %c2_37 = arith.constant 2 : index
    %c0_38 = arith.constant 0 : index
    %86 = vector.load %arg6[%c2_37, %c0_38] : memref<4x512xf32, #tpu.memory_space<vmem>>, vector<1x512xf32>
    %c2_39 = arith.constant 2 : index
    %c0_40 = arith.constant 0 : index
    %87 = vector.load %arg7[%c2_39, %c0_40] : memref<4x512xf32, #tpu.memory_space<vmem>>, vector<1x512xf32>
    %cst_41 = arith.constant dense<0.000000e+00> : vector<8xf32>
    %88 = vector.multi_reduction <add>, %85, %cst_41 [1] : vector<8x512xf32> to vector<8xf32>
    %89 = vector.shape_cast %88 : vector<8xf32> to vector<8x1xf32>
    %cst_42 = arith.constant 5.120000e+02 : f32
    %90 = vector.broadcast %cst_42 : f32 to vector<8x1xf32>
    %91 = arith.divf %89, %90 : vector<8x1xf32>
    %92 = arith.mulf %85, %85 : vector<8x512xf32>
    %cst_43 = arith.constant dense<0.000000e+00> : vector<8xf32>
    %93 = vector.multi_reduction <add>, %92, %cst_43 [1] : vector<8x512xf32> to vector<8xf32>
    %94 = vector.shape_cast %93 : vector<8xf32> to vector<8x1xf32>
    %cst_44 = arith.constant 5.120000e+02 : f32
    %95 = vector.broadcast %cst_44 : f32 to vector<8x1xf32>
    %96 = arith.divf %94, %95 : vector<8x1xf32>
    %97 = arith.mulf %91, %91 : vector<8x1xf32>
    %98 = arith.subf %96, %97 : vector<8x1xf32>
    %cst_45 = arith.constant 0.000000e+00 : f32
    %99 = vector.broadcast %cst_45 : f32 to vector<8x1xf32>
    %100 = arith.maximumf %98, %99 : vector<8x1xf32>
    %cst_46 = arith.constant 9.99999974E-6 : f32
    %101 = vector.broadcast %cst_46 : f32 to vector<8x1xf32>
    %102 = arith.addf %100, %101 : vector<8x1xf32>
    %103 = math.rsqrt %102 : vector<8x1xf32>
    %104 = vector.broadcast %86 : vector<1x512xf32> to vector<8x512xf32>
    %105 = vector.broadcast %103 : vector<8x1xf32> to vector<8x512xf32>
    %106 = arith.mulf %104, %105 : vector<8x512xf32>
    %107 = vector.broadcast %91 : vector<8x1xf32> to vector<8x512xf32>
    %108 = arith.mulf %107, %106 : vector<8x512xf32>
    %109 = vector.broadcast %87 : vector<1x512xf32> to vector<8x512xf32>
    %110 = arith.subf %109, %108 : vector<8x512xf32>
    %111 = arith.mulf %85, %106 : vector<8x512xf32>
    %112 = arith.addf %111, %110 : vector<8x512xf32>
    %113 = arith.truncf %112 : vector<8x512xf32> to vector<8x512xbf16>
    %114 = arith.negf %113 : vector<8x512xbf16>
    %115 = math.exp %114 : vector<8x512xbf16>
    %cst_47 = arith.constant 1.000000e+00 : bf16
    %116 = vector.broadcast %cst_47 : bf16 to vector<8x512xbf16>
    %117 = arith.addf %116, %115 : vector<8x512xbf16>
    %118 = arith.divf %116, %117 : vector<8x512xbf16>
    %119 = arith.mulf %113, %118 : vector<8x512xbf16>
    %c2_48 = arith.constant 2 : index
    %c0_49 = arith.constant 0 : index
    %c0_50 = arith.constant 0 : index
    %120 = vector.load %arg3[%c2_48, %c0_49, %c0_50] : memref<3x512x512xbf16, #tpu.memory_space<vmem>>, vector<1x512x512xbf16>
    %121 = vector.shape_cast %120 : vector<1x512x512xbf16> to vector<512x512xbf16>
    %cst_51 = arith.constant dense<0.000000e+00> : vector<8x512xf32>
    %122 = tpu.matmul %119, %121, %cst_51 {dimension_numbers = #tpu.dot_dimension_numbers<[1], [0], [0], [1], [0, 0, 1, 1], [], []>} : vector<8x512xbf16>, vector<512x512xbf16>, vector<8x512xf32> -> vector<8x512xf32>
    %c3 = arith.constant 3 : index
    %c0_52 = arith.constant 0 : index
    %123 = vector.load %arg5[%c3, %c0_52] : memref<4x512xf32, #tpu.memory_space<vmem>>, vector<1x512xf32>
    %124 = vector.broadcast %123 : vector<1x512xf32> to vector<8x512xf32>
    %125 = arith.addf %122, %124 : vector<8x512xf32>
    %c3_53 = arith.constant 3 : index
    %c0_54 = arith.constant 0 : index
    %126 = vector.load %arg6[%c3_53, %c0_54] : memref<4x512xf32, #tpu.memory_space<vmem>>, vector<1x512xf32>
    %c3_55 = arith.constant 3 : index
    %c0_56 = arith.constant 0 : index
    %127 = vector.load %arg7[%c3_55, %c0_56] : memref<4x512xf32, #tpu.memory_space<vmem>>, vector<1x512xf32>
    %cst_57 = arith.constant dense<0.000000e+00> : vector<8xf32>
    %128 = vector.multi_reduction <add>, %125, %cst_57 [1] : vector<8x512xf32> to vector<8xf32>
    %129 = vector.shape_cast %128 : vector<8xf32> to vector<8x1xf32>
    %cst_58 = arith.constant 5.120000e+02 : f32
    %130 = vector.broadcast %cst_58 : f32 to vector<8x1xf32>
    %131 = arith.divf %129, %130 : vector<8x1xf32>
    %132 = arith.mulf %125, %125 : vector<8x512xf32>
    %cst_59 = arith.constant dense<0.000000e+00> : vector<8xf32>
    %133 = vector.multi_reduction <add>, %132, %cst_59 [1] : vector<8x512xf32> to vector<8xf32>
    %134 = vector.shape_cast %133 : vector<8xf32> to vector<8x1xf32>
    %cst_60 = arith.constant 5.120000e+02 : f32
    %135 = vector.broadcast %cst_60 : f32 to vector<8x1xf32>
    %136 = arith.divf %134, %135 : vector<8x1xf32>
    %137 = arith.mulf %131, %131 : vector<8x1xf32>
    %138 = arith.subf %136, %137 : vector<8x1xf32>
    %cst_61 = arith.constant 0.000000e+00 : f32
    %139 = vector.broadcast %cst_61 : f32 to vector<8x1xf32>
    %140 = arith.maximumf %138, %139 : vector<8x1xf32>
    %cst_62 = arith.constant 9.99999974E-6 : f32
    %141 = vector.broadcast %cst_62 : f32 to vector<8x1xf32>
    %142 = arith.addf %140, %141 : vector<8x1xf32>
    %143 = math.rsqrt %142 : vector<8x1xf32>
    %144 = vector.broadcast %126 : vector<1x512xf32> to vector<8x512xf32>
    %145 = vector.broadcast %143 : vector<8x1xf32> to vector<8x512xf32>
    %146 = arith.mulf %144, %145 : vector<8x512xf32>
    %147 = vector.broadcast %131 : vector<8x1xf32> to vector<8x512xf32>
    %148 = arith.mulf %147, %146 : vector<8x512xf32>
    %149 = vector.broadcast %127 : vector<1x512xf32> to vector<8x512xf32>
    %150 = arith.subf %149, %148 : vector<8x512xf32>
    %151 = arith.mulf %125, %146 : vector<8x512xf32>
    %152 = arith.addf %151, %150 : vector<8x512xf32>
    %153 = arith.truncf %152 : vector<8x512xf32> to vector<8x512xbf16>
    %154 = arith.negf %153 : vector<8x512xbf16>
    %155 = math.exp %154 : vector<8x512xbf16>
    %cst_63 = arith.constant 1.000000e+00 : bf16
    %156 = vector.broadcast %cst_63 : bf16 to vector<8x512xbf16>
    %157 = arith.addf %156, %155 : vector<8x512xbf16>
    %158 = arith.divf %156, %157 : vector<8x512xbf16>
    %159 = arith.mulf %153, %158 : vector<8x512xbf16>
    %c0_64 = arith.constant 0 : index
    %c0_65 = arith.constant 0 : index
    %160 = vector.load %arg4[%c0_64, %c0_65] : memref<512x128xbf16, #tpu.memory_space<vmem>>, vector<512x128xbf16>
    %cst_66 = arith.constant dense<0.000000e+00> : vector<8x128xf32>
    %161 = tpu.matmul %159, %160, %cst_66 {dimension_numbers = #tpu.dot_dimension_numbers<[1], [0], [0], [1], [0, 0, 1, 1], [], []>} : vector<8x512xbf16>, vector<512x128xbf16>, vector<8x128xf32> -> vector<8x128xf32>
    %c0_67 = arith.constant 0 : index
    %c0_68 = arith.constant 0 : index
    %162 = vector.load %arg8[%c0_67, %c0_68] : memref<1x128xf32, #tpu.memory_space<vmem>>, vector<1x128xf32>
    %163 = vector.broadcast %162 : vector<1x128xf32> to vector<8x128xf32>
    %164 = arith.addf %161, %163 : vector<8x128xf32>
    %c0_69 = arith.constant 0 : index
    %c0_70 = arith.constant 0 : index
    %165 = vector.load %arg9[%c0_69, %c0_70] : memref<8x128xf32, #tpu.memory_space<vmem>>, vector<8x128xf32>
    tpu.vector_store %arg9[%c0_69, %c0_70], %164 {strides = array<i32>} : memref<8x128xf32, #tpu.memory_space<vmem>>, vector<8x128xf32>,
    return
  }
  func.func @transform_0(%arg0: i32) -> (i32, i32) {
    %c0_i32 = arith.constant 0 : i32
    %c0_i32_0 = arith.constant 0 : i32
    return %arg0, %c0_i32 : i32, i32
  }
  func.func @transform_1(%arg0: i32) -> (i32, i32) {
    %c0_i32 = arith.constant 0 : i32
    %c0_i32_0 = arith.constant 0 : i32
    %c0_i32_1 = arith.constant 0 : i32
    return %c0_i32, %c0_i32_0 : i32, i32
  }
  func.func @transform_2(%arg0: i32) -> (i32, i32, i32) {
    %c0_i32 = arith.constant 0 : i32
    %c0_i32_0 = arith.constant 0 : i32
    %c0_i32_1 = arith.constant 0 : i32
    %c0_i32_2 = arith.constant 0 : i32
    return %c0_i32, %c0_i32_0, %c0_i32_1 : i32, i32, i32
  }
  func.func @transform_3(%arg0: i32) -> (i32, i32) {
    %c0_i32 = arith.constant 0 : i32
    %c0_i32_0 = arith.constant 0 : i32
    %c0_i32_1 = arith.constant 0 : i32
    return %c0_i32, %c0_i32_0 : i32, i32
  }
  func.func @transform_4(%arg0: i32) -> (i32, i32) {
    %c0_i32 = arith.constant 0 : i32
    %c0_i32_0 = arith.constant 0 : i32
    %c0_i32_1 = arith.constant 0 : i32
    return %c0_i32, %c0_i32_0 : i32, i32
  }
  func.func @transform_5(%arg0: i32) -> (i32, i32) {
    %c0_i32 = arith.constant 0 : i32
    %c0_i32_0 = arith.constant 0 : i32
    %c0_i32_1 = arith.constant 0 : i32
    return %c0_i32, %c0_i32_0 : i32, i32
  }
  func.func @transform_6(%arg0: i32) -> (i32, i32) {
    %c0_i32 = arith.constant 0 : i32
    %c0_i32_0 = arith.constant 0 : i32
    %c0_i32_1 = arith.constant 0 : i32
    return %c0_i32, %c0_i32_0 : i32, i32
  }
  func.func @transform_7(%arg0: i32) -> (i32, i32) {
    %c0_i32 = arith.constant 0 : i32
    %c0_i32_0 = arith.constant 0 : i32
    %c0_i32_1 = arith.constant 0 : i32
    return %c0_i32, %c0_i32_0 : i32, i32
  }
  func.func @transform_8(%arg0: i32) -> (i32, i32) {
    %c0_i32 = arith.constant 0 : i32
    %c0_i32_0 = arith.constant 0 : i32
    return %arg0, %c0_i32 : i32, i32
  }
}

module attributes {stable_mosaic.version = 11 : i64} {
  func.func @gencoder_kernel(%arg0: i32, %arg1: memref<8x128xbf16, #tpu.memory_space<vmem>>, %arg2: memref<128x512xbf16, #tpu.memory_space<vmem>>, %arg3: memref<3x512x512xbf16, #tpu.memory_space<vmem>>, %arg4: memref<512x128xbf16, #tpu.memory_space<vmem>>, %arg5: memref<4x512xf32, #tpu.memory_space<vmem>>, %arg6: memref<4x512xf32, #tpu.memory_space<vmem>>, %arg7: memref<4x512xf32, #tpu.memory_space<vmem>>, %arg8: memref<1x128xf32, #tpu.memory_space<vmem>>, %arg9: memref<8x128xf32, #tpu.memory_space<vmem>>) attributes {dimension_semantics = [#tpu.dimension_semantics<parallel>], iteration_bounds = array<i64: 1>, scalar_prefetch = 0 : i64, scratch_operands = 0 : i64, tpu.core_type = #tpu.core_type<tc>, window_params = [{transform_indices = @transform_0, window_bounds = array<i64: 8, 128>}, {pipeline_mode = #tpu.pipeline_mode<synchronous>, transform_indices = @transform_1, window_bounds = array<i64: 128, 512>}, {pipeline_mode = #tpu.pipeline_mode<synchronous>, transform_indices = @transform_2, window_bounds = array<i64: 3, 512, 512>}, {pipeline_mode = #tpu.pipeline_mode<synchronous>, transform_indices = @transform_3, window_bounds = array<i64: 512, 128>}, {pipeline_mode = #tpu.pipeline_mode<synchronous>, transform_indices = @transform_4, window_bounds = array<i64: 4, 512>}, {pipeline_mode = #tpu.pipeline_mode<synchronous>, transform_indices = @transform_5, window_bounds = array<i64: 4, 512>}, {pipeline_mode = #tpu.pipeline_mode<synchronous>, transform_indices = @transform_6, window_bounds = array<i64: 4, 512>}, {pipeline_mode = #tpu.pipeline_mode<synchronous>, transform_indices = @transform_7, window_bounds = array<i64: 1, 128>}, {transform_indices = @transform_8, window_bounds = array<i64: 8, 128>}]} {
    %c0 = arith.constant 0 : index
    %c0_0 = arith.constant 0 : index
    %0 = vector.load %arg1[%c0, %c0_0] : memref<8x128xbf16, #tpu.memory_space<vmem>>, vector<8x128xbf16>
    %c0_1 = arith.constant 0 : index
    %c0_2 = arith.constant 0 : index
    %1 = vector.load %arg2[%c0_1, %c0_2] : memref<128x512xbf16, #tpu.memory_space<vmem>>, vector<128x512xbf16>
    %cst = arith.constant dense<0.000000e+00> : vector<8x512xf32>
    %2 = tpu.matmul %0, %1, %cst {dimension_numbers = #tpu.dot_dimension_numbers<[1], [0], [0], [1], [0, 0, 1, 1], [], []>} : vector<8x128xbf16>, vector<128x512xbf16>, vector<8x512xf32> -> vector<8x512xf32>
    %c0_3 = arith.constant 0 : index
    %c0_4 = arith.constant 0 : index
    %3 = vector.load %arg5[%c0_3, %c0_4] : memref<4x512xf32, #tpu.memory_space<vmem>>, vector<1x512xf32>
    %4 = vector.broadcast %3 : vector<1x512xf32> to vector<8x512xf32>
    %5 = arith.addf %2, %4 : vector<8x512xf32>
    %c0_5 = arith.constant 0 : index
    %c0_6 = arith.constant 0 : index
    %6 = vector.load %arg6[%c0_5, %c0_6] : memref<4x512xf32, #tpu.memory_space<vmem>>, vector<1x512xf32>
    %c0_7 = arith.constant 0 : index
    %c0_8 = arith.constant 0 : index
    %7 = vector.load %arg7[%c0_7, %c0_8] : memref<4x512xf32, #tpu.memory_space<vmem>>, vector<1x512xf32>
    %cst_9 = arith.constant dense<0.000000e+00> : vector<8xf32>
    %8 = vector.multi_reduction <add>, %5, %cst_9 [1] : vector<8x512xf32> to vector<8xf32>
    %9 = vector.shape_cast %8 : vector<8xf32> to vector<8x1xf32>
    %cst_10 = arith.constant 5.120000e+02 : f32
    %10 = vector.broadcast %cst_10 : f32 to vector<8x1xf32>
    %11 = arith.divf %9, %10 : vector<8x1xf32>
    %12 = arith.mulf %5, %5 : vector<8x512xf32>
    %cst_11 = arith.constant dense<0.000000e+00> : vector<8xf32>
    %13 = vector.multi_reduction <add>, %12, %cst_11 [1] : vector<8x512xf32> to vector<8xf32>
    %14 = vector.shape_cast %13 : vector<8xf32> to vector<8x1xf32>
    %cst_12 = arith.constant 5.120000e+02 : f32
    %15 = vector.broadcast %cst_12 : f32 to vector<8x1xf32>
    %16 = arith.divf %14, %15 : vector<8x1xf32>
    %17 = arith.mulf %11, %11 : vector<8x1xf32>
    %18 = arith.subf %16, %17 : vector<8x1xf32>
    %cst_13 = arith.constant 0.000000e+00 : f32
    %19 = vector.broadcast %cst_13 : f32 to vector<8x1xf32>
    %20 = arith.maximumf %18, %19 : vector<8x1xf32>
    %cst_14 = arith.constant 9.99999974E-6 : f32
    %21 = vector.broadcast %cst_14 : f32 to vector<8x1xf32>
    %22 = arith.addf %20, %21 : vector<8x1xf32>
    %23 = math.rsqrt %22 : vector<8x1xf32>
    %24 = vector.broadcast %6 : vector<1x512xf32> to vector<8x512xf32>
    %25 = vector.broadcast %23 : vector<8x1xf32> to vector<8x512xf32>
    %26 = arith.mulf %24, %25 : vector<8x512xf32>
    %27 = vector.broadcast %11 : vector<8x1xf32> to vector<8x512xf32>
    %28 = arith.mulf %27, %26 : vector<8x512xf32>
    %29 = vector.broadcast %7 : vector<1x512xf32> to vector<8x512xf32>
    %30 = arith.subf %29, %28 : vector<8x512xf32>
    %31 = arith.mulf %5, %26 : vector<8x512xf32>
    %32 = arith.addf %31, %30 : vector<8x512xf32>
    %33 = arith.truncf %32 : vector<8x512xf32> to vector<8x512xbf16>
    %34 = arith.negf %33 : vector<8x512xbf16>
    %35 = math.exp %34 : vector<8x512xbf16>
    %cst_15 = arith.constant 1.000000e+00 : bf16
    %36 = vector.broadcast %cst_15 : bf16 to vector<8x512xbf16>
    %37 = arith.addf %36, %35 : vector<8x512xbf16>
    %38 = arith.divf %36, %37 : vector<8x512xbf16>
    %39 = arith.mulf %33, %38 : vector<8x512xbf16>
    %c0_16 = arith.constant 0 : index
    %c0_17 = arith.constant 0 : index
    %c0_18 = arith.constant 0 : index
    %40 = vector.load %arg3[%c0_16, %c0_17, %c0_18] : memref<3x512x512xbf16, #tpu.memory_space<vmem>>, vector<1x512x512xbf16>
    %41 = vector.shape_cast %40 : vector<1x512x512xbf16> to vector<512x512xbf16>
    %cst_19 = arith.constant dense<0.000000e+00> : vector<8x512xf32>
    %42 = tpu.matmul %39, %41, %cst_19 {dimension_numbers = #tpu.dot_dimension_numbers<[1], [0], [0], [1], [0, 0, 1, 1], [], []>} : vector<8x512xbf16>, vector<512x512xbf16>, vector<8x512xf32> -> vector<8x512xf32>
    %c1 = arith.constant 1 : index
    %c0_20 = arith.constant 0 : index
    %43 = vector.load %arg5[%c1, %c0_20] : memref<4x512xf32, #tpu.memory_space<vmem>>, vector<1x512xf32>
    %44 = vector.broadcast %43 : vector<1x512xf32> to vector<8x512xf32>
    %45 = arith.addf %42, %44 : vector<8x512xf32>
    %c1_21 = arith.constant 1 : index
    %c0_22 = arith.constant 0 : index
    %46 = vector.load %arg6[%c1_21, %c0_22] : memref<4x512xf32, #tpu.memory_space<vmem>>, vector<1x512xf32>
    %c1_23 = arith.constant 1 : index
    %c0_24 = arith.constant 0 : index
    %47 = vector.load %arg7[%c1_23, %c0_24] : memref<4x512xf32, #tpu.memory_space<vmem>>, vector<1x512xf32>
    %cst_25 = arith.constant dense<0.000000e+00> : vector<8xf32>
    %48 = vector.multi_reduction <add>, %45, %cst_25 [1] : vector<8x512xf32> to vector<8xf32>
    %49 = vector.shape_cast %48 : vector<8xf32> to vector<8x1xf32>
    %cst_26 = arith.constant 5.120000e+02 : f32
    %50 = vector.broadcast %cst_26 : f32 to vector<8x1xf32>
    %51 = arith.divf %49, %50 : vector<8x1xf32>
    %52 = arith.mulf %45, %45 : vector<8x512xf32>
    %cst_27 = arith.constant dense<0.000000e+00> : vector<8xf32>
    %53 = vector.multi_reduction <add>, %52, %cst_27 [1] : vector<8x512xf32> to vector<8xf32>
    %54 = vector.shape_cast %53 : vector<8xf32> to vector<8x1xf32>
    %cst_28 = arith.constant 5.120000e+02 : f32
    %55 = vector.broadcast %cst_28 : f32 to vector<8x1xf32>
    %56 = arith.divf %54, %55 : vector<8x1xf32>
    %57 = arith.mulf %51, %51 : vector<8x1xf32>
    %58 = arith.subf %56, %57 : vector<8x1xf32>
    %cst_29 = arith.constant 0.000000e+00 : f32
    %59 = vector.broadcast %cst_29 : f32 to vector<8x1xf32>
    %60 = arith.maximumf %58, %59 : vector<8x1xf32>
    %cst_30 = arith.constant 9.99999974E-6 : f32
    %61 = vector.broadcast %cst_30 : f32 to vector<8x1xf32>
    %62 = arith.addf %60, %61 : vector<8x1xf32>
    %63 = math.rsqrt %62 : vector<8x1xf32>
    %64 = vector.broadcast %46 : vector<1x512xf32> to vector<8x512xf32>
    %65 = vector.broadcast %63 : vector<8x1xf32> to vector<8x512xf32>
    %66 = arith.mulf %64, %65 : vector<8x512xf32>
    %67 = vector.broadcast %51 : vector<8x1xf32> to vector<8x512xf32>
    %68 = arith.mulf %67, %66 : vector<8x512xf32>
    %69 = vector.broadcast %47 : vector<1x512xf32> to vector<8x512xf32>
    %70 = arith.subf %69, %68 : vector<8x512xf32>
    %71 = arith.mulf %45, %66 : vector<8x512xf32>
    %72 = arith.addf %71, %70 : vector<8x512xf32>
    %73 = arith.truncf %72 : vector<8x512xf32> to vector<8x512xbf16>
    %74 = arith.negf %73 : vector<8x512xbf16>
    %75 = math.exp %74 : vector<8x512xbf16>
    %cst_31 = arith.constant 1.000000e+00 : bf16
    %76 = vector.broadcast %cst_31 : bf16 to vector<8x512xbf16>
    %77 = arith.addf %76, %75 : vector<8x512xbf16>
    %78 = arith.divf %76, %77 : vector<8x512xbf16>
    %79 = arith.mulf %73, %78 : vector<8x512xbf16>
    %c1_32 = arith.constant 1 : index
    %c0_33 = arith.constant 0 : index
    %c0_34 = arith.constant 0 : index
    %80 = vector.load %arg3[%c1_32, %c0_33, %c0_34] : memref<3x512x512xbf16, #tpu.memory_space<vmem>>, vector<1x512x512xbf16>
    %81 = vector.shape_cast %80 : vector<1x512x512xbf16> to vector<512x512xbf16>
    %cst_35 = arith.constant dense<0.000000e+00> : vector<8x512xf32>
    %82 = tpu.matmul %79, %81, %cst_35 {dimension_numbers = #tpu.dot_dimension_numbers<[1], [0], [0], [1], [0, 0, 1, 1], [], []>} : vector<8x512xbf16>, vector<512x512xbf16>, vector<8x512xf32> -> vector<8x512xf32>
    %c2 = arith.constant 2 : index
    %c0_36 = arith.constant 0 : index
    %83 = vector.load %arg5[%c2, %c0_36] : memref<4x512xf32, #tpu.memory_space<vmem>>, vector<1x512xf32>
    %84 = vector.broadcast %83 : vector<1x512xf32> to vector<8x512xf32>
    %85 = arith.addf %82, %84 : vector<8x512xf32>
    %c2_37 = arith.constant 2 : index
    %c0_38 = arith.constant 0 : index
    %86 = vector.load %arg6[%c2_37, %c0_38] : memref<4x512xf32, #tpu.memory_space<vmem>>, vector<1x512xf32>
    %c2_39 = arith.constant 2 : index
    %c0_40 = arith.constant 0 : index
    %87 = vector.load %arg7[%c2_39, %c0_40] : memref<4x512xf32, #tpu.memory_space<vmem>>, vector<1x512xf32>
    %cst_41 = arith.constant dense<0.000000e+00> : vector<8xf32>
    %88 = vector.multi_reduction <add>, %85, %cst_41 [1] : vector<8x512xf32> to vector<8xf32>
    %89 = vector.shape_cast %88 : vector<8xf32> to vector<8x1xf32>
    %cst_42 = arith.constant 5.120000e+02 : f32
    %90 = vector.broadcast %cst_42 : f32 to vector<8x1xf32>
    %91 = arith.divf %89, %90 : vector<8x1xf32>
    %92 = arith.mulf %85, %85 : vector<8x512xf32>
    %cst_43 = arith.constant dense<0.000000e+00> : vector<8xf32>
    %93 = vector.multi_reduction <add>, %92, %cst_43 [1] : vector<8x512xf32> to vector<8xf32>
    %94 = vector.shape_cast %93 : vector<8xf32> to vector<8x1xf32>
    %cst_44 = arith.constant 5.120000e+02 : f32
    %95 = vector.broadcast %cst_44 : f32 to vector<8x1xf32>
    %96 = arith.divf %94, %95 : vector<8x1xf32>
    %97 = arith.mulf %91, %91 : vector<8x1xf32>
    %98 = arith.subf %96, %97 : vector<8x1xf32>
    %cst_45 = arith.constant 0.000000e+00 : f32
    %99 = vector.broadcast %cst_45 : f32 to vector<8x1xf32>
    %100 = arith.maximumf %98, %99 : vector<8x1xf32>
    %cst_46 = arith.constant 9.99999974E-6 : f32
    %101 = vector.broadcast %cst_46 : f32 to vector<8x1xf32>
    %102 = arith.addf %100, %101 : vector<8x1xf32>
    %103 = math.rsqrt %102 : vector<8x1xf32>
    %104 = vector.broadcast %86 : vector<1x512xf32> to vector<8x512xf32>
    %105 = vector.broadcast %103 : vector<8x1xf32> to vector<8x512xf32>
    %106 = arith.mulf %104, %105 : vector<8x512xf32>
    %107 = vector.broadcast %91 : vector<8x1xf32> to vector<8x512xf32>
    %108 = arith.mulf %107, %106 : vector<8x512xf32>
    %109 = vector.broadcast %87 : vector<1x512xf32> to vector<8x512xf32>
    %110 = arith.subf %109, %108 : vector<8x512xf32>
    %111 = arith.mulf %85, %106 : vector<8x512xf32>
    %112 = arith.addf %111, %110 : vector<8x512xf32>
    %113 = arith.truncf %112 : vector<8x512xf32> to vector<8x512xbf16>
    %114 = arith.negf %113 : vector<8x512xbf16>
    %115 = math.exp %114 : vector<8x512xbf16>
    %cst_47 = arith.constant 1.000000e+00 : bf16
    %116 = vector.broadcast %cst_47 : bf16 to vector<8x512xbf16>
    %117 = arith.addf %116, %115 : vector<8x512xbf16>
    %118 = arith.divf %116, %117 : vector<8x512xbf16>
    %119 = arith.mulf %113, %118 : vector<8x512xbf16>
    %c2_48 = arith.constant 2 : index
    %c0_49 = arith.constant 0 : index
    %c0_50 = arith.constant 0 : index
    %120 = vector.load %arg3[%c2_48, %c0_49, %c0_50] : memref<3x512x512xbf16, #tpu.memory_space<vmem>>, vector<1x512x512xbf16>
    %121 = vector.shape_cast %120 : vector<1x512x512xbf16> to vector<512x512xbf16>
    %cst_51 = arith.constant dense<0.000000e+00> : vector<8x512xf32>
    %122 = tpu.matmul %119, %121, %cst_51 {dimension_numbers = #tpu.dot_dimension_numbers<[1], [0], [0], [1], [0, 0, 1, 1], [], []>} : vector<8x512xbf16>, vector<512x512xbf16>, vector<8x512xf32> -> vector<8x512xf32>
    %c3 = arith.constant 3 : index
    %c0_52 = arith.constant 0 : index
    %123 = vector.load %arg5[%c3, %c0_52] : memref<4x512xf32, #tpu.memory_space<vmem>>, vector<1x512xf32>
    %124 = vector.broadcast %123 : vector<1x512xf32> to vector<8x512xf32>
    %125 = arith.addf %122, %124 : vector<8x512xf32>
    %c3_53 = arith.constant 3 : index
    %c0_54 = arith.constant 0 : index
    %126 = vector.load %arg6[%c3_53, %c0_54] : memref<4x512xf32, #tpu.memory_space<vmem>>, vector<1x512xf32>
    %c3_55 = arith.constant 3 : index
    %c0_56 = arith.constant 0 : index
    %127 = vector.load %arg7[%c3_55, %c0_56] : memref<4x512xf32, #tpu.memory_space<vmem>>, vector<1x512xf32>
    %cst_57 = arith.constant dense<0.000000e+00> : vector<8xf32>
    %128 = vector.multi_reduction <add>, %125, %cst_57 [1] : vector<8x512xf32> to vector<8xf32>
    %129 = vector.shape_cast %128 : vector<8xf32> to vector<8x1xf32>
    %cst_58 = arith.constant 5.120000e+02 : f32
    %130 = vector.broadcast %cst_58 : f32 to vector<8x1xf32>
    %131 = arith.divf %129, %130 : vector<8x1xf32>
    %132 = arith.mulf %125, %125 : vector<8x512xf32>
    %cst_59 = arith.constant dense<0.000000e+00> : vector<8xf32>
    %133 = vector.multi_reduction <add>, %132, %cst_59 [1] : vector<8x512xf32> to vector<8xf32>
    %134 = vector.shape_cast %133 : vector<8xf32> to vector<8x1xf32>
    %cst_60 = arith.constant 5.120000e+02 : f32
    %135 = vector.broadcast %cst_60 : f32 to vector<8x1xf32>
    %136 = arith.divf %134, %135 : vector<8x1xf32>
    %137 = arith.mulf %131, %131 : vector<8x1xf32>
    %138 = arith.subf %136, %137 : vector<8x1xf32>
    %cst_61 = arith.constant 0.000000e+00 : f32
    %139 = vector.broadcast %cst_61 : f32 to vector<8x1xf32>
    %140 = arith.maximumf %138, %139 : vector<8x1xf32>
    %cst_62 = arith.constant 9.99999974E-6 : f32
    %141 = vector.broadcast %cst_62 : f32 to vector<8x1xf32>
    %142 = arith.addf %140, %141 : vector<8x1xf32>
    %143 = math.rsqrt %142 : vector<8x1xf32>
    %144 = vector.broadcast %126 : vector<1x512xf32> to vector<8x512xf32>
    %145 = vector.broadcast %143 : vector<8x1xf32> to vector<8x512xf32>
    %146 = arith.mulf %144, %145 : vector<8x512xf32>
    %147 = vector.broadcast %131 : vector<8x1xf32> to vector<8x512xf32>
    %148 = arith.mulf %147, %146 : vector<8x512xf32>
    %149 = vector.broadcast %127 : vector<1x512xf32> to vector<8x512xf32>
    %150 = arith.subf %149, %148 : vector<8x512xf32>
    %151 = arith.mulf %125, %146 : vector<8x512xf32>
    %152 = arith.addf %151, %150 : vector<8x512xf32>
    %153 = arith.truncf %152 : vector<8x512xf32> to vector<8x512xbf16>
    %154 = arith.negf %153 : vector<8x512xbf16>
    %155 = math.exp %154 : vector<8x512xbf16>
    %cst_63 = arith.constant 1.000000e+00 : bf16
    %156 = vector.broadcast %cst_63 : bf16 to vector<8x512xbf16>
    %157 = arith.addf %156, %155 : vector<8x512xbf16>
    %158 = arith.divf %156, %157 : vector<8x512xbf16>
    %159 = arith.mulf %153, %158 : vector<8x512xbf16>
    %c0_64 = arith.constant 0 : index
    %c0_65 = arith.constant 0 : index
    %160 = vector.load %arg4[%c0_64, %c0_65] : memref<512x128xbf16, #tpu.memory_space<vmem>>, vector<512x128xbf16>
    %cst_66 = arith.constant dense<0.000000e+00> : vector<8x128xf32>
    %161 = tpu.matmul %159, %160, %cst_66 {dimension_numbers = #tpu.dot_dimension_numbers<[1], [0], [0], [1], [0, 0, 1, 1], [], []>} : vector<8x512xbf16>, vector<512x128xbf16>, vector<8x128xf32> -> vector<8x128xf32>
    %c0_67 = arith.constant 0 : index
    %c0_68 = arith.constant 0 : index
    %162 = vector.load %arg8[%c0_67, %c0_68] : memref<1x128xf32, #tpu.memory_space<vmem>>, vector<1x128xf32>
    %163 = vector.broadcast %162 : vector<1x128xf32> to vector<8x128xf32>
    %164 = arith.addf %161, %163 : vector<8x128xf32>
    %c0_69 = arith.constant 0 : index
    %c0_70 = arith.constant 0 : index
    %165 = vector.load %arg9[%c0_69, %c0_70] : memref<8x128xf32, #tpu.memory_space<vmem>>, vector<8x128xf32>
    tpu.vector_store %arg9[%c0_69, %c0_70], %164 {strides = array<i32>} : memref<8x128xf32, #tpu.memory_space<vmem>>, vector<8x128xf32>,
    return
  }
  func.func @transform_0(%arg0: i32) -> (i32, i32) {
    %c0_i32 = arith.constant 0 : i32
    %c0_i32_0 = arith.constant 0 : i32
    return %arg0, %c0_i32 : i32, i32
  }
  func.func @transform_1(%arg0: i32) -> (i32, i32) {
    %c0_i32 = arith.constant 0 : i32
    %c0_i32_0 = arith.constant 0 : i32
    %c0_i32_1 = arith.constant 0 : i32
    return %c0_i32, %c0_i32_0 : i32, i32
  }
  func.func @transform_2(%arg0: i32) -> (i32, i32, i32) {
    %c0_i32 = arith.constant 0 : i32
    %c0_i32_0 = arith.constant 0 : i32
    %c0_i32_1 = arith.constant 0 : i32
    %c0_i32_2 = arith.constant 0 : i32
    return %c0_i32, %c0_i32_0, %c0_i32_1 : i32, i32, i32
  }
  func.func @transform_3(%arg0: i32) -> (i32, i32) {
    %c0_i32 = arith.constant 0 : i32
    %c0_i32_0 = arith.constant 0 : i32
    %c0_i32_1 = arith.constant 0 : i32
    return %c0_i32, %c0_i32_0 : i32, i32
  }
  func.func @transform_4(%arg0: i32) -> (i32, i32) {
    %c0_i32 = arith.constant 0 : i32
    %c0_i32_0 = arith.constant 0 : i32
    %c0_i32_1 = arith.constant 0 : i32
    return %c0_i32, %c0_i32_0 : i32, i32
  }
  func.func @transform_5(%arg0: i32) -> (i32, i32) {
    %c0_i32 = arith.constant 0 : i32
    %c0_i32_0 = arith.constant 0 : i32
    %c0_i32_1 = arith.constant 0 : i32
    return %c0_i32, %c0_i32_0 : i32, i32
  }
  func.func @transform_6(%arg0: i32) -> (i32, i32) {
    %c0_i32 = arith.constant 0 : i32
    %c0_i32_0 = arith.constant 0 : i32
    %c0_i32_1 = arith.constant 0 : i32
    return %c0_i32, %c0_i32_0 : i32, i32
  }
  func.func @transform_7(%arg0: i32) -> (i32, i32) {
    %c0_i32 = arith.constant 0 : i32
    %c0_i32_0 = arith.constant 0 : i32
    %c0_i32_1 = arith.constant 0 : i32
    return %c0_i32, %c0_i32_0 : i32, i32
  }
  func.func @transform_8(%arg0: i32) -> (i32, i32) {
    %c0_i32 = arith.constant 0 : i32
    %c0_i32_0 = arith.constant 0 : i32
    return %arg0, %c0_i32 : i32, i32
  }
}

</mosaic_0001>

<bundles_post_ra>
// kernel: tpu_custom_call.1
= control target key start
LH: loop header
LB: loop body
LE: loop exit
PB: predicated region body
PF: predicated region fallthrough
CT: control target
= control target key end

     0   :  { %13 = vsyncpa [#allocation3], 0  ;;  %s5860_s0 = inlined_call_operand.hbm [shape: bf16[8,128], index: 0, kind: input, shape index: {}]   ;;  %s5861_s1 = inlined_call_operand.hbm [shape: bf16[128,512], index: 1, kind: input, shape index: {}]   ;;  %s5862_s2 = inlined_call_operand.hbm [shape: bf16[3,512,512], index: 2, kind: input, shape index: {}]   ;;  %s5863_s3 = inlined_call_operand.hbm [shape: bf16[512,128], index: 3, kind: input, shape index: {}]   ;;  %s5864_s4 = inlined_call_operand.hbm [shape: f32[4,512], index: 4, kind: input, shape index: {}]   ;;  %s5865_s5 = inlined_call_operand.hbm [shape: f32[4,512], index: 5, kind: input, shape index: {}]   ;;  %s5866_s6 = inlined_call_operand.hbm [shape: f32[4,512], index: 6, kind: input, shape index: {}]   ;;  %s5867_s7 = inlined_call_operand.hbm [shape: f32[1,128], index: 7, kind: input, shape index: {}]   ;;  %s5868_s8 = inlined_call_operand.hbm [shape: f32[8,128], index: 8, kind: output, shape index: {}]  }
   0x1   :  { %14 = vsyncpa [#allocation6], 0 }
   0x2   :  { %15 = vsyncpa [#allocation9], 0 }
   0x3   :  { %16 = vsyncpa [#allocation12], 0 }
   0x4   :  { %17 = vsyncpa [#allocation15], 0 }
   0x5   :  { %18 = vsyncpa [#allocation4], 0  ;;  %s5592_s27 = smov [#allocation5]  }
   0x6   :  { %s34_s28 = sshll.u32 %s5592_s27, 4  ;;  %s35_s28 = int_to_ptr.vmem [resolvable:$true] %s34_s28 }
   0x7   :  { %s5408_s29 = scalar_lea.vmem %s35_s28, 4096  ;;  %p5413_p1 = scmp.lt.s32.totalorder %s35_s28, %s35_s28 }
   0x8   :  { %p5409_p0 = scmp.ne.s32.totalorder %s35_s28, %s5408_s29  ;;  %p5414_p2 = scmp.lt.s32.totalorder %s5408_s29, %s5408_s29 }
   0xa   :  { %p5415_p3 = por %p5414_p2, %p5413_p1 }
   0xc   :  { %p5416_p4 = pnand %p5415_p3, %p5409_p0 }
   0xe   :  { %5419 = shalt.err (!%p5416_p4)
}
   0xf   :  { %s5593_s30 = smov 256   ;;  %s5594_s9 = smov 16  }
  0x10   :  { %40 = dma.hbm_to_vmem [thread:$0]  %s5861_s1, 4096, %s35_s28, [#allocation6], %s5593_s30, %s5593_s30, %s5594_s9  }
  0x11   :  { %s5595_s12 = smov [#allocation8]  }
  0x12   :  { %s58_s13 = sshll.u32 %s5595_s12, 4  ;;  %s59_s13 = int_to_ptr.vmem [resolvable:$true] %s58_s13 }
  0x13   :  { %s5428_s14 = scalar_lea.vmem %s59_s13, 4096  ;;  %p5433_p6 = scmp.lt.s32.totalorder %s59_s13, %s59_s13 }
  0x14   :  { %p5429_p5 = scmp.ne.s32.totalorder %s59_s13, %s5428_s14  ;;  %p5434_p7 = scmp.lt.s32.totalorder %s5428_s14, %s5428_s14 }
  0x16   :  { %p5435_p8 = por %p5434_p7, %p5433_p6 }
  0x18   :  { %p5436_p9 = pnand %p5435_p8, %p5429_p5 }
  0x1a   :  { %5439 = shalt.err (!%p5436_p9)
}
  0x1b   :  { %s5596_s15 = smov 64   ;;  %s5597_s16 = smov 4  }
  0x1c   :  { %64 = dma.hbm_to_vmem [thread:$0]  %s5863_s3, 4096, %s59_s13, [#allocation9], %s5596_s15, %s5596_s15, %s5597_s16  }
  0x1d   :  { %s5598_s19 = smov [#allocation11]   ;;  %s5599_s21 = smov [#allocation2]  }
  0x1e   :  { %s81_s20 = sshll.u32 %s5598_s19, 4  ;;  %s25_s1 = sshll.u32 %s5599_s21, 4  ;;  %s82_s20 = int_to_ptr.vmem [resolvable:$true] %s81_s20  ;;  %s26_s1 = int_to_ptr.vmem [resolvable:$true] %s25_s1 }
  0x1f   :  { %s5448_s22 = scalar_lea.vmem %s82_s20, 256  ;;  %p5453_p11 = scmp.lt.s32.totalorder %s82_s20, %s82_s20 }
  0x20   :  { %p5449_p10 = scmp.ne.s32.totalorder %s82_s20, %s5448_s22  ;;  %p5454_p12 = scmp.lt.s32.totalorder %s5448_s22, %s5448_s22 }
  0x22   :  { %p5455_p13 = por %p5454_p12, %p5453_p11 }
  0x24   :  { %p5456_p0 = pnand %p5455_p13, %p5449_p10 }
  0x26   :  { %5459 = shalt.err (!%p5456_p0)
}
  0x27   :  { %84 = dma.hbm_to_vmem [thread:$0]  %s5865_s5, 256, %s82_s20, [#allocation12]  }
  0x28   :  { %s5468_s25 = scalar_lea.vmem %s26_s1, 64  ;;  %p5473_p2 = scmp.lt.s32.totalorder %s26_s1, %s26_s1 }
  0x29   :  { %p5469_p1 = scmp.ne.s32.totalorder %s26_s1, %s5468_s25  ;;  %p5474_p3 = scmp.lt.s32.totalorder %s5468_s25, %s5468_s25 }
  0x2b   :  { %p5475_p4 = por %p5474_p3, %p5473_p2 }
  0x2d   :  { %p5476_p5 = pnand %p5475_p4, %p5469_p1 }
  0x2f   :  { %5479 = shalt.err (!%p5476_p5)
}
  0x30   :  { %28 = dma.hbm_to_vmem [thread:$0]  %s5860_s0, 64, %s26_s1, [#allocation3]  }
  0x31   :  { %s5600_s27 = smov [#allocation7]   ;;  %s5601_s29 = smov [#allocation10]  }
  0x32   :  { %s46_s28 = sshll.u32 %s5600_s27, 4  ;;  %s71_s10 = sshll.u32 %s5601_s29, 4  ;;  %s47_s28 = int_to_ptr.vmem [resolvable:$true] %s46_s28  ;;  %s72_s10 = int_to_ptr.vmem [resolvable:$true] %s71_s10 }
  0x33   :  { %s5488_s11 = scalar_lea.vmem %s47_s28, 49152  ;;  %p5493_p7 = scmp.lt.s32.totalorder %s47_s28, %s47_s28 }
  0x34   :  { %p5489_p6 = scmp.ne.s32.totalorder %s47_s28, %s5488_s11  ;;  %p5494_p8 = scmp.lt.s32.totalorder %s5488_s11, %s5488_s11 }
  0x36   :  { %p5495_p9 = por %p5494_p8, %p5493_p7 }
  0x38   :  { %p5496_p10 = pnand %p5495_p9, %p5489_p6 }
  0x3a   :  { %5499 = shalt.err (!%p5496_p10)
}
  0x3b   :  { %52 = dma.hbm_to_vmem [thread:$0]  %s5862_s2, 49152, %s47_s28, [#allocation6], %s5593_s30, %s5593_s30, %s5594_s9  }
  0x3c   :  { %s5508_s0 = scalar_lea.vmem %s72_s10, 256  ;;  %p5513_p12 = scmp.lt.s32.totalorder %s72_s10, %s72_s10 }
  0x3d   :  { %p5509_p11 = scmp.ne.s32.totalorder %s72_s10, %s5508_s0  ;;  %p5514_p13 = scmp.lt.s32.totalorder %s5508_s0, %s5508_s0 }
  0x3f   :  { %p5515_p0 = por %p5514_p13, %p5513_p12 }
  0x41   :  { %p5516_p1 = pnand %p5515_p0, %p5509_p11 }
  0x43   :  { %5519 = shalt.err (!%p5516_p1)
}
  0x44   :  { %74 = dma.hbm_to_vmem [thread:$0]  %s5864_s4, 256, %s72_s10, [#allocation9]  }
  0x45   :  { %s5602_s15 = smov [#allocation13]   ;;  %s5603_s17 = smov [#allocation14]  }
  0x46   :  { %s91_s16 = sshll.u32 %s5602_s15, 4  ;;  %s101_s18 = sshll.u32 %s5603_s17, 4  ;;  %s92_s16 = int_to_ptr.vmem [resolvable:$true] %s91_s16  ;;  %s102_s18 = int_to_ptr.vmem [resolvable:$true] %s101_s18 }
  0x47   :  { %s5528_s19 = scalar_lea.vmem %s92_s16, 256  ;;  %p5533_p3 = scmp.lt.s32.totalorder %s92_s16, %s92_s16 }
  0x48   :  { %p5529_p2 = scmp.ne.s32.totalorder %s92_s16, %s5528_s19  ;;  %p5534_p4 = scmp.lt.s32.totalorder %s5528_s19, %s5528_s19 }
  0x4a   :  { %p5535_p5 = por %p5534_p4, %p5533_p3 }
  0x4c   :  { %p5536_p6 = pnand %p5535_p5, %p5529_p2 }
  0x4e   :  { %5539 = shalt.err (!%p5536_p6)
}
  0x4f   :  { %94 = dma.hbm_to_vmem [thread:$0]  %s5866_s6, 256, %s92_s16, [#allocation12]  }
  0x50   :  { %s5548_s9 = scalar_lea.vmem %s102_s18, 16  ;;  %s5552_s4 = scalar_lea.vmem %s102_s18, 32 }
  0x51   :  { %p5549_p7 = scmp.ne.s32.totalorder %s102_s18, %s5548_s9  ;;  %p5553_p8 = scmp.lt.s32.totalorder %s102_s18, %s102_s18 }
  0x52   :  { %p5554_p9 = scmp.lt.s32.totalorder %s5552_s4, %s5548_s9 }
  0x54   :  { %p5555_p10 = por %p5554_p9, %p5553_p8 }
  0x56   :  { %p5556_p11 = pnand %p5555_p10, %p5549_p7 }
  0x58   :  { %5559 = shalt.err (!%p5556_p11)
}
  0x59   :  { %104 = dma.hbm_to_vmem [thread:$0]  %s5867_s7, 16, %s102_s18, [#allocation15]  }
  0x5a   :  { %5580 = dma.done.wait [#allocation3], 64  }
  0x5b   :  { %5581 = vsyncadd [#allocation3], 4294967232 }
  0x5c   :  { %5582 = dma.done.wait [#allocation6], 53248  }
  0x5d   :  { %5583 = vsyncadd [#allocation6], 4294914048 }
  0x5e   :  { %5584 = dma.done.wait [#allocation9], 4352  }
  0x5f   :  { %5585 = vsyncadd [#allocation9], 4294962944 }
  0x60   :  { %5586 = dma.done.wait [#allocation12], 512  }
  0x61   :  { %5587 = vsyncadd [#allocation12], 4294966784 }
  0x62   :  { %5588 = dma.done.wait [#allocation15], 16  }
  0x63   :  { %5589 = vsyncadd [#allocation15], 4294967280  ;;  %v5604_v0 = vmov 0   ;;  %v4672_v1 = vld [vmem:[#allocation5 + $0xe4] ss:$16 sps:$4 sm:$0xff]   ;;  %v166_v34 = vlaneseq  ;;  %s5605_s6 = smov [#allocation16]  }
  0x64   :  { %378 = vmatprep.mubr.bf16.mxu0 %v5604_v0  ;;  %419 = vmatprep.mubr.bf16.mxu1 %v5604_v0  ;;  %v4674_v2 = vld [vmem:[#allocation5 + $0xec] ss:$16 sps:$4 sm:$0xff]   ;;  %v4676_v3 = vld [vmem:[#allocation5 + $0xe0] ss:$16 sps:$4 sm:$0xff]   ;;  %v4677_v4 = vld [vmem:[#allocation5 + $0xe8] ss:$16 sps:$4 sm:$0xff]  }
  0x65   :  { %346 = vmatprep.subr.bf16.mxu0 %v4672_v1  ;;  %387 = vmatprep.subr.bf16.mxu1 %v4674_v2  ;;  %v4678_v5 = vld [vmem:[#allocation5 + $0xc4] ss:$16 sps:$4 sm:$0xff]   ;;  %v4680_v6 = vld [vmem:[#allocation5 + $0xcc] ss:$16 sps:$4 sm:$0xff]   ;;  %v4682_v7 = vld [vmem:[#allocation5 + $0xc0] ss:$16 sps:$4 sm:$0xff]  }
  0x66   :  { %347 = vmatpush1.bf16.msra.mxu0 %v4676_v3  ;;  %388 = vmatpush1.bf16.msra.mxu1 %v4677_v4  ;;  %v4683_v8 = vld [vmem:[#allocation5 + $0xc8] ss:$16 sps:$4 sm:$0xff]   ;;  %v4684_v9 = vld [vmem:[#allocation5 + $0xa4] ss:$16 sps:$4 sm:$0xff]   ;;  %v4686_v10 = vld [vmem:[#allocation5 + $0xac] ss:$16 sps:$4 sm:$0xff]  }
  0x67   :  { %348 = vmatprep.subr.bf16.mxu0 %v4678_v5  ;;  %389 = vmatprep.subr.bf16.mxu1 %v4680_v6  ;;  %v4688_v11 = vld [vmem:[#allocation5 + $0xa0] ss:$16 sps:$4 sm:$0xff]   ;;  %v4689_v12 = vld [vmem:[#allocation5 + $0xa8] ss:$16 sps:$4 sm:$0xff]   ;;  %v4690_v13 = vld [vmem:[#allocation5 + $0x84] ss:$16 sps:$4 sm:$0xff]  }
  0x68   :  { %v4692_v14 = vld [vmem:[#allocation5 + $0x8c] ss:$16 sps:$4 sm:$0xff]   ;;  %v4694_v15 = vld [vmem:[#allocation5 + $0x80] ss:$16 sps:$4 sm:$0xff]   ;;  %v4695_v16 = vld [vmem:[#allocation5 + $0x88] ss:$16 sps:$4 sm:$0xff]  }
  0x69   :  { %v4696_v17 = vld [vmem:[#allocation5 + $0x64] ss:$16 sps:$4 sm:$0xff]   ;;  %v4698_v18 = vld [vmem:[#allocation5 + $0x6c] ss:$16 sps:$4 sm:$0xff]   ;;  %v4700_v19 = vld [vmem:[#allocation5 + $0x60] ss:$16 sps:$4 sm:$0xff]  }
  0x6a   :  { %349 = vmatpush1.bf16.msra.mxu0 %v4682_v7  ;;  %390 = vmatpush1.bf16.msra.mxu1 %v4683_v8  ;;  %v4701_v20 = vld [vmem:[#allocation5 + $0x68] ss:$16 sps:$4 sm:$0xff]   ;;  %v4702_v21 = vld [vmem:[#allocation5 + $0x44] ss:$16 sps:$4 sm:$0xff]   ;;  %v4704_v22 = vld [vmem:[#allocation5 + $0x4c] ss:$16 sps:$4 sm:$0xff]  }
  0x6b   :  { %350 = vmatprep.subr.bf16.mxu0 %v4684_v9  ;;  %391 = vmatprep.subr.bf16.mxu1 %v4686_v10  ;;  %v4706_v23 = vld [vmem:[#allocation5 + $0x40] ss:$16 sps:$4 sm:$0xff]   ;;  %v4707_v24 = vld [vmem:[#allocation5 + $0x48] ss:$16 sps:$4 sm:$0xff]   ;;  %v4708_v25 = vld [vmem:[#allocation5 + $0x24] ss:$16 sps:$4 sm:$0xff]  }
  0x6c   :  { %v4710_v26 = vld [vmem:[#allocation5 + $0x2c] ss:$16 sps:$4 sm:$0xff]   ;;  %v4712_v27 = vld [vmem:[#allocation5 + $0x20] ss:$16 sps:$4 sm:$0xff]   ;;  %v4713_v28 = vld [vmem:[#allocation5 + $0x28] ss:$16 sps:$4 sm:$0xff]  }
  0x6d   :  { %v4714_v29 = vld [vmem:[#allocation5 + $0x4] ss:$16 sps:$4 sm:$0xff]   ;;  %v4716_v30 = vld [vmem:[#allocation5 + $0xc] ss:$16 sps:$4 sm:$0xff]   ;;  %v4718_v31 = vld [vmem:[#allocation5] ss:$16 sps:$4 sm:$0xff]  }
  0x6e   :  { %351 = vmatpush1.bf16.msra.mxu0 %v4688_v11  ;;  %392 = vmatpush1.bf16.msra.mxu1 %v4689_v12  ;;  %v4719_v32 = vld [vmem:[#allocation5 + $0x8] ss:$16 sps:$4 sm:$0xff]   ;;  %v131_v33 = vld [vmem:[#allocation2] sm:$0xf]  ;;  %v167_v35 = vshrl.u32 %v166_v34, 7  ;;  %s4136_s7 = sshll.u32 %s5605_s6, 4  ;;  %s4137_s7 = int_to_ptr.vmem [resolvable:$true] %s4136_s7 }
  0x6f   :  { %352 = vmatprep.subr.bf16.mxu0 %v4690_v13  ;;  %393 = vmatprep.subr.bf16.mxu1 %v4692_v14  ;;  %v164_v38 = vld [vmem:[#allocation10] ss:$4 sm:$0xf]  ;;  %s5560_s1 = scalar_lea.vmem %s4137_s7, 128  ;;  %p5565_p13 = scmp.lt.s32.totalorder %s4137_s7, %s4137_s7 }
  0x70   :  { %v5681_v36 = vsub.s32 0, %v167_v35  ;;  %v5683_v37 = vsub.s32 2, %v167_v35  ;;  %v5685_v39 = vsub.s32 1, %v167_v35  ;;  %v5690_v43 = vsub.s32 3, %v167_v35  ;;  %v4722_v3 = vld [vmem:[#allocation7 + $0xe4] ss:$16 sps:$4 sm:$0xff]   ;;  %p5561_p12 = scmp.ne.s32.totalorder %s4137_s7, %s5560_s1  ;;  %p5566_p0 = scmp.lt.s32.totalorder %s5560_s1, %s5560_s1 }
  0x71   :  { %v4725_v4 = vld [vmem:[#allocation7 + $0x2e4] ss:$16 sps:$4 sm:$0xff]   ;;  %v4720_v5 = vld [vmem:[#allocation7 + $0xe0] ss:$16 sps:$4 sm:$0xff]  }
  0x72   :  { %353 = vmatpush1.bf16.msra.mxu0 %v4694_v15  ;;  %394 = vmatpush1.bf16.msra.mxu1 %v4695_v16  ;;  %v169_v40 = vrot.slane %v164_v38, %v5681_v36  ;;  %v177_v41 = vrot.slane %v164_v38, %v5683_v37  ;;  %v173_v42 = vrot.slane %v164_v38, %v5685_v39  ;;  %v4723_v6 = vld [vmem:[#allocation7 + $0x2e0] ss:$16 sps:$4 sm:$0xff]   ;;  %v4728_v8 = vld [vmem:[#allocation7 + $0xc4] ss:$16 sps:$4 sm:$0xff]   ;;  %p5567_p1 = por %p5566_p0, %p5565_p13 }
  0x73   :  { %354 = vmatprep.subr.bf16.mxu0 %v4696_v17  ;;  %395 = vmatprep.subr.bf16.mxu1 %v4698_v18  ;;  %v181_v51 = vrot.slane %v164_v38, %v5690_v43  ;;  %v4726_v7 = vld [vmem:[#allocation7 + $0xc0] ss:$16 sps:$4 sm:$0xff]   ;;  %v4731_v10 = vld [vmem:[#allocation7 + $0x2c4] ss:$16 sps:$4 sm:$0xff]  }
  0x74   :  { %v4729_v9 = vld [vmem:[#allocation7 + $0x2c0] ss:$16 sps:$4 sm:$0xff]   ;;  %v4734_v11 = vld [vmem:[#allocation7 + $0xa4] ss:$16 sps:$4 sm:$0xff]   ;;  %p5568_p2 = pnand %p5567_p1, %p5561_p12 }
  0x75   :  { %v4737_v12 = vld [vmem:[#allocation7 + $0x2a4] ss:$16 sps:$4 sm:$0xff]   ;;  %v4732_v13 = vld [vmem:[#allocation7 + $0xa0] ss:$16 sps:$4 sm:$0xff]  }
  0x76   :  { %355 = vmatpush1.bf16.msra.mxu0 %v4700_v19  ;;  %396 = vmatpush1.bf16.msra.mxu1 %v4701_v20  ;;  %v4735_v14 = vld [vmem:[#allocation7 + $0x2a0] ss:$16 sps:$4 sm:$0xff]   ;;  %v4740_v15 = vld [vmem:[#allocation7 + $0x84] ss:$16 sps:$4 sm:$0xff]  }
  0x77   :  { %356 = vmatprep.subr.bf16.mxu0 %v4702_v21  ;;  %397 = vmatprep.subr.bf16.mxu1 %v4704_v22  ;;  %v4743_v16 = vld [vmem:[#allocation7 + $0x284] ss:$16 sps:$4 sm:$0xff]   ;;  %v4738_v17 = vld [vmem:[#allocation7 + $0x80] ss:$16 sps:$4 sm:$0xff]  }
  0x78   :  { %v4741_v18 = vld [vmem:[#allocation7 + $0x280] ss:$16 sps:$4 sm:$0xff]   ;;  %v4746_v19 = vld [vmem:[#allocation7 + $0x64] ss:$16 sps:$4 sm:$0xff]  }
  0x79   :  { %v4749_v20 = vld [vmem:[#allocation7 + $0x264] ss:$16 sps:$4 sm:$0xff]   ;;  %v4744_v21 = vld [vmem:[#allocation7 + $0x60] ss:$16 sps:$4 sm:$0xff]  }
  0x7a   :  { %357 = vmatpush1.bf16.msra.mxu0 %v4706_v23  ;;  %398 = vmatpush1.bf16.msra.mxu1 %v4707_v24  ;;  %v4747_v22 = vld [vmem:[#allocation7 + $0x260] ss:$16 sps:$4 sm:$0xff]   ;;  %v4752_v23 = vld [vmem:[#allocation7 + $0x44] ss:$16 sps:$4 sm:$0xff]  }
  0x7b   :  { %358 = vmatprep.subr.bf16.mxu0 %v4708_v25  ;;  %399 = vmatprep.subr.bf16.mxu1 %v4710_v26  ;;  %v4755_v24 = vld [vmem:[#allocation7 + $0x244] ss:$16 sps:$4 sm:$0xff]   ;;  %v4750_v25 = vld [vmem:[#allocation7 + $0x40] ss:$16 sps:$4 sm:$0xff]  }
  0x7c   :  { %v4753_v26 = vld [vmem:[#allocation7 + $0x240] ss:$16 sps:$4 sm:$0xff]   ;;  %v4770_v35 = vld [vmem:[#allocation7 + $0x1e4] ss:$16 sps:$4 sm:$0xff]  }
  0x7d   :  { %v4765_v34 = vld [vmem:[#allocation7 + $0x200] ss:$16 sps:$4 sm:$0xff]   ;;  %v4773_v38 = vld [vmem:[#allocation7 + $0x3e4] ss:$16 sps:$4 sm:$0xff]  }
  0x7e   :  { %359 = vmatpush1.bf16.msra.mxu0 %v4712_v27  ;;  %400 = vmatpush1.bf16.msra.mxu1 %v4713_v28  ;;  %v4758_v27 = vld [vmem:[#allocation7 + $0x24] ss:$16 sps:$4 sm:$0xff]  }
  0x7f   :  { %360 = vmatprep.subr.bf16.mxu0 %v4714_v29  ;;  %401 = vmatprep.subr.bf16.mxu1 %v4716_v30  ;;  %v4761_v28 = vld [vmem:[#allocation7 + $0x224] ss:$16 sps:$4 sm:$0xff]   ;;  %v4756_v29 = vld [vmem:[#allocation7 + $0x20] ss:$16 sps:$4 sm:$0xff]  }
  0x80   :  { %v4759_v30 = vld [vmem:[#allocation7 + $0x220] ss:$16 sps:$4 sm:$0xff]  }
  0x82   :  { %361 = vmatpush1.bf16.msra.mxu0 %v4718_v31  ;;  %402 = vmatpush1.bf16.msra.mxu1 %v4719_v32  ;;  %v4764_v31 = vld [vmem:[#allocation7 + $0x4] ss:$16 sps:$4 sm:$0xff]  }
  0x83   :  { %1341 = vmatprep.subr.bf16.mxu0 %v4722_v3  ;;  %1382 = vmatprep.subr.bf16.mxu1 %v4725_v4  ;;  %v4767_v32 = vld [vmem:[#allocation7 + $0x204] ss:$16 sps:$4 sm:$0xff]  }
  0x84   :  { %v4806_v3 = vld [vmem:[#allocation7 + $0x124] ss:$16 sps:$4 sm:$0xff]  }
  0x85   :  { %379 = vmatmul.mubr.bf16.vlgmr.msra.gmra.mxu0 %v131_v33  ;;  %420 = vmatmul.mubr.bf16.vlgmr.msra.gmra.mxu1 %v131_v33  ;;  %v4762_v33 = vld [vmem:[#allocation7] ss:$16 sps:$4 sm:$0xff]   ;;  %v4809_v4 = vld [vmem:[#allocation7 + $0x324] ss:$16 sps:$4 sm:$0xff]  }
  0x86   :  { %1342 = vmatpush1.bf16.msra.mxu0 %v4720_v5  ;;  %1383 = vmatpush1.bf16.msra.mxu1 %v4723_v6  ;;  %v4804_v5 = vld [vmem:[#allocation7 + $0x120] ss:$16 sps:$4 sm:$0xff]  }
  0x87   :  { %1343 = vmatprep.subr.bf16.mxu0 %v4728_v8  ;;  %1384 = vmatprep.subr.bf16.mxu1 %v4731_v10  ;;  %v4807_v6 = vld [vmem:[#allocation7 + $0x320] ss:$16 sps:$4 sm:$0xff]   ;;  %v4815_v8 = vld [vmem:[#allocation7 + $0x304] ss:$16 sps:$4 sm:$0xff]  }
  0x88   :  { %v4813_v10 = vld [vmem:[#allocation7 + $0x300] ss:$16 sps:$4 sm:$0xff]  }
  0x8a   :  { %1344 = vmatpush1.bf16.msra.mxu0 %v4726_v7  ;;  %1385 = vmatpush1.bf16.msra.mxu1 %v4729_v9  ;;  %v4812_v7 = vld [vmem:[#allocation7 + $0x104] ss:$16 sps:$4 sm:$0xff]   ;;  %v4810_v9 = vld [vmem:[#allocation7 + $0x100] ss:$16 sps:$4 sm:$0xff]  }
  0x8b   :  { %1345 = vmatprep.subr.bf16.mxu0 %v4734_v11  ;;  %1386 = vmatprep.subr.bf16.mxu1 %v4737_v12  ;;  %v4818_v11 = vld [vmem:[#allocation7 + $0xec] ss:$16 sps:$4 sm:$0xff]  }
  0x8c   :  { %v4821_v12 = vld [vmem:[#allocation7 + $0x2ec] ss:$16 sps:$4 sm:$0xff]  }
  0x8e   :  { %1346 = vmatpush1.bf16.msra.mxu0 %v4732_v13  ;;  %1387 = vmatpush1.bf16.msra.mxu1 %v4735_v14 }
  0x8f   :  { %1347 = vmatprep.subr.bf16.mxu0 %v4740_v15  ;;  %1388 = vmatprep.subr.bf16.mxu1 %v4743_v16 }
  0x92   :  { %1348 = vmatpush1.bf16.msra.mxu0 %v4738_v17  ;;  %1389 = vmatpush1.bf16.msra.mxu1 %v4741_v18 }
  0x93   :  { %1349 = vmatprep.subr.bf16.mxu0 %v4746_v19  ;;  %1390 = vmatprep.subr.bf16.mxu1 %v4749_v20 }
  0x96   :  { %1350 = vmatpush1.bf16.msra.mxu0 %v4744_v21  ;;  %1391 = vmatpush1.bf16.msra.mxu1 %v4747_v22  ;;  %v428_v21 = vld [vmem:[#allocation11] ss:$4 sm:$0xf]  ;;  %v429_v22 = vld [vmem:[#allocation13] ss:$4 sm:$0xf] }
  0x97   :  { %1351 = vmatprep.subr.bf16.mxu0 %v4752_v23  ;;  %1392 = vmatprep.subr.bf16.mxu1 %v4755_v24  ;;  %v460_v23 = vrot.slane %v428_v21, %v5685_v39  ;;  %v468_v24 = vrot.slane %v428_v21, %v5690_v43 }
  0x9a   :  { %1352 = vmatpush1.bf16.msra.mxu0 %v4750_v25  ;;  %1393 = vmatpush1.bf16.msra.mxu1 %v4753_v26  ;;  %v456_v25 = vrot.slane %v428_v21, %v5681_v36  ;;  %v464_v26 = vrot.slane %v428_v21, %v5683_v37 }
  0x9b   :  { %1353 = vmatprep.subr.bf16.mxu0 %v4758_v27  ;;  %1394 = vmatprep.subr.bf16.mxu1 %v4761_v28  ;;  %v489_v28 = vrot.slane %v429_v22, %v5685_v39 }
  0x9e   :  { %1354 = vmatpush1.bf16.msra.mxu0 %v4756_v29  ;;  %1395 = vmatpush1.bf16.msra.mxu1 %v4759_v30  ;;  %v497_v29 = vrot.slane %v429_v22, %v5690_v43 }
  0x9f   :  { %1355 = vmatprep.subr.bf16.mxu0 %v4764_v31  ;;  %1396 = vmatprep.subr.bf16.mxu1 %v4767_v32 }
  0xa2   :  { %1356 = vmatpush1.bf16.msra.mxu0 %v4762_v33  ;;  %1397 = vmatpush1.bf16.msra.mxu1 %v4765_v34  ;;  %v485_v34 = vrot.slane %v429_v22, %v5681_v36 }
  0xa3   :  { %1357 = vmatprep.subr.bf16.mxu0 %v4770_v35  ;;  %1398 = vmatprep.subr.bf16.mxu1 %v4773_v38  ;;  %v493_v35 = vrot.slane %v429_v22, %v5683_v37  ;;  %v4824_v22 = vld [vmem:[#allocation7 + $0xcc] ss:$16 sps:$4 sm:$0xff]  }
 0x145   :  { %v380_v44 = vpop.f32.mrf.mxu0  ;;  %v421_v45 = vpop.f32.mrf.mxu1 }
 0x146   :  { %v5692_v46 = vadd.f32 %v380_v44, %v169_v40  ;;  %v5694_v47 = vadd.f32 %v421_v45, %v177_v41  ;;  %v4768_v40 = vld [vmem:[#allocation7 + $0x1e0] ss:$16 sps:$4 sm:$0xff]   ;;  %v4779_v44 = vld [vmem:[#allocation7 + $0x3c4] ss:$16 sps:$4 sm:$0xff]  }
 0x147   :  { %v382_v48 = vpop.f32.mrf.mxu0  ;;  %v423_v49 = vpop.f32.mrf.mxu1  ;;  %v4771_v41 = vld [vmem:[#allocation7 + $0x3e0] ss:$16 sps:$4 sm:$0xff]   ;;  %1358 = vmatpush2.bf16.msra.mxu0 %v4768_v40 }
 0x148   :  { %v5696_v50 = vadd.f32 %v382_v48, %v173_v42  ;;  %v437_v54 = vmul.f32 %v5692_v46, %v5692_v46  ;;  %v439_v55 = vmul.f32 %v5694_v47, %v5694_v47  ;;  %v5707_v60 = vadd.f32 %v423_v49, %v181_v51  ;;  %v4776_v42 = vld [vmem:[#allocation7 + $0x1c4] ss:$16 sps:$4 sm:$0xff]   ;;  %v4774_v45 = vld [vmem:[#allocation7 + $0x1c0] ss:$16 sps:$4 sm:$0xff]   ;;  %1399 = vmatpush2.bf16.msra.mxu1 %v4771_v41 }
 0x149   :  { %v384_v52 = vpop.f32.mrf.mxu0  ;;  %v425_v53 = vpop.f32.mrf.mxu1  ;;  %1359 = vmatprep.subr.bf16.mxu0 %v4776_v42  ;;  %v4777_v48 = vld [vmem:[#allocation7 + $0x3c0] ss:$16 sps:$4 sm:$0xff]   ;;  %v4782_v49 = vld [vmem:[#allocation7 + $0x1a4] ss:$16 sps:$4 sm:$0xff]   ;;  %1400 = vmatprep.subr.bf16.mxu1 %v4779_v44 }
 0x14a   :  { %v438_v56 = vmul.f32 %v5696_v50, %v5696_v50  ;;  %v430_v57 = vadd.f32 %v5696_v50, %v5692_v46  ;;  %v440_v1 = vmul.f32 %v5707_v60, %v5707_v60  ;;  %v4785_v51 = vld [vmem:[#allocation7 + $0x3a4] ss:$16 sps:$4 sm:$0xff]   ;;  %v4780_v52 = vld [vmem:[#allocation7 + $0x1a0] ss:$16 sps:$4 sm:$0xff]  }
 0x14b   :  { %v385_v58 = vpop.f32.mrf.mxu0  ;;  %v426_v59 = vpop.f32.mrf.mxu1  ;;  %1360 = vmatpush2.bf16.msra.mxu0 %v4774_v45  ;;  %v4783_v53 = vld [vmem:[#allocation7 + $0x3a0] ss:$16 sps:$4 sm:$0xff]  }
 0x14c   :  { %v431_v61 = vadd.f32 %v430_v57, %v5694_v47  ;;  %v441_v62 = vadd.f32 %v438_v56, %v437_v54  ;;  %1401 = vmatpush2.bf16.msra.mxu1 %v4777_v48  ;;  %1361 = vmatprep.subr.bf16.mxu0 %v4782_v49  ;;  %v4788_v54 = vld [vmem:[#allocation7 + $0x184] ss:$16 sps:$4 sm:$0xff]   ;;  %v4786_v56 = vld [vmem:[#allocation7 + $0x180] ss:$16 sps:$4 sm:$0xff]  }
 0x14d   :  { %1402 = vmatprep.subr.bf16.mxu1 %v4785_v51  ;;  %v4789_v57 = vld [vmem:[#allocation7 + $0x380] ss:$16 sps:$4 sm:$0xff]   ;;  %v4794_v58 = vld [vmem:[#allocation7 + $0x164] ss:$16 sps:$4 sm:$0xff]  }
 0x14e   :  { %v432_v63 = vadd.f32 %v431_v61, %v5707_v60  ;;  %v442_v0 = vadd.f32 %v441_v62, %v439_v55  ;;  %v4791_v55 = vld [vmem:[#allocation7 + $0x384] ss:$16 sps:$4 sm:$0xff]   ;;  %v4792_v61 = vld [vmem:[#allocation7 + $0x160] ss:$16 sps:$4 sm:$0xff]  }
 0x14f   :  { %1362 = vmatpush2.bf16.msra.mxu0 %v4780_v52  ;;  %v4797_v59 = vld [vmem:[#allocation7 + $0x364] ss:$16 sps:$4 sm:$0xff]   ;;  %v4795_v62 = vld [vmem:[#allocation7 + $0x360] ss:$16 sps:$4 sm:$0xff]  }
 0x150   :  { %433 = vadd.xlane.f32.xlu0 %v432_v63  ;;  %v443_v2 = vadd.f32 %v442_v0, %v440_v1  ;;  %1403 = vmatpush2.bf16.msra.mxu1 %v4783_v53  ;;  %v4800_v63 = vld [vmem:[#allocation7 + $0x144] ss:$16 sps:$4 sm:$0xff]   ;;  %v4798_v1 = vld [vmem:[#allocation7 + $0x140] ss:$16 sps:$4 sm:$0xff]  }
 0x151   :  { %1363 = vmatprep.subr.bf16.mxu0 %v4788_v54  ;;  %1404 = vmatprep.subr.bf16.mxu1 %v4791_v55  ;;  %v4803_v0 = vld [vmem:[#allocation7 + $0x344] ss:$16 sps:$4 sm:$0xff]  }
 0x153   :  { %1364 = vmatpush2.bf16.msra.mxu0 %v4786_v56 }
 0x154   :  { %444 = vadd.xlane.f32.xlu0 %v443_v2  ;;  %1405 = vmatpush2.bf16.msra.mxu1 %v4789_v57  ;;  %v4801_v2 = vld [vmem:[#allocation7 + $0x340] ss:$16 sps:$4 sm:$0xff]  }
 0x155   :  { %1365 = vmatprep.subr.bf16.mxu0 %v4794_v58  ;;  %1406 = vmatprep.subr.bf16.mxu1 %v4797_v59 }
 0x157   :  { %1366 = vmatpush2.bf16.msra.mxu0 %v4792_v61 }
 0x158   :  { %1407 = vmatpush2.bf16.msra.mxu1 %v4795_v62  ;;  %1367 = vmatprep.subr.bf16.mxu0 %v4800_v63 }
 0x159   :  { %1408 = vmatprep.subr.bf16.mxu1 %v4803_v0 }
 0x15b   :  { %1368 = vmatpush2.bf16.msra.mxu0 %v4798_v1 }
 0x15c   :  { %1409 = vmatpush2.bf16.msra.mxu1 %v4801_v2  ;;  %1369 = vmatprep.subr.bf16.mxu0 %v4806_v3 }
 0x15d   :  { %1410 = vmatprep.subr.bf16.mxu1 %v4809_v4 }
 0x15f   :  { %1370 = vmatpush2.bf16.msra.mxu0 %v4804_v5 }
 0x160   :  { %1411 = vmatpush2.bf16.msra.mxu1 %v4807_v6  ;;  %1371 = vmatprep.subr.bf16.mxu0 %v4812_v7 }
 0x161   :  { %1412 = vmatprep.subr.bf16.mxu1 %v4815_v8 }
 0x163   :  { %1372 = vmatpush2.bf16.msra.mxu0 %v4810_v9 }
 0x164   :  { %1413 = vmatpush2.bf16.msra.mxu1 %v4813_v10  ;;  %1423 = vmatprep.subr.bf16.mxu0 %v4818_v11 }
 0x165   :  { %1464 = vmatprep.subr.bf16.mxu1 %v4821_v12 }
 0x1d9   :  { %v434_v13 = vpop.xlane.xlu0 %433 }
 0x1da   :  { %v436_v14 = vmul.f32 0.001953125, %v434_v13 }
 0x1dc   :  { %v447_v16 = vmul.f32 %v436_v14, %v436_v14 }
 0x1dd   :  { %v445_v15 = vpop.xlane.xlu0 %444 }
 0x1de   :  { %v446_v17 = vmul.f32 0.001953125, %v445_v15 }
 0x1e0   :  { %v448_v18 = vsub.f32 %v446_v17, %v447_v16  ;;  %v4816_v17 = vld [vmem:[#allocation7 + $0xe8] ss:$16 sps:$4 sm:$0xff]  }
 0x1e2   :  { %v449_v19 = vmax.f32 %v448_v18, 0.0 }
 0x1e4   :  { %v450_v20 = vadd.f32 1e-05, %v449_v19  ;;  %v4819_v19 = vld [vmem:[#allocation7 + $0x2e8] ss:$16 sps:$4 sm:$0xff]  }
 0x1e6   :  { %5328 = vrsqrt.f32 %v450_v20 }
 0x1f3   :  { %v5329_v27 = vpop.eup %5328 }
 0x1f4   :  { %v474_v30 = vmul.f32 %v5329_v27, %v460_v23  ;;  %v476_v31 = vmul.f32 %v5329_v27, %v468_v24  ;;  %v473_v32 = vmul.f32 %v5329_v27, %v456_v25  ;;  %v475_v33 = vmul.f32 %v5329_v27, %v464_v26  ;;  %v4827_v23 = vld [vmem:[#allocation7 + $0x2cc] ss:$16 sps:$4 sm:$0xff]   ;;  %v4822_v24 = vld [vmem:[#allocation7 + $0xc8] ss:$16 sps:$4 sm:$0xff]  }
 0x1f5   :  { %v4825_v25 = vld [vmem:[#allocation7 + $0x2c8] ss:$16 sps:$4 sm:$0xff]   ;;  %v4830_v26 = vld [vmem:[#allocation7 + $0xac] ss:$16 sps:$4 sm:$0xff]  }
 0x1f6   :  { %v478_v38 = vmul.f32 %v474_v30, %v436_v14  ;;  %v480_v40 = vmul.f32 %v476_v31, %v436_v14  ;;  %v477_v41 = vmul.f32 %v473_v32, %v436_v14  ;;  %v479_v42 = vmul.f32 %v475_v33, %v436_v14  ;;  %v4833_v27 = vld [vmem:[#allocation7 + $0x2ac] ss:$16 sps:$4 sm:$0xff]  }
 0x1f7   :  { %v507_v45 = vmul.f32 %v474_v30, %v5696_v50  ;;  %v509_v49 = vmul.f32 %v476_v31, %v5707_v60  ;;  %v506_v52 = vmul.f32 %v473_v32, %v5692_v46  ;;  %v508_v54 = vmul.f32 %v475_v33, %v5694_v47  ;;  %v4836_v30 = vld [vmem:[#allocation7 + $0x8c] ss:$16 sps:$4 sm:$0xff]   ;;  %v4834_v32 = vld [vmem:[#allocation7 + $0x88] ss:$16 sps:$4 sm:$0xff]  }
 0x1f8   :  { %v503_v44 = vsub.f32 %v489_v28, %v478_v38  ;;  %v505_v48 = vsub.f32 %v497_v29, %v480_v40  ;;  %v502_v51 = vsub.f32 %v485_v34, %v477_v41  ;;  %v504_v53 = vsub.f32 %v493_v35, %v479_v42  ;;  %v4828_v28 = vld [vmem:[#allocation7 + $0xa8] ss:$16 sps:$4 sm:$0xff]   ;;  %v4839_v31 = vld [vmem:[#allocation7 + $0x28c] ss:$16 sps:$4 sm:$0xff]  }
 0x1f9   :  { %v4831_v29 = vld [vmem:[#allocation7 + $0x2a8] ss:$16 sps:$4 sm:$0xff]   ;;  %v4842_v34 = vld [vmem:[#allocation7 + $0x6c] ss:$16 sps:$4 sm:$0xff]  }
 0x1fa   :  { %v511_v55 = vadd.f32 %v507_v45, %v503_v44  ;;  %v513_v56 = vadd.f32 %v509_v49, %v505_v48  ;;  %v510_v57 = vadd.f32 %v506_v52, %v502_v51  ;;  %v512_v58 = vadd.f32 %v508_v54, %v504_v53  ;;  %v4837_v33 = vld [vmem:[#allocation7 + $0x288] ss:$16 sps:$4 sm:$0xff]   ;;  %v4845_v35 = vld [vmem:[#allocation7 + $0x26c] ss:$16 sps:$4 sm:$0xff]  }
 0x1fb   :  { %v4840_v38 = vld [vmem:[#allocation7 + $0x68] ss:$16 sps:$4 sm:$0xff]   ;;  %v4848_v41 = vld [vmem:[#allocation7 + $0x4c] ss:$16 sps:$4 sm:$0xff]  }
 0x1fc   :  { %v515_v59 = vpack.c.bf16 %v511_v55, %v511_v55  ;;  %v517_v61 = vpack.c.bf16 %v513_v56, %v513_v56  ;;  %v514_v62 = vpack.c.bf16 %v510_v57, %v510_v57  ;;  %v516_v63 = vpack.c.bf16 %v512_v58, %v512_v58  ;;  %v4843_v40 = vld [vmem:[#allocation7 + $0x268] ss:$16 sps:$4 sm:$0xff]   ;;  %v4851_v42 = vld [vmem:[#allocation7 + $0x24c] ss:$16 sps:$4 sm:$0xff]  }
 0x1fd   :  { %v4846_v44 = vld [vmem:[#allocation7 + $0x48] ss:$16 sps:$4 sm:$0xff]   ;;  %v4854_v48 = vld [vmem:[#allocation7 + $0x2c] ss:$16 sps:$4 sm:$0xff]  }
 0x1fe   :  { %v4182_v0 = vmul.bf16 3216621497, %v515_v59  ;;  %v4184_v1 = vmul.bf16 3216621497, %v517_v61  ;;  %v4181_v50 = vmul.bf16 3216621497, %v514_v62 }
 0x1ff   :  { %v4183_v2 = vmul.bf16 3216621497, %v516_v63  ;;  %v4849_v45 = vld [vmem:[#allocation7 + $0x248] ss:$16 sps:$4 sm:$0xff]   ;;  %v4857_v49 = vld [vmem:[#allocation7 + $0x22c] ss:$16 sps:$4 sm:$0xff]  }
 0x200   :  { %5330 = vpow.bf16 %v4182_v0  ;;  %v4852_v51 = vld [vmem:[#allocation7 + $0x28] ss:$16 sps:$4 sm:$0xff]   ;;  %v4860_v53 = vld [vmem:[#allocation7 + $0xc] ss:$16 sps:$4 sm:$0xff]  }
 0x201   :  { %5332 = vpow.bf16 %v4184_v1  ;;  %v4855_v52 = vld [vmem:[#allocation7 + $0x228] ss:$16 sps:$4 sm:$0xff]   ;;  %v4863_v54 = vld [vmem:[#allocation7 + $0x20c] ss:$16 sps:$4 sm:$0xff]  }
 0x202   :  { %5334 = vpow.bf16 %v4181_v50  ;;  %v4858_v55 = vld [vmem:[#allocation7 + $0x8] ss:$16 sps:$4 sm:$0xff]   ;;  %v4866_v57 = vld [vmem:[#allocation7 + $0x1ec] ss:$16 sps:$4 sm:$0xff]  }
 0x203   :  { %5336 = vpow.bf16 %v4183_v2  ;;  %v4861_v56 = vld [vmem:[#allocation7 + $0x208] ss:$16 sps:$4 sm:$0xff]   ;;  %v4869_v58 = vld [vmem:[#allocation7 + $0x3ec] ss:$16 sps:$4 sm:$0xff]  }
 0x204   :  { %v4870_v0 = vld [vmem:[#allocation7 + $0x1c8] ss:$16 sps:$4 sm:$0xff]   ;;  %v4878_v50 = vld [vmem:[#allocation7 + $0x1ac] ss:$16 sps:$4 sm:$0xff]  }
 0x205   :  { %v4873_v1 = vld [vmem:[#allocation7 + $0x3c8] ss:$16 sps:$4 sm:$0xff]   ;;  %v4881_v2 = vld [vmem:[#allocation7 + $0x3ac] ss:$16 sps:$4 sm:$0xff]  }
 0x20e   :  { %v5331_v46 = vpop.eup %5330 }
 0x20f   :  { %v5333_v60 = vpop.eup %5332  ;;  %v535_v3 = vadd.bf16 1065369472, %v5331_v46  ;;  %v4876_v46 = vld [vmem:[#allocation7 + $0x1a8] ss:$16 sps:$4 sm:$0xff]  }
 0x210   :  { %v5335_v47 = vpop.eup %5334  ;;  %v537_v4 = vadd.bf16 1065369472, %v5333_v60  ;;  %v4879_v60 = vld [vmem:[#allocation7 + $0x3a8] ss:$16 sps:$4 sm:$0xff]  }
 0x211   :  { %v5337_v5 = vpop.eup %5336  ;;  %5338 = vrcp.bf16 %v535_v3  ;;  %v534_v6 = vadd.bf16 1065369472, %v5335_v47  ;;  %v4884_v3 = vld [vmem:[#allocation7 + $0x18c] ss:$16 sps:$4 sm:$0xff]  }
 0x212   :  { %5340 = vrcp.bf16 %v537_v4  ;;  %v536_v7 = vadd.bf16 1065369472, %v5337_v5  ;;  %v4887_v47 = vld [vmem:[#allocation7 + $0x38c] ss:$16 sps:$4 sm:$0xff]   ;;  %v4882_v4 = vld [vmem:[#allocation7 + $0x188] ss:$16 sps:$4 sm:$0xff]  }
 0x213   :  { %5342 = vrcp.bf16 %v534_v6  ;;  %v4885_v5 = vld [vmem:[#allocation7 + $0x388] ss:$16 sps:$4 sm:$0xff]   ;;  %v4890_v6 = vld [vmem:[#allocation7 + $0x16c] ss:$16 sps:$4 sm:$0xff]  }
 0x214   :  { %5344 = vrcp.bf16 %v536_v7  ;;  %v4893_v7 = vld [vmem:[#allocation7 + $0x36c] ss:$16 sps:$4 sm:$0xff]  }
 0x21f   :  { %v5339_v8 = vpop.eup %5338 }
 0x220   :  { %v5341_v9 = vpop.eup %5340  ;;  %v541_v10 = vmul.bf16 1065369472, %v5339_v8  ;;  %v4888_v8 = vld [vmem:[#allocation7 + $0x168] ss:$16 sps:$4 sm:$0xff]  }
 0x221   :  { %v5343_v11 = vpop.eup %5342  ;;  %v545_v12 = vmul.bf16 1065369472, %v5341_v9  ;;  %v4891_v9 = vld [vmem:[#allocation7 + $0x368] ss:$16 sps:$4 sm:$0xff]  }
 0x222   :  { %v5345_v13 = vpop.eup %5344  ;;  %v547_v14 = vmul.bf16 %v541_v10, %v515_v59  ;;  %v539_v15 = vmul.bf16 1065369472, %v5343_v11  ;;  %v4864_v59 = vld [vmem:[#allocation7 + $0x1e8] ss:$16 sps:$4 sm:$0xff]   ;;  %v4896_v10 = vld [vmem:[#allocation7 + $0x14c] ss:$16 sps:$4 sm:$0xff]  }
 0x223   :  { %v549_v16 = vmul.bf16 %v545_v12, %v517_v61  ;;  %v543_v18 = vmul.bf16 1065369472, %v5345_v13  ;;  %v4867_v61 = vld [vmem:[#allocation7 + $0x3e8] ss:$16 sps:$4 sm:$0xff]   ;;  %v4899_v11 = vld [vmem:[#allocation7 + $0x34c] ss:$16 sps:$4 sm:$0xff]  }
 0x224   :  { %1373 = vmatprep.mubr.bf16.mxu0 %v547_v14  ;;  %v5725_v20 = vmul.bf16 %v539_v15, %v514_v62  ;;  %v4872_v62 = vld [vmem:[#allocation7 + $0x1cc] ss:$16 sps:$4 sm:$0xff]   ;;  %v4894_v12 = vld [vmem:[#allocation7 + $0x148] ss:$16 sps:$4 sm:$0xff]  }
 0x225   :  { %1414 = vmatprep.mubr.bf16.mxu1 %v549_v16  ;;  %v5727_v21 = vmul.bf16 %v543_v18, %v516_v63  ;;  %v4875_v63 = vld [vmem:[#allocation7 + $0x3cc] ss:$16 sps:$4 sm:$0xff]   ;;  %v4897_v13 = vld [vmem:[#allocation7 + $0x348] ss:$16 sps:$4 sm:$0xff]  }
 0x226   :  { %1374 = vmatmul.mubr.bf16.vlgmr.msra.gmra.mxu0 %v5725_v20  ;;  %v4905_v15 = vld [vmem:[#allocation7 + $0x32c] ss:$16 sps:$4 sm:$0xff]  }
 0x227   :  { %1415 = vmatmul.mubr.bf16.vlgmr.msra.gmra.mxu1 %v5727_v21  ;;  %1424 = vmatpush1.bf16.msra.mxu0 %v4816_v17  ;;  %v4903_v17 = vld [vmem:[#allocation7 + $0x328] ss:$16 sps:$4 sm:$0xff]   ;;  %v4908_v18 = vld [vmem:[#allocation7 + $0x10c] ss:$16 sps:$4 sm:$0xff]  }
 0x228   :  { %1465 = vmatpush1.bf16.msra.mxu1 %v4819_v19  ;;  %1455 = vmatprep.mubr.bf16.mxu0 %v547_v14  ;;  %v4902_v14 = vld [vmem:[#allocation7 + $0x12c] ss:$16 sps:$4 sm:$0xff]  }
 0x229   :  { %1496 = vmatprep.mubr.bf16.mxu1 %v549_v16  ;;  %1425 = vmatprep.subr.bf16.mxu0 %v4824_v22  ;;  %v4900_v16 = vld [vmem:[#allocation7 + $0x128] ss:$16 sps:$4 sm:$0xff]   ;;  %v4911_v19 = vld [vmem:[#allocation7 + $0x30c] ss:$16 sps:$4 sm:$0xff]  }
 0x22a   :  { %1466 = vmatprep.subr.bf16.mxu1 %v4827_v23  ;;  %v4906_v22 = vld [vmem:[#allocation7 + $0x108] ss:$16 sps:$4 sm:$0xff]  }
 0x22b   :  { %1426 = vmatpush1.bf16.msra.mxu0 %v4822_v24  ;;  %v4909_v23 = vld [vmem:[#allocation7 + $0x308] ss:$16 sps:$4 sm:$0xff]  }
 0x22c   :  { %1467 = vmatpush1.bf16.msra.mxu1 %v4825_v25  ;;  %1427 = vmatprep.subr.bf16.mxu0 %v4830_v26 }
 0x22d   :  { %1468 = vmatprep.subr.bf16.mxu1 %v4833_v27 }
 0x22f   :  { %1428 = vmatpush1.bf16.msra.mxu0 %v4828_v28 }
 0x230   :  { %1469 = vmatpush1.bf16.msra.mxu1 %v4831_v29  ;;  %1429 = vmatprep.subr.bf16.mxu0 %v4836_v30 }
 0x231   :  { %1470 = vmatprep.subr.bf16.mxu1 %v4839_v31 }
 0x233   :  { %1430 = vmatpush1.bf16.msra.mxu0 %v4834_v32  ;;  %v679_v32 = vld [vmem:[#allocation10 + $0x1] ss:$4 sm:$0xf] }
 0x234   :  { %1471 = vmatpush1.bf16.msra.mxu1 %v4837_v33  ;;  %1431 = vmatprep.subr.bf16.mxu0 %v4842_v34  ;;  %v688_v33 = vrot.slane %v679_v32, %v5685_v39  ;;  %v684_v34 = vrot.slane %v679_v32, %v5681_v36 }
 0x235   :  { %1472 = vmatprep.subr.bf16.mxu1 %v4845_v35 }
 0x237   :  { %1432 = vmatpush1.bf16.msra.mxu0 %v4840_v38 }
 0x238   :  { %1473 = vmatpush1.bf16.msra.mxu1 %v4843_v40  ;;  %1433 = vmatprep.subr.bf16.mxu0 %v4848_v41  ;;  %v696_v41 = vrot.slane %v679_v32, %v5690_v43 }
 0x239   :  { %1474 = vmatprep.subr.bf16.mxu1 %v4851_v42 }
 0x23b   :  { %1434 = vmatpush1.bf16.msra.mxu0 %v4846_v44 }
 0x23c   :  { %1475 = vmatpush1.bf16.msra.mxu1 %v4849_v45  ;;  %1435 = vmatprep.subr.bf16.mxu0 %v4854_v48 }
 0x23d   :  { %1476 = vmatprep.subr.bf16.mxu1 %v4857_v49 }
 0x23f   :  { %1436 = vmatpush1.bf16.msra.mxu0 %v4852_v51 }
 0x240   :  { %1477 = vmatpush1.bf16.msra.mxu1 %v4855_v52  ;;  %1437 = vmatprep.subr.bf16.mxu0 %v4860_v53 }
 0x241   :  { %1478 = vmatprep.subr.bf16.mxu1 %v4863_v54 }
 0x243   :  { %1438 = vmatpush1.bf16.msra.mxu0 %v4858_v55 }
 0x244   :  { %1479 = vmatpush1.bf16.msra.mxu1 %v4861_v56  ;;  %1439 = vmatprep.subr.bf16.mxu0 %v4866_v57 }
 0x245   :  { %1480 = vmatprep.subr.bf16.mxu1 %v4869_v58 }
 0x247   :  { %1440 = vmatpush2.bf16.msra.mxu0 %v4864_v59 }
 0x248   :  { %1481 = vmatpush2.bf16.msra.mxu1 %v4867_v61  ;;  %1441 = vmatprep.subr.bf16.mxu0 %v4872_v62 }
 0x249   :  { %1482 = vmatprep.subr.bf16.mxu1 %v4875_v63 }
 0x24b   :  { %1442 = vmatpush2.bf16.msra.mxu0 %v4870_v0 }
 0x24c   :  { %1483 = vmatpush2.bf16.msra.mxu1 %v4873_v1  ;;  %1443 = vmatprep.subr.bf16.mxu0 %v4878_v50 }
 0x24d   :  { %1484 = vmatprep.subr.bf16.mxu1 %v4881_v2 }
 0x24f   :  { %1444 = vmatpush2.bf16.msra.mxu0 %v4876_v46 }
 0x250   :  { %1485 = vmatpush2.bf16.msra.mxu1 %v4879_v60  ;;  %1445 = vmatprep.subr.bf16.mxu0 %v4884_v3  ;;  %v4914_v60 = vld [vmem:[#allocation7 + $0x4e4] ss:$16 sps:$4 sm:$0xff]  }
 0x251   :  { %1486 = vmatprep.subr.bf16.mxu1 %v4887_v47  ;;  %v4917_v3 = vld [vmem:[#allocation7 + $0x6e4] ss:$16 sps:$4 sm:$0xff]   ;;  %v4912_v47 = vld [vmem:[#allocation7 + $0x4e0] ss:$16 sps:$4 sm:$0xff]  }
 0x253   :  { %1446 = vmatpush2.bf16.msra.mxu0 %v4882_v4  ;;  %v4915_v4 = vld [vmem:[#allocation7 + $0x6e0] ss:$16 sps:$4 sm:$0xff]  }
 0x254   :  { %1487 = vmatpush2.bf16.msra.mxu1 %v4885_v5  ;;  %1447 = vmatprep.subr.bf16.mxu0 %v4890_v6  ;;  %v4918_v5 = vld [vmem:[#allocation7 + $0x4c0] ss:$16 sps:$4 sm:$0xff]   ;;  %v4920_v6 = vld [vmem:[#allocation7 + $0x4c4] ss:$16 sps:$4 sm:$0xff]  }
 0x255   :  { %1488 = vmatprep.subr.bf16.mxu1 %v4893_v7  ;;  %v4921_v7 = vld [vmem:[#allocation7 + $0x6c0] ss:$16 sps:$4 sm:$0xff]  }
 0x257   :  { %1448 = vmatpush2.bf16.msra.mxu0 %v4888_v8  ;;  %v4923_v8 = vld [vmem:[#allocation7 + $0x6c4] ss:$16 sps:$4 sm:$0xff]  }
 0x258   :  { %1489 = vmatpush2.bf16.msra.mxu1 %v4891_v9  ;;  %1449 = vmatprep.subr.bf16.mxu0 %v4896_v10  ;;  %v4926_v9 = vld [vmem:[#allocation7 + $0x4a4] ss:$16 sps:$4 sm:$0xff]  }
 0x259   :  { %1490 = vmatprep.subr.bf16.mxu1 %v4899_v11  ;;  %v4929_v10 = vld [vmem:[#allocation7 + $0x6a4] ss:$16 sps:$4 sm:$0xff]   ;;  %v4924_v11 = vld [vmem:[#allocation7 + $0x4a0] ss:$16 sps:$4 sm:$0xff]  }
 0x25b   :  { %1450 = vmatpush2.bf16.msra.mxu0 %v4894_v12  ;;  %v4927_v12 = vld [vmem:[#allocation7 + $0x6a0] ss:$16 sps:$4 sm:$0xff]  }
 0x25c   :  { %1491 = vmatpush2.bf16.msra.mxu1 %v4897_v13  ;;  %1451 = vmatprep.subr.bf16.mxu0 %v4902_v14  ;;  %v4932_v13 = vld [vmem:[#allocation7 + $0x484] ss:$16 sps:$4 sm:$0xff]  }
 0x25d   :  { %1492 = vmatprep.subr.bf16.mxu1 %v4905_v15  ;;  %v4935_v14 = vld [vmem:[#allocation7 + $0x684] ss:$16 sps:$4 sm:$0xff]   ;;  %v4930_v15 = vld [vmem:[#allocation7 + $0x480] ss:$16 sps:$4 sm:$0xff]  }
 0x25f   :  { %1452 = vmatpush2.bf16.msra.mxu0 %v4900_v16  ;;  %v4933_v16 = vld [vmem:[#allocation7 + $0x680] ss:$16 sps:$4 sm:$0xff]  }
 0x260   :  { %1493 = vmatpush2.bf16.msra.mxu1 %v4903_v17  ;;  %1453 = vmatprep.subr.bf16.mxu0 %v4908_v18  ;;  %v4938_v17 = vld [vmem:[#allocation7 + $0x464] ss:$16 sps:$4 sm:$0xff]  }
 0x261   :  { %1494 = vmatprep.subr.bf16.mxu1 %v4911_v19  ;;  %v4941_v18 = vld [vmem:[#allocation7 + $0x664] ss:$16 sps:$4 sm:$0xff]   ;;  %v4936_v19 = vld [vmem:[#allocation7 + $0x460] ss:$16 sps:$4 sm:$0xff]  }
 0x263   :  { %1454 = vmatpush2.bf16.msra.mxu0 %v4906_v22  ;;  %v4939_v22 = vld [vmem:[#allocation7 + $0x660] ss:$16 sps:$4 sm:$0xff]  }
 0x264   :  { %1495 = vmatpush2.bf16.msra.mxu1 %v4909_v23  ;;  %2420 = vmatprep.subr.bf16.mxu0 %v4914_v60  ;;  %v4944_v23 = vld [vmem:[#allocation7 + $0x444] ss:$16 sps:$4 sm:$0xff]  }
 0x265   :  { %2461 = vmatprep.subr.bf16.mxu1 %v4917_v3  ;;  %v4998_v60 = vld [vmem:[#allocation7 + $0x524] ss:$16 sps:$4 sm:$0xff]  }
 0x266   :  { %1456 = vmatmul.mubr.bf16.vlgmr.msra.gmra.mxu0 %v5725_v20  ;;  %v692_v20 = vrot.slane %v679_v32, %v5683_v37  ;;  %v4959_v32 = vld [vmem:[#allocation7 + $0x604] ss:$16 sps:$4 sm:$0xff]  }
 0x267   :  { %1497 = vmatmul.mubr.bf16.vlgmr.msra.gmra.mxu1 %v5727_v21  ;;  %2421 = vmatpush1.bf16.msra.mxu0 %v4912_v47  ;;  %v5001_v3 = vld [vmem:[#allocation7 + $0x724] ss:$16 sps:$4 sm:$0xff]   ;;  %v4996_v47 = vld [vmem:[#allocation7 + $0x520] ss:$16 sps:$4 sm:$0xff]  }
 0x268   :  { %2462 = vmatpush1.bf16.msra.mxu1 %v4915_v4  ;;  %2422 = vmatprep.subr.bf16.mxu0 %v4920_v6  ;;  %v4999_v4 = vld [vmem:[#allocation7 + $0x720] ss:$16 sps:$4 sm:$0xff]   ;;  %v5007_v6 = vld [vmem:[#allocation7 + $0x704] ss:$16 sps:$4 sm:$0xff]  }
 0x269   :  { %2463 = vmatprep.subr.bf16.mxu1 %v4923_v8  ;;  %v5005_v8 = vld [vmem:[#allocation7 + $0x700] ss:$16 sps:$4 sm:$0xff]  }
 0x26b   :  { %2423 = vmatpush1.bf16.msra.mxu0 %v4918_v5  ;;  %v5004_v5 = vld [vmem:[#allocation7 + $0x504] ss:$16 sps:$4 sm:$0xff]  }
 0x26c   :  { %2464 = vmatpush1.bf16.msra.mxu1 %v4921_v7  ;;  %2424 = vmatprep.subr.bf16.mxu0 %v4926_v9  ;;  %v5002_v7 = vld [vmem:[#allocation7 + $0x500] ss:$16 sps:$4 sm:$0xff]   ;;  %v5010_v9 = vld [vmem:[#allocation7 + $0x4ec] ss:$16 sps:$4 sm:$0xff]  }
 0x26d   :  { %2465 = vmatprep.subr.bf16.mxu1 %v4929_v10  ;;  %v5013_v10 = vld [vmem:[#allocation7 + $0x6ec] ss:$16 sps:$4 sm:$0xff]  }
 0x26f   :  { %2425 = vmatpush1.bf16.msra.mxu0 %v4924_v11 }
 0x270   :  { %2466 = vmatpush1.bf16.msra.mxu1 %v4927_v12  ;;  %2426 = vmatprep.subr.bf16.mxu0 %v4932_v13 }
 0x271   :  { %2467 = vmatprep.subr.bf16.mxu1 %v4935_v14 }
 0x273   :  { %2427 = vmatpush1.bf16.msra.mxu0 %v4930_v15 }
 0x274   :  { %2468 = vmatpush1.bf16.msra.mxu1 %v4933_v16  ;;  %2428 = vmatprep.subr.bf16.mxu0 %v4938_v17 }
 0x275   :  { %2469 = vmatprep.subr.bf16.mxu1 %v4941_v18 }
 0x277   :  { %2429 = vmatpush1.bf16.msra.mxu0 %v4936_v19  ;;  %v1506_v19 = vld [vmem:[#allocation11 + $0x1] ss:$4 sm:$0xf] }
 0x278   :  { %2470 = vmatpush1.bf16.msra.mxu1 %v4939_v22  ;;  %2430 = vmatprep.subr.bf16.mxu0 %v4944_v23  ;;  %v1508_v22 = vld [vmem:[#allocation13 + $0x1] ss:$4 sm:$0xf]  ;;  %v1538_v23 = vrot.slane %v1506_v19, %v5685_v39 }
 0x2e6   :  { %v1375_v24 = vpop.f32.mrf.mxu0 }
 0x2e7   :  { %v1416_v25 = vpop.f32.mrf.mxu1  ;;  %v1376_v38 = vadd.f32 %v1375_v24, %v684_v34  ;;  %v4947_v24 = vld [vmem:[#allocation7 + $0x644] ss:$16 sps:$4 sm:$0xff]   ;;  %v4957_v34 = vld [vmem:[#allocation7 + $0x600] ss:$16 sps:$4 sm:$0xff]  }
 0x2e8   :  { %v1377_v26 = vpop.f32.mrf.mxu0  ;;  %2471 = vmatprep.subr.bf16.mxu1 %v4947_v24  ;;  %v1546_v24 = vrot.slane %v1506_v19, %v5690_v43 }
 0x2e9   :  { %v1418_v27 = vpop.f32.mrf.mxu1  ;;  %v1378_v35 = vadd.f32 %v1377_v26, %v688_v33  ;;  %v5738_v21 = vadd.f32 %v1416_v25, %v1376_v38  ;;  %v4942_v25 = vld [vmem:[#allocation7 + $0x440] ss:$16 sps:$4 sm:$0xff]   ;;  %v4965_v38 = vld [vmem:[#allocation7 + $0x7e4] ss:$16 sps:$4 sm:$0xff]  }
 0x2ea   :  { %v1379_v28 = vpop.f32.mrf.mxu0  ;;  %v4945_v26 = vld [vmem:[#allocation7 + $0x640] ss:$16 sps:$4 sm:$0xff]   ;;  %2431 = vmatpush1.bf16.msra.mxu0 %v4942_v25  ;;  %v1534_v25 = vrot.slane %v1506_v19, %v5681_v36 }
 0x2eb   :  { %v1420_v29 = vpop.f32.mrf.mxu1  ;;  %v5735_v40 = vadd.f32 %v1418_v27, %v1378_v35  ;;  %v1515_v51 = vmul.f32 %v5738_v21, %v5738_v21  ;;  %v4950_v27 = vld [vmem:[#allocation7 + $0x424] ss:$16 sps:$4 sm:$0xff]   ;;  %2472 = vmatpush1.bf16.msra.mxu1 %v4945_v26  ;;  %v4954_v33 = vld [vmem:[#allocation7 + $0x400] ss:$16 sps:$4 sm:$0xff]   ;;  %v1542_v26 = vrot.slane %v1506_v19, %v5683_v37 }
 0x2ec   :  { %v1380_v30 = vpop.f32.mrf.mxu0  ;;  %v4953_v28 = vld [vmem:[#allocation7 + $0x624] ss:$16 sps:$4 sm:$0xff]   ;;  %v4948_v29 = vld [vmem:[#allocation7 + $0x420] ss:$16 sps:$4 sm:$0xff]   ;;  %2432 = vmatprep.subr.bf16.mxu0 %v4950_v27 }
 0x2ed   :  { %v1421_v31 = vpop.f32.mrf.mxu1  ;;  %v1516_v44 = vmul.f32 %v5735_v40, %v5735_v40  ;;  %v1509_v55 = vadd.f32 %v5735_v40, %v5738_v21  ;;  %v4951_v30 = vld [vmem:[#allocation7 + $0x620] ss:$16 sps:$4 sm:$0xff]   ;;  %2473 = vmatprep.subr.bf16.mxu1 %v4953_v28  ;;  %v4962_v35 = vld [vmem:[#allocation7 + $0x5e4] ss:$16 sps:$4 sm:$0xff]   ;;  %v1567_v28 = vrot.slane %v1508_v22, %v5685_v39 }
 0x2ee   :  { %v4956_v31 = vld [vmem:[#allocation7 + $0x404] ss:$16 sps:$4 sm:$0xff]   ;;  %2433 = vmatpush1.bf16.msra.mxu0 %v4948_v29  ;;  %v1575_v29 = vrot.slane %v1508_v22, %v5690_v43 }
 0x2ef   :  { %v1519_v62 = vadd.f32 %v1516_v44, %v1515_v51  ;;  %2474 = vmatpush1.bf16.msra.mxu1 %v4951_v30  ;;  %2434 = vmatprep.subr.bf16.mxu0 %v4956_v31  ;;  %v4971_v44 = vld [vmem:[#allocation7 + $0x7c4] ss:$16 sps:$4 sm:$0xff]  }
 0x2f0   :  { %2475 = vmatprep.subr.bf16.mxu1 %v4959_v32  ;;  %v4977_v51 = vld [vmem:[#allocation7 + $0x7a4] ss:$16 sps:$4 sm:$0xff]  }
 0x2f2   :  { %2435 = vmatpush1.bf16.msra.mxu0 %v4954_v33 }
 0x2f3   :  { %2476 = vmatpush1.bf16.msra.mxu1 %v4957_v34  ;;  %2436 = vmatprep.subr.bf16.mxu0 %v4962_v35  ;;  %v1563_v34 = vrot.slane %v1508_v22, %v5681_v36  ;;  %v1571_v35 = vrot.slane %v1508_v22, %v5683_v37  ;;  %v5016_v22 = vld [vmem:[#allocation7 + $0x4cc] ss:$16 sps:$4 sm:$0xff]  }
 0x2f4   :  { %2477 = vmatprep.subr.bf16.mxu1 %v4965_v38 }
 0x326   :  { %v1457_v42 = vpop.f32.mrf.mxu0 }
 0x327   :  { %v1458_v45 = vadd.f32 %v1457_v42, %v692_v20  ;;  %v1498_v48 = vpop.f32.mrf.mxu1  ;;  %v4960_v20 = vld [vmem:[#allocation7 + $0x5e0] ss:$16 sps:$4 sm:$0xff]   ;;  %v4968_v42 = vld [vmem:[#allocation7 + $0x5c4] ss:$16 sps:$4 sm:$0xff]  }
 0x328   :  { %v1459_v49 = vpop.f32.mrf.mxu0  ;;  %2437 = vmatpush2.bf16.msra.mxu0 %v4960_v20 }
 0x329   :  { %v5745_v52 = vadd.f32 %v1498_v48, %v1458_v45  ;;  %v1460_v53 = vadd.f32 %v1459_v49, %v696_v41  ;;  %v1500_v54 = vpop.f32.mrf.mxu1  ;;  %v4963_v41 = vld [vmem:[#allocation7 + $0x7e0] ss:$16 sps:$4 sm:$0xff]   ;;  %2438 = vmatprep.subr.bf16.mxu0 %v4968_v42  ;;  %v4974_v49 = vld [vmem:[#allocation7 + $0x5a4] ss:$16 sps:$4 sm:$0xff]  }
 0x32a   :  { %v1461_v56 = vpop.f32.mrf.mxu0  ;;  %2478 = vmatpush2.bf16.msra.mxu1 %v4963_v41  ;;  %v4966_v45 = vld [vmem:[#allocation7 + $0x5c0] ss:$16 sps:$4 sm:$0xff]  }
 0x32b   :  { %v1517_v57 = vmul.f32 %v5745_v52, %v5745_v52  ;;  %v5751_v58 = vadd.f32 %v1500_v54, %v1460_v53  ;;  %v1502_v59 = vpop.f32.mrf.mxu1  ;;  %v1510_v61 = vadd.f32 %v1509_v55, %v5745_v52  ;;  %v4969_v48 = vld [vmem:[#allocation7 + $0x7c0] ss:$16 sps:$4 sm:$0xff]   ;;  %2479 = vmatprep.subr.bf16.mxu1 %v4971_v44  ;;  %v4980_v55 = vld [vmem:[#allocation7 + $0x584] ss:$16 sps:$4 sm:$0xff]  }
 0x32c   :  { %v1462_v63 = vpop.f32.mrf.mxu0  ;;  %2439 = vmatpush2.bf16.msra.mxu0 %v4966_v45  ;;  %v4972_v53 = vld [vmem:[#allocation7 + $0x5a0] ss:$16 sps:$4 sm:$0xff]   ;;  %v4983_v56 = vld [vmem:[#allocation7 + $0x784] ss:$16 sps:$4 sm:$0xff]  }
 0x32d   :  { %v1503_v0 = vpop.f32.mrf.mxu1  ;;  %v1511_v1 = vadd.f32 %v1510_v61, %v5751_v58  ;;  %v1518_v50 = vmul.f32 %v5751_v58, %v5751_v58  ;;  %v1520_v2 = vadd.f32 %v1519_v62, %v1517_v57  ;;  %v4975_v54 = vld [vmem:[#allocation7 + $0x7a0] ss:$16 sps:$4 sm:$0xff]   ;;  %2440 = vmatprep.subr.bf16.mxu0 %v4974_v49  ;;  %v4986_v61 = vld [vmem:[#allocation7 + $0x564] ss:$16 sps:$4 sm:$0xff]  }
 0x32e   :  { %2480 = vmatpush2.bf16.msra.mxu1 %v4969_v48  ;;  %v4978_v57 = vld [vmem:[#allocation7 + $0x580] ss:$16 sps:$4 sm:$0xff]   ;;  %v4989_v62 = vld [vmem:[#allocation7 + $0x764] ss:$16 sps:$4 sm:$0xff]  }
 0x32f   :  { %1512 = vadd.xlane.f32.xlu1 %v1511_v1  ;;  %v1521_v46 = vadd.f32 %v1520_v2, %v1518_v50  ;;  %2481 = vmatprep.subr.bf16.mxu1 %v4977_v51  ;;  %v4981_v59 = vld [vmem:[#allocation7 + $0x780] ss:$16 sps:$4 sm:$0xff]   ;;  %v4992_v1 = vld [vmem:[#allocation7 + $0x544] ss:$16 sps:$4 sm:$0xff]  }
 0x330   :  { %2441 = vmatpush2.bf16.msra.mxu0 %v4972_v53  ;;  %v4984_v63 = vld [vmem:[#allocation7 + $0x560] ss:$16 sps:$4 sm:$0xff]   ;;  %v4995_v50 = vld [vmem:[#allocation7 + $0x744] ss:$16 sps:$4 sm:$0xff]  }
 0x331   :  { %2442 = vmatprep.subr.bf16.mxu0 %v4980_v55  ;;  %v4987_v0 = vld [vmem:[#allocation7 + $0x760] ss:$16 sps:$4 sm:$0xff]  }
 0x332   :  { %2482 = vmatpush2.bf16.msra.mxu1 %v4975_v54  ;;  %v4990_v2 = vld [vmem:[#allocation7 + $0x540] ss:$16 sps:$4 sm:$0xff]  }
 0x333   :  { %1522 = vadd.xlane.f32.xlu1 %v1521_v46  ;;  %2483 = vmatprep.subr.bf16.mxu1 %v4983_v56  ;;  %v4993_v46 = vld [vmem:[#allocation7 + $0x740] ss:$16 sps:$4 sm:$0xff]  }
 0x334   :  { %2443 = vmatpush2.bf16.msra.mxu0 %v4978_v57 }
 0x335   :  { %2444 = vmatprep.subr.bf16.mxu0 %v4986_v61 }
 0x336   :  { %2484 = vmatpush2.bf16.msra.mxu1 %v4981_v59 }
 0x337   :  { %2485 = vmatprep.subr.bf16.mxu1 %v4989_v62 }
 0x338   :  { %2445 = vmatpush2.bf16.msra.mxu0 %v4984_v63 }
 0x339   :  { %2446 = vmatprep.subr.bf16.mxu0 %v4992_v1 }
 0x33a   :  { %2486 = vmatpush2.bf16.msra.mxu1 %v4987_v0 }
 0x33b   :  { %2487 = vmatprep.subr.bf16.mxu1 %v4995_v50 }
 0x33c   :  { %2447 = vmatpush2.bf16.msra.mxu0 %v4990_v2 }
 0x33d   :  { %2448 = vmatprep.subr.bf16.mxu0 %v4998_v60 }
 0x33e   :  { %2488 = vmatpush2.bf16.msra.mxu1 %v4993_v46 }
 0x33f   :  { %2489 = vmatprep.subr.bf16.mxu1 %v5001_v3 }
 0x340   :  { %2449 = vmatpush2.bf16.msra.mxu0 %v4996_v47 }
 0x341   :  { %2450 = vmatprep.subr.bf16.mxu0 %v5004_v5 }
 0x342   :  { %2490 = vmatpush2.bf16.msra.mxu1 %v4999_v4 }
 0x343   :  { %2491 = vmatprep.subr.bf16.mxu1 %v5007_v6 }
 0x344   :  { %2451 = vmatpush2.bf16.msra.mxu0 %v5002_v7 }
 0x345   :  { %2502 = vmatprep.subr.bf16.mxu0 %v5010_v9 }
 0x346   :  { %2492 = vmatpush2.bf16.msra.mxu1 %v5005_v8 }
 0x347   :  { %2543 = vmatprep.subr.bf16.mxu1 %v5013_v10 }
 0x3b8   :  { %v1513_v11 = vpop.xlane.xlu1 %1512 }
 0x3b9   :  { %v1514_v12 = vmul.f32 0.001953125, %v1513_v11 }
 0x3bb   :  { %v1525_v14 = vmul.f32 %v1514_v12, %v1514_v12 }
 0x3bc   :  { %v1523_v13 = vpop.xlane.xlu1 %1522 }
 0x3bd   :  { %v1524_v15 = vmul.f32 0.001953125, %v1523_v13 }
 0x3bf   :  { %v1526_v16 = vsub.f32 %v1524_v15, %v1525_v14  ;;  %v5008_v15 = vld [vmem:[#allocation7 + $0x4e8] ss:$16 sps:$4 sm:$0xff]  }
 0x3c1   :  { %v1527_v17 = vmax.f32 %v1526_v16, 0.0 }
 0x3c3   :  { %v1528_v18 = vadd.f32 1e-05, %v1527_v17  ;;  %v5011_v17 = vld [vmem:[#allocation7 + $0x6e8] ss:$16 sps:$4 sm:$0xff]  }
 0x3c5   :  { %5346 = vrsqrt.f32 %v1528_v18 }
 0x3d2   :  { %v5347_v27 = vpop.eup %5346 }
 0x3d3   :  { %v1552_v30 = vmul.f32 %v5347_v27, %v1538_v23  ;;  %v1554_v31 = vmul.f32 %v5347_v27, %v1546_v24  ;;  %v1551_v32 = vmul.f32 %v5347_v27, %v1534_v25  ;;  %v1553_v33 = vmul.f32 %v5347_v27, %v1542_v26  ;;  %v5019_v23 = vld [vmem:[#allocation7 + $0x6cc] ss:$16 sps:$4 sm:$0xff]   ;;  %v5014_v24 = vld [vmem:[#allocation7 + $0x4c8] ss:$16 sps:$4 sm:$0xff]  }
 0x3d4   :  { %v5017_v25 = vld [vmem:[#allocation7 + $0x6c8] ss:$16 sps:$4 sm:$0xff]   ;;  %v5022_v26 = vld [vmem:[#allocation7 + $0x4ac] ss:$16 sps:$4 sm:$0xff]  }
 0x3d5   :  { %v1556_v38 = vmul.f32 %v1552_v30, %v1514_v12  ;;  %v1558_v20 = vmul.f32 %v1554_v31, %v1514_v12  ;;  %v1555_v41 = vmul.f32 %v1551_v32, %v1514_v12  ;;  %v1557_v42 = vmul.f32 %v1553_v33, %v1514_v12  ;;  %v5025_v27 = vld [vmem:[#allocation7 + $0x6ac] ss:$16 sps:$4 sm:$0xff]  }
 0x3d6   :  { %v1585_v45 = vmul.f32 %v1552_v30, %v5735_v40  ;;  %v1587_v49 = vmul.f32 %v1554_v31, %v5751_v58  ;;  %v1584_v53 = vmul.f32 %v1551_v32, %v5738_v21  ;;  %v1586_v55 = vmul.f32 %v1553_v33, %v5745_v52  ;;  %v5028_v30 = vld [vmem:[#allocation7 + $0x48c] ss:$16 sps:$4 sm:$0xff]   ;;  %v5026_v32 = vld [vmem:[#allocation7 + $0x488] ss:$16 sps:$4 sm:$0xff]  }
 0x3d7   :  { %v1581_v44 = vsub.f32 %v1567_v28, %v1556_v38  ;;  %v1583_v48 = vsub.f32 %v1575_v29, %v1558_v20  ;;  %v1580_v51 = vsub.f32 %v1563_v34, %v1555_v41  ;;  %v1582_v54 = vsub.f32 %v1571_v35, %v1557_v42  ;;  %v5020_v28 = vld [vmem:[#allocation7 + $0x4a8] ss:$16 sps:$4 sm:$0xff]   ;;  %v5031_v31 = vld [vmem:[#allocation7 + $0x68c] ss:$16 sps:$4 sm:$0xff]  }
 0x3d8   :  { %v5023_v29 = vld [vmem:[#allocation7 + $0x6a8] ss:$16 sps:$4 sm:$0xff]   ;;  %v5034_v34 = vld [vmem:[#allocation7 + $0x46c] ss:$16 sps:$4 sm:$0xff]  }
 0x3d9   :  { %v1589_v56 = vadd.f32 %v1585_v45, %v1581_v44  ;;  %v1591_v57 = vadd.f32 %v1587_v49, %v1583_v48  ;;  %v1588_v59 = vadd.f32 %v1584_v53, %v1580_v51  ;;  %v1590_v61 = vadd.f32 %v1586_v55, %v1582_v54  ;;  %v5029_v33 = vld [vmem:[#allocation7 + $0x688] ss:$16 sps:$4 sm:$0xff]   ;;  %v5037_v35 = vld [vmem:[#allocation7 + $0x66c] ss:$16 sps:$4 sm:$0xff]  }
 0x3da   :  { %v5032_v38 = vld [vmem:[#allocation7 + $0x468] ss:$16 sps:$4 sm:$0xff]   ;;  %v5040_v41 = vld [vmem:[#allocation7 + $0x44c] ss:$16 sps:$4 sm:$0xff]  }
 0x3db   :  { %v1593_v62 = vpack.c.bf16 %v1589_v56, %v1589_v56  ;;  %v1595_v63 = vpack.c.bf16 %v1591_v57, %v1591_v57  ;;  %v1592_v0 = vpack.c.bf16 %v1588_v59, %v1588_v59  ;;  %v1594_v1 = vpack.c.bf16 %v1590_v61, %v1590_v61  ;;  %v5035_v20 = vld [vmem:[#allocation7 + $0x668] ss:$16 sps:$4 sm:$0xff]   ;;  %v5043_v42 = vld [vmem:[#allocation7 + $0x64c] ss:$16 sps:$4 sm:$0xff]  }
 0x3dc   :  { %v5038_v44 = vld [vmem:[#allocation7 + $0x448] ss:$16 sps:$4 sm:$0xff]   ;;  %v5046_v48 = vld [vmem:[#allocation7 + $0x42c] ss:$16 sps:$4 sm:$0xff]  }
 0x3dd   :  { %v4314_v50 = vmul.bf16 3216621497, %v1593_v62  ;;  %v4316_v2 = vmul.bf16 3216621497, %v1595_v63  ;;  %v4313_v40 = vmul.bf16 3216621497, %v1592_v0 }
 0x3de   :  { %v4315_v46 = vmul.bf16 3216621497, %v1594_v1  ;;  %v5041_v45 = vld [vmem:[#allocation7 + $0x648] ss:$16 sps:$4 sm:$0xff]   ;;  %v5049_v49 = vld [vmem:[#allocation7 + $0x62c] ss:$16 sps:$4 sm:$0xff]  }
 0x3df   :  { %5348 = vpow.bf16 %v4314_v50  ;;  %v5044_v51 = vld [vmem:[#allocation7 + $0x428] ss:$16 sps:$4 sm:$0xff]   ;;  %v5052_v54 = vld [vmem:[#allocation7 + $0x40c] ss:$16 sps:$4 sm:$0xff]  }
 0x3e0   :  { %5350 = vpow.bf16 %v4316_v2  ;;  %v5047_v53 = vld [vmem:[#allocation7 + $0x628] ss:$16 sps:$4 sm:$0xff]   ;;  %v5055_v55 = vld [vmem:[#allocation7 + $0x60c] ss:$16 sps:$4 sm:$0xff]  }
 0x3e1   :  { %5352 = vpow.bf16 %v4313_v40  ;;  %v5050_v56 = vld [vmem:[#allocation7 + $0x408] ss:$16 sps:$4 sm:$0xff]   ;;  %v5058_v59 = vld [vmem:[#allocation7 + $0x5ec] ss:$16 sps:$4 sm:$0xff]  }
 0x3e2   :  { %5354 = vpow.bf16 %v4315_v46  ;;  %v5053_v57 = vld [vmem:[#allocation7 + $0x608] ss:$16 sps:$4 sm:$0xff]   ;;  %v5061_v61 = vld [vmem:[#allocation7 + $0x7ec] ss:$16 sps:$4 sm:$0xff]  }
 0x3e3   :  { %v5062_v50 = vld [vmem:[#allocation7 + $0x5c8] ss:$16 sps:$4 sm:$0xff]   ;;  %v5070_v40 = vld [vmem:[#allocation7 + $0x5ac] ss:$16 sps:$4 sm:$0xff]  }
 0x3e4   :  { %v5065_v2 = vld [vmem:[#allocation7 + $0x7c8] ss:$16 sps:$4 sm:$0xff]   ;;  %v5073_v46 = vld [vmem:[#allocation7 + $0x7ac] ss:$16 sps:$4 sm:$0xff]  }
 0x3ed   :  { %v5349_v21 = vpop.eup %5348 }
 0x3ee   :  { %v5351_v58 = vpop.eup %5350  ;;  %v1613_v60 = vadd.bf16 1065369472, %v5349_v21  ;;  %v5068_v21 = vld [vmem:[#allocation7 + $0x5a8] ss:$16 sps:$4 sm:$0xff]  }
 0x3ef   :  { %v5353_v52 = vpop.eup %5352  ;;  %v1615_v3 = vadd.bf16 1065369472, %v5351_v58  ;;  %v5071_v58 = vld [vmem:[#allocation7 + $0x7a8] ss:$16 sps:$4 sm:$0xff]  }
 0x3f0   :  { %v5355_v47 = vpop.eup %5354  ;;  %5356 = vrcp.bf16 %v1613_v60  ;;  %v1612_v4 = vadd.bf16 1065369472, %v5353_v52  ;;  %v5076_v60 = vld [vmem:[#allocation7 + $0x58c] ss:$16 sps:$4 sm:$0xff]  }
 0x3f1   :  { %5358 = vrcp.bf16 %v1615_v3  ;;  %v1614_v5 = vadd.bf16 1065369472, %v5355_v47  ;;  %v5079_v52 = vld [vmem:[#allocation7 + $0x78c] ss:$16 sps:$4 sm:$0xff]   ;;  %v5074_v3 = vld [vmem:[#allocation7 + $0x588] ss:$16 sps:$4 sm:$0xff]  }
 0x3f2   :  { %5360 = vrcp.bf16 %v1612_v4  ;;  %v5077_v47 = vld [vmem:[#allocation7 + $0x788] ss:$16 sps:$4 sm:$0xff]   ;;  %v5082_v4 = vld [vmem:[#allocation7 + $0x56c] ss:$16 sps:$4 sm:$0xff]  }
 0x3f3   :  { %5362 = vrcp.bf16 %v1614_v5  ;;  %v5085_v5 = vld [vmem:[#allocation7 + $0x76c] ss:$16 sps:$4 sm:$0xff]  }
 0x3fe   :  { %v5357_v6 = vpop.eup %5356 }
 0x3ff   :  { %v5359_v7 = vpop.eup %5358  ;;  %v1619_v8 = vmul.bf16 1065369472, %v5357_v6  ;;  %v5080_v6 = vld [vmem:[#allocation7 + $0x568] ss:$16 sps:$4 sm:$0xff]  }
 0x400   :  { %v5361_v9 = vpop.eup %5360  ;;  %v1623_v10 = vmul.bf16 1065369472, %v5359_v7  ;;  %v5083_v7 = vld [vmem:[#allocation7 + $0x768] ss:$16 sps:$4 sm:$0xff]  }
 0x401   :  { %v5363_v11 = vpop.eup %5362  ;;  %v1625_v12 = vmul.bf16 %v1619_v8, %v1593_v62  ;;  %v1617_v13 = vmul.bf16 1065369472, %v5361_v9  ;;  %v5056_v62 = vld [vmem:[#allocation7 + $0x5e8] ss:$16 sps:$4 sm:$0xff]   ;;  %v5088_v8 = vld [vmem:[#allocation7 + $0x54c] ss:$16 sps:$4 sm:$0xff]  }
 0x402   :  { %v1627_v14 = vmul.bf16 %v1623_v10, %v1595_v63  ;;  %v1621_v16 = vmul.bf16 1065369472, %v5363_v11  ;;  %v5059_v63 = vld [vmem:[#allocation7 + $0x7e8] ss:$16 sps:$4 sm:$0xff]   ;;  %v5091_v9 = vld [vmem:[#allocation7 + $0x74c] ss:$16 sps:$4 sm:$0xff]  }
 0x403   :  { %2452 = vmatprep.mubr.bf16.mxu0 %v1625_v12  ;;  %v5769_v18 = vmul.bf16 %v1617_v13, %v1592_v0  ;;  %v5064_v0 = vld [vmem:[#allocation7 + $0x5cc] ss:$16 sps:$4 sm:$0xff]   ;;  %v5086_v10 = vld [vmem:[#allocation7 + $0x548] ss:$16 sps:$4 sm:$0xff]  }
 0x404   :  { %2493 = vmatprep.mubr.bf16.mxu1 %v1627_v14  ;;  %v5771_v19 = vmul.bf16 %v1621_v16, %v1594_v1  ;;  %v5067_v1 = vld [vmem:[#allocation7 + $0x7cc] ss:$16 sps:$4 sm:$0xff]   ;;  %v5089_v11 = vld [vmem:[#allocation7 + $0x748] ss:$16 sps:$4 sm:$0xff]  }
 0x405   :  { %2453 = vmatmul.mubr.bf16.vlgmr.msra.gmra.mxu0 %v5769_v18  ;;  %v5097_v13 = vld [vmem:[#allocation7 + $0x72c] ss:$16 sps:$4 sm:$0xff]  }
 0x406   :  { %2494 = vmatmul.mubr.bf16.vlgmr.msra.gmra.mxu1 %v5771_v19  ;;  %2503 = vmatpush1.bf16.msra.mxu0 %v5008_v15  ;;  %v5095_v15 = vld [vmem:[#allocation7 + $0x728] ss:$16 sps:$4 sm:$0xff]   ;;  %v5100_v16 = vld [vmem:[#allocation7 + $0x50c] ss:$16 sps:$4 sm:$0xff]  }
 0x407   :  { %2544 = vmatpush1.bf16.msra.mxu1 %v5011_v17  ;;  %2534 = vmatprep.mubr.bf16.mxu0 %v1625_v12  ;;  %v5094_v12 = vld [vmem:[#allocation7 + $0x52c] ss:$16 sps:$4 sm:$0xff]  }
 0x408   :  { %2575 = vmatprep.mubr.bf16.mxu1 %v1627_v14  ;;  %2504 = vmatprep.subr.bf16.mxu0 %v5016_v22  ;;  %v5092_v14 = vld [vmem:[#allocation7 + $0x528] ss:$16 sps:$4 sm:$0xff]   ;;  %v5103_v17 = vld [vmem:[#allocation7 + $0x70c] ss:$16 sps:$4 sm:$0xff]  }
 0x409   :  { %2545 = vmatprep.subr.bf16.mxu1 %v5019_v23  ;;  %v5098_v22 = vld [vmem:[#allocation7 + $0x508] ss:$16 sps:$4 sm:$0xff]  }
 0x40a   :  { %2505 = vmatpush1.bf16.msra.mxu0 %v5014_v24  ;;  %v5101_v23 = vld [vmem:[#allocation7 + $0x708] ss:$16 sps:$4 sm:$0xff]  }
 0x40b   :  { %2546 = vmatpush1.bf16.msra.mxu1 %v5017_v25  ;;  %2506 = vmatprep.subr.bf16.mxu0 %v5022_v26 }
 0x40c   :  { %2547 = vmatprep.subr.bf16.mxu1 %v5025_v27 }
 0x40e   :  { %2507 = vmatpush1.bf16.msra.mxu0 %v5020_v28 }
 0x40f   :  { %2548 = vmatpush1.bf16.msra.mxu1 %v5023_v29  ;;  %2508 = vmatprep.subr.bf16.mxu0 %v5028_v30 }
 0x410   :  { %2549 = vmatprep.subr.bf16.mxu1 %v5031_v31 }
 0x412   :  { %2509 = vmatpush1.bf16.msra.mxu0 %v5026_v32  ;;  %v1758_v32 = vld [vmem:[#allocation10 + $0x2] ss:$4 sm:$0xf] }
 0x413   :  { %2550 = vmatpush1.bf16.msra.mxu1 %v5029_v33  ;;  %2510 = vmatprep.subr.bf16.mxu0 %v5034_v34  ;;  %v1767_v33 = vrot.slane %v1758_v32, %v5685_v39  ;;  %v1763_v34 = vrot.slane %v1758_v32, %v5681_v36 }
 0x414   :  { %2551 = vmatprep.subr.bf16.mxu1 %v5037_v35 }
 0x416   :  { %2511 = vmatpush1.bf16.msra.mxu0 %v5032_v38 }
 0x417   :  { %2552 = vmatpush1.bf16.msra.mxu1 %v5035_v20  ;;  %2512 = vmatprep.subr.bf16.mxu0 %v5040_v41  ;;  %v1775_v41 = vrot.slane %v1758_v32, %v5690_v43 }
 0x418   :  { %2553 = vmatprep.subr.bf16.mxu1 %v5043_v42 }
 0x41a   :  { %2513 = vmatpush1.bf16.msra.mxu0 %v5038_v44 }
 0x41b   :  { %2554 = vmatpush1.bf16.msra.mxu1 %v5041_v45  ;;  %2514 = vmatprep.subr.bf16.mxu0 %v5046_v48 }
 0x41c   :  { %2555 = vmatprep.subr.bf16.mxu1 %v5049_v49 }
 0x41e   :  { %2515 = vmatpush1.bf16.msra.mxu0 %v5044_v51 }
 0x41f   :  { %2556 = vmatpush1.bf16.msra.mxu1 %v5047_v53  ;;  %2516 = vmatprep.subr.bf16.mxu0 %v5052_v54 }
 0x420   :  { %2557 = vmatprep.subr.bf16.mxu1 %v5055_v55 }
 0x422   :  { %2517 = vmatpush1.bf16.msra.mxu0 %v5050_v56 }
 0x423   :  { %2558 = vmatpush1.bf16.msra.mxu1 %v5053_v57  ;;  %2518 = vmatprep.subr.bf16.mxu0 %v5058_v59 }
 0x424   :  { %2559 = vmatprep.subr.bf16.mxu1 %v5061_v61 }
 0x426   :  { %2519 = vmatpush2.bf16.msra.mxu0 %v5056_v62 }
 0x427   :  { %2560 = vmatpush2.bf16.msra.mxu1 %v5059_v63  ;;  %2520 = vmatprep.subr.bf16.mxu0 %v5064_v0 }
 0x428   :  { %2561 = vmatprep.subr.bf16.mxu1 %v5067_v1 }
 0x42a   :  { %2521 = vmatpush2.bf16.msra.mxu0 %v5062_v50 }
 0x42b   :  { %2562 = vmatpush2.bf16.msra.mxu1 %v5065_v2  ;;  %2522 = vmatprep.subr.bf16.mxu0 %v5070_v40 }
 0x42c   :  { %2563 = vmatprep.subr.bf16.mxu1 %v5073_v46 }
 0x42e   :  { %2523 = vmatpush2.bf16.msra.mxu0 %v5068_v21 }
 0x42f   :  { %2564 = vmatpush2.bf16.msra.mxu1 %v5071_v58  ;;  %2524 = vmatprep.subr.bf16.mxu0 %v5076_v60  ;;  %v5106_v58 = vld [vmem:[#allocation7 + $0x8e4] ss:$16 sps:$4 sm:$0xff]  }
 0x430   :  { %2565 = vmatprep.subr.bf16.mxu1 %v5079_v52  ;;  %v5109_v60 = vld [vmem:[#allocation7 + $0xae4] ss:$16 sps:$4 sm:$0xff]   ;;  %v5104_v52 = vld [vmem:[#allocation7 + $0x8e0] ss:$16 sps:$4 sm:$0xff]  }
 0x432   :  { %2525 = vmatpush2.bf16.msra.mxu0 %v5074_v3  ;;  %v5107_v3 = vld [vmem:[#allocation7 + $0xae0] ss:$16 sps:$4 sm:$0xff]  }
 0x433   :  { %2566 = vmatpush2.bf16.msra.mxu1 %v5077_v47  ;;  %2526 = vmatprep.subr.bf16.mxu0 %v5082_v4  ;;  %v5110_v47 = vld [vmem:[#allocation7 + $0x8c0] ss:$16 sps:$4 sm:$0xff]   ;;  %v5112_v4 = vld [vmem:[#allocation7 + $0x8c4] ss:$16 sps:$4 sm:$0xff]  }
 0x434   :  { %2567 = vmatprep.subr.bf16.mxu1 %v5085_v5  ;;  %v5113_v5 = vld [vmem:[#allocation7 + $0xac0] ss:$16 sps:$4 sm:$0xff]  }
 0x436   :  { %2527 = vmatpush2.bf16.msra.mxu0 %v5080_v6  ;;  %v5115_v6 = vld [vmem:[#allocation7 + $0xac4] ss:$16 sps:$4 sm:$0xff]  }
 0x437   :  { %2568 = vmatpush2.bf16.msra.mxu1 %v5083_v7  ;;  %2528 = vmatprep.subr.bf16.mxu0 %v5088_v8  ;;  %v5118_v7 = vld [vmem:[#allocation7 + $0x8a4] ss:$16 sps:$4 sm:$0xff]  }
 0x438   :  { %2569 = vmatprep.subr.bf16.mxu1 %v5091_v9  ;;  %v5121_v8 = vld [vmem:[#allocation7 + $0xaa4] ss:$16 sps:$4 sm:$0xff]   ;;  %v5116_v9 = vld [vmem:[#allocation7 + $0x8a0] ss:$16 sps:$4 sm:$0xff]  }
 0x43a   :  { %2529 = vmatpush2.bf16.msra.mxu0 %v5086_v10  ;;  %v5119_v10 = vld [vmem:[#allocation7 + $0xaa0] ss:$16 sps:$4 sm:$0xff]  }
 0x43b   :  { %2570 = vmatpush2.bf16.msra.mxu1 %v5089_v11  ;;  %2530 = vmatprep.subr.bf16.mxu0 %v5094_v12  ;;  %v5124_v11 = vld [vmem:[#allocation7 + $0x884] ss:$16 sps:$4 sm:$0xff]  }
 0x43c   :  { %2571 = vmatprep.subr.bf16.mxu1 %v5097_v13  ;;  %v5127_v12 = vld [vmem:[#allocation7 + $0xa84] ss:$16 sps:$4 sm:$0xff]   ;;  %v5122_v13 = vld [vmem:[#allocation7 + $0x880] ss:$16 sps:$4 sm:$0xff]  }
 0x43e   :  { %2531 = vmatpush2.bf16.msra.mxu0 %v5092_v14  ;;  %v5125_v14 = vld [vmem:[#allocation7 + $0xa80] ss:$16 sps:$4 sm:$0xff]  }
 0x43f   :  { %2572 = vmatpush2.bf16.msra.mxu1 %v5095_v15  ;;  %2532 = vmatprep.subr.bf16.mxu0 %v5100_v16  ;;  %v5130_v15 = vld [vmem:[#allocation7 + $0x864] ss:$16 sps:$4 sm:$0xff]  }
 0x440   :  { %2573 = vmatprep.subr.bf16.mxu1 %v5103_v17  ;;  %v5133_v16 = vld [vmem:[#allocation7 + $0xa64] ss:$16 sps:$4 sm:$0xff]   ;;  %v5128_v17 = vld [vmem:[#allocation7 + $0x860] ss:$16 sps:$4 sm:$0xff]  }
 0x442   :  { %2533 = vmatpush2.bf16.msra.mxu0 %v5098_v22  ;;  %v5131_v22 = vld [vmem:[#allocation7 + $0xa60] ss:$16 sps:$4 sm:$0xff]  }
 0x443   :  { %2574 = vmatpush2.bf16.msra.mxu1 %v5101_v23  ;;  %3499 = vmatprep.subr.bf16.mxu0 %v5106_v58  ;;  %v5136_v23 = vld [vmem:[#allocation7 + $0x844] ss:$16 sps:$4 sm:$0xff]  }
 0x444   :  { %3540 = vmatprep.subr.bf16.mxu1 %v5109_v60  ;;  %v5190_v58 = vld [vmem:[#allocation7 + $0x924] ss:$16 sps:$4 sm:$0xff]  }
 0x445   :  { %2535 = vmatmul.mubr.bf16.vlgmr.msra.gmra.mxu0 %v5769_v18  ;;  %v1771_v18 = vrot.slane %v1758_v32, %v5683_v37  ;;  %v5151_v32 = vld [vmem:[#allocation7 + $0xa04] ss:$16 sps:$4 sm:$0xff]  }
 0x446   :  { %2576 = vmatmul.mubr.bf16.vlgmr.msra.gmra.mxu1 %v5771_v19  ;;  %3500 = vmatpush1.bf16.msra.mxu0 %v5104_v52  ;;  %v5193_v60 = vld [vmem:[#allocation7 + $0xb24] ss:$16 sps:$4 sm:$0xff]   ;;  %v5188_v52 = vld [vmem:[#allocation7 + $0x920] ss:$16 sps:$4 sm:$0xff]  }
 0x447   :  { %3541 = vmatpush1.bf16.msra.mxu1 %v5107_v3  ;;  %3501 = vmatprep.subr.bf16.mxu0 %v5112_v4  ;;  %v5191_v3 = vld [vmem:[#allocation7 + $0xb20] ss:$16 sps:$4 sm:$0xff]   ;;  %v5199_v4 = vld [vmem:[#allocation7 + $0xb04] ss:$16 sps:$4 sm:$0xff]  }
 0x448   :  { %3542 = vmatprep.subr.bf16.mxu1 %v5115_v6  ;;  %v5197_v6 = vld [vmem:[#allocation7 + $0xb00] ss:$16 sps:$4 sm:$0xff]  }
 0x44a   :  { %3502 = vmatpush1.bf16.msra.mxu0 %v5110_v47  ;;  %v5196_v47 = vld [vmem:[#allocation7 + $0x904] ss:$16 sps:$4 sm:$0xff]  }
 0x44b   :  { %3543 = vmatpush1.bf16.msra.mxu1 %v5113_v5  ;;  %3503 = vmatprep.subr.bf16.mxu0 %v5118_v7  ;;  %v5194_v5 = vld [vmem:[#allocation7 + $0x900] ss:$16 sps:$4 sm:$0xff]   ;;  %v5202_v7 = vld [vmem:[#allocation7 + $0x8ec] ss:$16 sps:$4 sm:$0xff]  }
 0x44c   :  { %3544 = vmatprep.subr.bf16.mxu1 %v5121_v8  ;;  %v5205_v8 = vld [vmem:[#allocation7 + $0xaec] ss:$16 sps:$4 sm:$0xff]  }
 0x44e   :  { %3504 = vmatpush1.bf16.msra.mxu0 %v5116_v9 }
 0x44f   :  { %3545 = vmatpush1.bf16.msra.mxu1 %v5119_v10  ;;  %3505 = vmatprep.subr.bf16.mxu0 %v5124_v11 }
 0x450   :  { %3546 = vmatprep.subr.bf16.mxu1 %v5127_v12 }
 0x452   :  { %3506 = vmatpush1.bf16.msra.mxu0 %v5122_v13 }
 0x453   :  { %3547 = vmatpush1.bf16.msra.mxu1 %v5125_v14  ;;  %3507 = vmatprep.subr.bf16.mxu0 %v5130_v15 }
 0x454   :  { %3548 = vmatprep.subr.bf16.mxu1 %v5133_v16 }
 0x456   :  { %3508 = vmatpush1.bf16.msra.mxu0 %v5128_v17  ;;  %v2585_v17 = vld [vmem:[#allocation11 + $0x2] ss:$4 sm:$0xf] }
 0x457   :  { %3549 = vmatpush1.bf16.msra.mxu1 %v5131_v22  ;;  %3509 = vmatprep.subr.bf16.mxu0 %v5136_v23  ;;  %v2587_v22 = vld [vmem:[#allocation13 + $0x2] ss:$4 sm:$0xf]  ;;  %v2617_v23 = vrot.slane %v2585_v17, %v5685_v39 }
 0x4c5   :  { %v2454_v24 = vpop.f32.mrf.mxu0 }
 0x4c6   :  { %v2495_v25 = vpop.f32.mrf.mxu1  ;;  %v2455_v38 = vadd.f32 %v2454_v24, %v1763_v34  ;;  %v5139_v24 = vld [vmem:[#allocation7 + $0xa44] ss:$16 sps:$4 sm:$0xff]   ;;  %v5149_v34 = vld [vmem:[#allocation7 + $0xa00] ss:$16 sps:$4 sm:$0xff]  }
 0x4c7   :  { %v2456_v26 = vpop.f32.mrf.mxu0  ;;  %3550 = vmatprep.subr.bf16.mxu1 %v5139_v24  ;;  %v2625_v24 = vrot.slane %v2585_v17, %v5690_v43 }
 0x4c8   :  { %v2497_v27 = vpop.f32.mrf.mxu1  ;;  %v2457_v35 = vadd.f32 %v2456_v26, %v1767_v33  ;;  %v5782_v19 = vadd.f32 %v2495_v25, %v2455_v38  ;;  %v5134_v25 = vld [vmem:[#allocation7 + $0x840] ss:$16 sps:$4 sm:$0xff]   ;;  %v5157_v38 = vld [vmem:[#allocation7 + $0xbe4] ss:$16 sps:$4 sm:$0xff]  }
 0x4c9   :  { %v2458_v28 = vpop.f32.mrf.mxu0  ;;  %v5137_v26 = vld [vmem:[#allocation7 + $0xa40] ss:$16 sps:$4 sm:$0xff]   ;;  %3510 = vmatpush1.bf16.msra.mxu0 %v5134_v25  ;;  %v2613_v25 = vrot.slane %v2585_v17, %v5681_v36 }
 0x4ca   :  { %v2499_v29 = vpop.f32.mrf.mxu1  ;;  %v5779_v20 = vadd.f32 %v2497_v27, %v2457_v35  ;;  %v2594_v51 = vmul.f32 %v5782_v19, %v5782_v19  ;;  %v5142_v27 = vld [vmem:[#allocation7 + $0x824] ss:$16 sps:$4 sm:$0xff]   ;;  %3551 = vmatpush1.bf16.msra.mxu1 %v5137_v26  ;;  %v5146_v33 = vld [vmem:[#allocation7 + $0x800] ss:$16 sps:$4 sm:$0xff]   ;;  %v2621_v26 = vrot.slane %v2585_v17, %v5683_v37 }
 0x4cb   :  { %v2459_v30 = vpop.f32.mrf.mxu0  ;;  %v5145_v28 = vld [vmem:[#allocation7 + $0xa24] ss:$16 sps:$4 sm:$0xff]   ;;  %v5140_v29 = vld [vmem:[#allocation7 + $0x820] ss:$16 sps:$4 sm:$0xff]   ;;  %3511 = vmatprep.subr.bf16.mxu0 %v5142_v27 }
 0x4cc   :  { %v2500_v31 = vpop.f32.mrf.mxu1  ;;  %v2595_v44 = vmul.f32 %v5779_v20, %v5779_v20  ;;  %v2588_v53 = vadd.f32 %v5779_v20, %v5782_v19  ;;  %v5143_v30 = vld [vmem:[#allocation7 + $0xa20] ss:$16 sps:$4 sm:$0xff]   ;;  %3552 = vmatprep.subr.bf16.mxu1 %v5145_v28  ;;  %v5154_v35 = vld [vmem:[#allocation7 + $0x9e4] ss:$16 sps:$4 sm:$0xff]   ;;  %v2646_v28 = vrot.slane %v2587_v22, %v5685_v39 }
 0x4cd   :  { %v5148_v31 = vld [vmem:[#allocation7 + $0x804] ss:$16 sps:$4 sm:$0xff]   ;;  %3512 = vmatpush1.bf16.msra.mxu0 %v5140_v29  ;;  %v2654_v29 = vrot.slane %v2587_v22, %v5690_v43 }
 0x4ce   :  { %v2598_v0 = vadd.f32 %v2595_v44, %v2594_v51  ;;  %3553 = vmatpush1.bf16.msra.mxu1 %v5143_v30  ;;  %3513 = vmatprep.subr.bf16.mxu0 %v5148_v31  ;;  %v5163_v44 = vld [vmem:[#allocation7 + $0xbc4] ss:$16 sps:$4 sm:$0xff]  }
 0x4cf   :  { %3554 = vmatprep.subr.bf16.mxu1 %v5151_v32  ;;  %v5169_v51 = vld [vmem:[#allocation7 + $0xba4] ss:$16 sps:$4 sm:$0xff]  }
 0x4d1   :  { %3514 = vmatpush1.bf16.msra.mxu0 %v5146_v33 }
 0x4d2   :  { %3555 = vmatpush1.bf16.msra.mxu1 %v5149_v34  ;;  %3515 = vmatprep.subr.bf16.mxu0 %v5154_v35  ;;  %v2642_v34 = vrot.slane %v2587_v22, %v5681_v36  ;;  %v2650_v35 = vrot.slane %v2587_v22, %v5683_v37  ;;  %v5208_v22 = vld [vmem:[#allocation7 + $0x8cc] ss:$16 sps:$4 sm:$0xff]  }
 0x4d3   :  { %3556 = vmatprep.subr.bf16.mxu1 %v5157_v38 }
 0x505   :  { %v2536_v42 = vpop.f32.mrf.mxu0 }
 0x506   :  { %v2537_v45 = vadd.f32 %v2536_v42, %v1771_v18  ;;  %v2577_v48 = vpop.f32.mrf.mxu1  ;;  %v5152_v18 = vld [vmem:[#allocation7 + $0x9e0] ss:$16 sps:$4 sm:$0xff]   ;;  %v5160_v42 = vld [vmem:[#allocation7 + $0x9c4] ss:$16 sps:$4 sm:$0xff]  }
 0x507   :  { %v2538_v49 = vpop.f32.mrf.mxu0  ;;  %3516 = vmatpush2.bf16.msra.mxu0 %v5152_v18 }
 0x508   :  { %v5791_v54 = vadd.f32 %v2577_v48, %v2537_v45  ;;  %v2539_v55 = vadd.f32 %v2538_v49, %v1775_v41  ;;  %v2579_v56 = vpop.f32.mrf.mxu1  ;;  %v5155_v41 = vld [vmem:[#allocation7 + $0xbe0] ss:$16 sps:$4 sm:$0xff]   ;;  %3517 = vmatprep.subr.bf16.mxu0 %v5160_v42  ;;  %v5166_v49 = vld [vmem:[#allocation7 + $0x9a4] ss:$16 sps:$4 sm:$0xff]  }
 0x509   :  { %v2540_v57 = vpop.f32.mrf.mxu0  ;;  %3557 = vmatpush2.bf16.msra.mxu1 %v5155_v41  ;;  %v5158_v45 = vld [vmem:[#allocation7 + $0x9c0] ss:$16 sps:$4 sm:$0xff]  }
 0x50a   :  { %v2596_v59 = vmul.f32 %v5791_v54, %v5791_v54  ;;  %v5795_v61 = vadd.f32 %v2579_v56, %v2539_v55  ;;  %v2581_v62 = vpop.f32.mrf.mxu1  ;;  %v2589_v63 = vadd.f32 %v2588_v53, %v5791_v54  ;;  %v5161_v48 = vld [vmem:[#allocation7 + $0xbc0] ss:$16 sps:$4 sm:$0xff]   ;;  %3558 = vmatprep.subr.bf16.mxu1 %v5163_v44  ;;  %v5172_v56 = vld [vmem:[#allocation7 + $0x984] ss:$16 sps:$4 sm:$0xff]  }
 0x50b   :  { %v2541_v1 = vpop.f32.mrf.mxu0  ;;  %3518 = vmatpush2.bf16.msra.mxu0 %v5158_v45  ;;  %v5164_v53 = vld [vmem:[#allocation7 + $0x9a0] ss:$16 sps:$4 sm:$0xff]   ;;  %v5175_v57 = vld [vmem:[#allocation7 + $0xb84] ss:$16 sps:$4 sm:$0xff]  }
 0x50c   :  { %v2582_v50 = vpop.f32.mrf.mxu1  ;;  %v2590_v2 = vadd.f32 %v2589_v63, %v5795_v61  ;;  %v2597_v40 = vmul.f32 %v5795_v61, %v5795_v61  ;;  %v2599_v46 = vadd.f32 %v2598_v0, %v2596_v59  ;;  %v5167_v55 = vld [vmem:[#allocation7 + $0xba0] ss:$16 sps:$4 sm:$0xff]   ;;  %3519 = vmatprep.subr.bf16.mxu0 %v5166_v49  ;;  %v5178_v63 = vld [vmem:[#allocation7 + $0x964] ss:$16 sps:$4 sm:$0xff]  }
 0x50d   :  { %3559 = vmatpush2.bf16.msra.mxu1 %v5161_v48  ;;  %v5170_v59 = vld [vmem:[#allocation7 + $0x980] ss:$16 sps:$4 sm:$0xff]   ;;  %v5181_v0 = vld [vmem:[#allocation7 + $0xb64] ss:$16 sps:$4 sm:$0xff]  }
 0x50e   :  { %2591 = vadd.xlane.f32.xlu0 %v2590_v2  ;;  %v2600_v21 = vadd.f32 %v2599_v46, %v2597_v40  ;;  %3560 = vmatprep.subr.bf16.mxu1 %v5169_v51  ;;  %v5173_v62 = vld [vmem:[#allocation7 + $0xb80] ss:$16 sps:$4 sm:$0xff]   ;;  %v5184_v2 = vld [vmem:[#allocation7 + $0x944] ss:$16 sps:$4 sm:$0xff]  }
 0x50f   :  { %3520 = vmatpush2.bf16.msra.mxu0 %v5164_v53  ;;  %v5176_v1 = vld [vmem:[#allocation7 + $0x960] ss:$16 sps:$4 sm:$0xff]   ;;  %v5187_v40 = vld [vmem:[#allocation7 + $0xb44] ss:$16 sps:$4 sm:$0xff]  }
 0x510   :  { %2601 = vadd.xlane.f32.xlu1 %v2600_v21  ;;  %3521 = vmatprep.subr.bf16.mxu0 %v5172_v56  ;;  %v5179_v50 = vld [vmem:[#allocation7 + $0xb60] ss:$16 sps:$4 sm:$0xff]  }
 0x511   :  { %3561 = vmatpush2.bf16.msra.mxu1 %v5167_v55  ;;  %v5182_v46 = vld [vmem:[#allocation7 + $0x940] ss:$16 sps:$4 sm:$0xff]  }
 0x512   :  { %3562 = vmatprep.subr.bf16.mxu1 %v5175_v57  ;;  %v5185_v21 = vld [vmem:[#allocation7 + $0xb40] ss:$16 sps:$4 sm:$0xff]  }
 0x513   :  { %3522 = vmatpush2.bf16.msra.mxu0 %v5170_v59 }
 0x514   :  { %3523 = vmatprep.subr.bf16.mxu0 %v5178_v63 }
 0x515   :  { %3563 = vmatpush2.bf16.msra.mxu1 %v5173_v62 }
 0x516   :  { %3564 = vmatprep.subr.bf16.mxu1 %v5181_v0 }
 0x517   :  { %3524 = vmatpush2.bf16.msra.mxu0 %v5176_v1 }
 0x518   :  { %3525 = vmatprep.subr.bf16.mxu0 %v5184_v2 }
 0x519   :  { %3565 = vmatpush2.bf16.msra.mxu1 %v5179_v50 }
 0x51a   :  { %3566 = vmatprep.subr.bf16.mxu1 %v5187_v40 }
 0x51b   :  { %3526 = vmatpush2.bf16.msra.mxu0 %v5182_v46 }
 0x51c   :  { %3527 = vmatprep.subr.bf16.mxu0 %v5190_v58 }
 0x51d   :  { %3567 = vmatpush2.bf16.msra.mxu1 %v5185_v21 }
 0x51e   :  { %3568 = vmatprep.subr.bf16.mxu1 %v5193_v60 }
 0x51f   :  { %3528 = vmatpush2.bf16.msra.mxu0 %v5188_v52 }
 0x520   :  { %3529 = vmatprep.subr.bf16.mxu0 %v5196_v47 }
 0x521   :  { %3569 = vmatpush2.bf16.msra.mxu1 %v5191_v3 }
 0x522   :  { %3570 = vmatprep.subr.bf16.mxu1 %v5199_v4 }
 0x523   :  { %3530 = vmatpush2.bf16.msra.mxu0 %v5194_v5 }
 0x524   :  { %3581 = vmatprep.subr.bf16.mxu0 %v5202_v7 }
 0x525   :  { %3571 = vmatpush2.bf16.msra.mxu1 %v5197_v6 }
 0x526   :  { %3622 = vmatprep.subr.bf16.mxu1 %v5205_v8 }
 0x597   :  { %v2592_v9 = vpop.xlane.xlu0 %2591 }
 0x598   :  { %v2593_v10 = vmul.f32 0.001953125, %v2592_v9 }
 0x599   :  { %v2602_v11 = vpop.xlane.xlu1 %2601 }
 0x59a   :  { %v2603_v12 = vmul.f32 0.001953125, %v2602_v11  ;;  %v2604_v13 = vmul.f32 %v2593_v10, %v2593_v10 }
 0x59c   :  { %v2605_v14 = vsub.f32 %v2603_v12, %v2604_v13  ;;  %v5200_v13 = vld [vmem:[#allocation7 + $0x8e8] ss:$16 sps:$4 sm:$0xff]  }
 0x59e   :  { %v2606_v15 = vmax.f32 %v2605_v14, 0.0 }
 0x5a0   :  { %v2607_v16 = vadd.f32 1e-05, %v2606_v15  ;;  %v5203_v15 = vld [vmem:[#allocation7 + $0xae8] ss:$16 sps:$4 sm:$0xff]  }
 0x5a2   :  { %5364 = vrsqrt.f32 %v2607_v16 }
 0x5af   :  { %v5365_v27 = vpop.eup %5364 }
 0x5b0   :  { %v2631_v30 = vmul.f32 %v5365_v27, %v2617_v23  ;;  %v2633_v31 = vmul.f32 %v5365_v27, %v2625_v24  ;;  %v2630_v32 = vmul.f32 %v5365_v27, %v2613_v25  ;;  %v2632_v33 = vmul.f32 %v5365_v27, %v2621_v26  ;;  %v5211_v23 = vld [vmem:[#allocation7 + $0xacc] ss:$16 sps:$4 sm:$0xff]   ;;  %v5206_v24 = vld [vmem:[#allocation7 + $0x8c8] ss:$16 sps:$4 sm:$0xff]  }
 0x5b1   :  { %v5209_v25 = vld [vmem:[#allocation7 + $0xac8] ss:$16 sps:$4 sm:$0xff]   ;;  %v5214_v26 = vld [vmem:[#allocation7 + $0x8ac] ss:$16 sps:$4 sm:$0xff]  }
 0x5b2   :  { %v2635_v38 = vmul.f32 %v2631_v30, %v2593_v10  ;;  %v2637_v18 = vmul.f32 %v2633_v31, %v2593_v10  ;;  %v2634_v41 = vmul.f32 %v2630_v32, %v2593_v10  ;;  %v2636_v42 = vmul.f32 %v2632_v33, %v2593_v10  ;;  %v5217_v27 = vld [vmem:[#allocation7 + $0xaac] ss:$16 sps:$4 sm:$0xff]  }
 0x5b3   :  { %v2664_v45 = vmul.f32 %v2631_v30, %v5779_v20  ;;  %v2666_v49 = vmul.f32 %v2633_v31, %v5795_v61  ;;  %v2663_v53 = vmul.f32 %v2630_v32, %v5782_v19  ;;  %v2665_v56 = vmul.f32 %v2632_v33, %v5791_v54  ;;  %v5220_v30 = vld [vmem:[#allocation7 + $0x88c] ss:$16 sps:$4 sm:$0xff]   ;;  %v5218_v32 = vld [vmem:[#allocation7 + $0x888] ss:$16 sps:$4 sm:$0xff]  }
 0x5b4   :  { %v2660_v44 = vsub.f32 %v2646_v28, %v2635_v38  ;;  %v2662_v48 = vsub.f32 %v2654_v29, %v2637_v18  ;;  %v2659_v51 = vsub.f32 %v2642_v34, %v2634_v41  ;;  %v2661_v55 = vsub.f32 %v2650_v35, %v2636_v42  ;;  %v5212_v28 = vld [vmem:[#allocation7 + $0x8a8] ss:$16 sps:$4 sm:$0xff]   ;;  %v5223_v31 = vld [vmem:[#allocation7 + $0xa8c] ss:$16 sps:$4 sm:$0xff]  }
 0x5b5   :  { %v5215_v29 = vld [vmem:[#allocation7 + $0xaa8] ss:$16 sps:$4 sm:$0xff]   ;;  %v5226_v34 = vld [vmem:[#allocation7 + $0x86c] ss:$16 sps:$4 sm:$0xff]  }
 0x5b6   :  { %v2668_v57 = vadd.f32 %v2664_v45, %v2660_v44  ;;  %v2670_v59 = vadd.f32 %v2666_v49, %v2662_v48  ;;  %v2667_v62 = vadd.f32 %v2663_v53, %v2659_v51  ;;  %v2669_v63 = vadd.f32 %v2665_v56, %v2661_v55  ;;  %v5221_v33 = vld [vmem:[#allocation7 + $0xa88] ss:$16 sps:$4 sm:$0xff]   ;;  %v5229_v35 = vld [vmem:[#allocation7 + $0xa6c] ss:$16 sps:$4 sm:$0xff]  }
 0x5b7   :  { %v5224_v38 = vld [vmem:[#allocation7 + $0x868] ss:$16 sps:$4 sm:$0xff]   ;;  %v5232_v41 = vld [vmem:[#allocation7 + $0x84c] ss:$16 sps:$4 sm:$0xff]  }
 0x5b8   :  { %v2672_v0 = vpack.c.bf16 %v2668_v57, %v2668_v57  ;;  %v2674_v1 = vpack.c.bf16 %v2670_v59, %v2670_v59  ;;  %v2671_v50 = vpack.c.bf16 %v2667_v62, %v2667_v62  ;;  %v2673_v2 = vpack.c.bf16 %v2669_v63, %v2669_v63  ;;  %v5227_v18 = vld [vmem:[#allocation7 + $0xa68] ss:$16 sps:$4 sm:$0xff]   ;;  %v5235_v42 = vld [vmem:[#allocation7 + $0xa4c] ss:$16 sps:$4 sm:$0xff]  }
 0x5b9   :  { %v5230_v44 = vld [vmem:[#allocation7 + $0x848] ss:$16 sps:$4 sm:$0xff]   ;;  %v5238_v48 = vld [vmem:[#allocation7 + $0x82c] ss:$16 sps:$4 sm:$0xff]  }
 0x5ba   :  { %v4446_v40 = vmul.bf16 3216621497, %v2672_v0  ;;  %v4448_v46 = vmul.bf16 3216621497, %v2674_v1  ;;  %v4445_v20 = vmul.bf16 3216621497, %v2671_v50 }
 0x5bb   :  { %v4447_v21 = vmul.bf16 3216621497, %v2673_v2  ;;  %v5233_v45 = vld [vmem:[#allocation7 + $0xa48] ss:$16 sps:$4 sm:$0xff]   ;;  %v5241_v49 = vld [vmem:[#allocation7 + $0xa2c] ss:$16 sps:$4 sm:$0xff]  }
 0x5bc   :  { %5366 = vpow.bf16 %v4446_v40  ;;  %v5236_v51 = vld [vmem:[#allocation7 + $0x828] ss:$16 sps:$4 sm:$0xff]   ;;  %v5244_v55 = vld [vmem:[#allocation7 + $0x80c] ss:$16 sps:$4 sm:$0xff]  }
 0x5bd   :  { %5368 = vpow.bf16 %v4448_v46  ;;  %v5239_v53 = vld [vmem:[#allocation7 + $0xa28] ss:$16 sps:$4 sm:$0xff]   ;;  %v5247_v56 = vld [vmem:[#allocation7 + $0xa0c] ss:$16 sps:$4 sm:$0xff]  }
 0x5be   :  { %5370 = vpow.bf16 %v4445_v20  ;;  %v5242_v57 = vld [vmem:[#allocation7 + $0x808] ss:$16 sps:$4 sm:$0xff]   ;;  %v5250_v62 = vld [vmem:[#allocation7 + $0x9ec] ss:$16 sps:$4 sm:$0xff]  }
 0x5bf   :  { %5372 = vpow.bf16 %v4447_v21  ;;  %v5245_v59 = vld [vmem:[#allocation7 + $0xa08] ss:$16 sps:$4 sm:$0xff]   ;;  %v5253_v63 = vld [vmem:[#allocation7 + $0xbec] ss:$16 sps:$4 sm:$0xff]  }
 0x5c0   :  { %v5254_v40 = vld [vmem:[#allocation7 + $0x9c8] ss:$16 sps:$4 sm:$0xff]   ;;  %v5262_v20 = vld [vmem:[#allocation7 + $0x9ac] ss:$16 sps:$4 sm:$0xff]  }
 0x5c1   :  { %v5257_v46 = vld [vmem:[#allocation7 + $0xbc8] ss:$16 sps:$4 sm:$0xff]   ;;  %v5265_v21 = vld [vmem:[#allocation7 + $0xbac] ss:$16 sps:$4 sm:$0xff]  }
 0x5ca   :  { %v5367_v19 = vpop.eup %5366 }
 0x5cb   :  { %v5369_v61 = vpop.eup %5368  ;;  %v2692_v58 = vadd.bf16 1065369472, %v5367_v19  ;;  %v5260_v19 = vld [vmem:[#allocation7 + $0x9a8] ss:$16 sps:$4 sm:$0xff]  }
 0x5cc   :  { %v5371_v54 = vpop.eup %5370  ;;  %v2694_v60 = vadd.bf16 1065369472, %v5369_v61  ;;  %v5263_v61 = vld [vmem:[#allocation7 + $0xba8] ss:$16 sps:$4 sm:$0xff]  }
 0x5cd   :  { %v5373_v52 = vpop.eup %5372  ;;  %5374 = vrcp.bf16 %v2692_v58  ;;  %v2691_v3 = vadd.bf16 1065369472, %v5371_v54  ;;  %v5268_v58 = vld [vmem:[#allocation7 + $0x98c] ss:$16 sps:$4 sm:$0xff]  }
 0x5ce   :  { %5376 = vrcp.bf16 %v2694_v60  ;;  %v2693_v47 = vadd.bf16 1065369472, %v5373_v52  ;;  %v5271_v54 = vld [vmem:[#allocation7 + $0xb8c] ss:$16 sps:$4 sm:$0xff]   ;;  %v5266_v60 = vld [vmem:[#allocation7 + $0x988] ss:$16 sps:$4 sm:$0xff]  }
 0x5cf   :  { %5378 = vrcp.bf16 %v2691_v3  ;;  %v5269_v52 = vld [vmem:[#allocation7 + $0xb88] ss:$16 sps:$4 sm:$0xff]   ;;  %v5274_v3 = vld [vmem:[#allocation7 + $0x96c] ss:$16 sps:$4 sm:$0xff]  }
 0x5d0   :  { %5380 = vrcp.bf16 %v2693_v47  ;;  %v5277_v47 = vld [vmem:[#allocation7 + $0xb6c] ss:$16 sps:$4 sm:$0xff]  }
 0x5db   :  { %v5375_v4 = vpop.eup %5374 }
 0x5dc   :  { %v5377_v5 = vpop.eup %5376  ;;  %v2698_v6 = vmul.bf16 1065369472, %v5375_v4  ;;  %v5272_v4 = vld [vmem:[#allocation7 + $0x968] ss:$16 sps:$4 sm:$0xff]  }
 0x5dd   :  { %v5379_v7 = vpop.eup %5378  ;;  %v2702_v8 = vmul.bf16 1065369472, %v5377_v5  ;;  %v5275_v5 = vld [vmem:[#allocation7 + $0xb68] ss:$16 sps:$4 sm:$0xff]  }
 0x5de   :  { %v5381_v9 = vpop.eup %5380  ;;  %v2704_v10 = vmul.bf16 %v2698_v6, %v2672_v0  ;;  %v2696_v11 = vmul.bf16 1065369472, %v5379_v7  ;;  %v5248_v0 = vld [vmem:[#allocation7 + $0x9e8] ss:$16 sps:$4 sm:$0xff]   ;;  %v5280_v6 = vld [vmem:[#allocation7 + $0x94c] ss:$16 sps:$4 sm:$0xff]  }
 0x5df   :  { %v2706_v12 = vmul.bf16 %v2702_v8, %v2674_v1  ;;  %v2700_v14 = vmul.bf16 1065369472, %v5381_v9  ;;  %v5251_v1 = vld [vmem:[#allocation7 + $0xbe8] ss:$16 sps:$4 sm:$0xff]   ;;  %v5283_v7 = vld [vmem:[#allocation7 + $0xb4c] ss:$16 sps:$4 sm:$0xff]  }
 0x5e0   :  { %3531 = vmatprep.mubr.bf16.mxu0 %v2704_v10  ;;  %v5813_v16 = vmul.bf16 %v2696_v11, %v2671_v50  ;;  %v5256_v50 = vld [vmem:[#allocation7 + $0x9cc] ss:$16 sps:$4 sm:$0xff]   ;;  %v5278_v8 = vld [vmem:[#allocation7 + $0x948] ss:$16 sps:$4 sm:$0xff]  }
 0x5e1   :  { %3572 = vmatprep.mubr.bf16.mxu1 %v2706_v12  ;;  %v5815_v17 = vmul.bf16 %v2700_v14, %v2673_v2  ;;  %v5259_v2 = vld [vmem:[#allocation7 + $0xbcc] ss:$16 sps:$4 sm:$0xff]   ;;  %v5281_v9 = vld [vmem:[#allocation7 + $0xb48] ss:$16 sps:$4 sm:$0xff]  }
 0x5e2   :  { %3532 = vmatmul.mubr.bf16.vlgmr.msra.gmra.mxu0 %v5813_v16  ;;  %v5289_v11 = vld [vmem:[#allocation7 + $0xb2c] ss:$16 sps:$4 sm:$0xff]  }
 0x5e3   :  { %3573 = vmatmul.mubr.bf16.vlgmr.msra.gmra.mxu1 %v5815_v17  ;;  %3582 = vmatpush1.bf16.msra.mxu0 %v5200_v13  ;;  %v5287_v13 = vld [vmem:[#allocation7 + $0xb28] ss:$16 sps:$4 sm:$0xff]   ;;  %v5292_v14 = vld [vmem:[#allocation7 + $0x90c] ss:$16 sps:$4 sm:$0xff]  }
 0x5e4   :  { %3623 = vmatpush1.bf16.msra.mxu1 %v5203_v15  ;;  %3613 = vmatprep.mubr.bf16.mxu0 %v2704_v10  ;;  %v5286_v10 = vld [vmem:[#allocation7 + $0x92c] ss:$16 sps:$4 sm:$0xff]  }
 0x5e5   :  { %3654 = vmatprep.mubr.bf16.mxu1 %v2706_v12  ;;  %3583 = vmatprep.subr.bf16.mxu0 %v5208_v22  ;;  %v5284_v12 = vld [vmem:[#allocation7 + $0x928] ss:$16 sps:$4 sm:$0xff]   ;;  %v5295_v15 = vld [vmem:[#allocation7 + $0xb0c] ss:$16 sps:$4 sm:$0xff]  }
 0x5e6   :  { %3624 = vmatprep.subr.bf16.mxu1 %v5211_v23  ;;  %v5290_v22 = vld [vmem:[#allocation7 + $0x908] ss:$16 sps:$4 sm:$0xff]  }
 0x5e7   :  { %3584 = vmatpush1.bf16.msra.mxu0 %v5206_v24  ;;  %v5293_v23 = vld [vmem:[#allocation7 + $0xb08] ss:$16 sps:$4 sm:$0xff]  }
 0x5e8   :  { %3625 = vmatpush1.bf16.msra.mxu1 %v5209_v25  ;;  %3585 = vmatprep.subr.bf16.mxu0 %v5214_v26 }
 0x5e9   :  { %3626 = vmatprep.subr.bf16.mxu1 %v5217_v27 }
 0x5eb   :  { %3586 = vmatpush1.bf16.msra.mxu0 %v5212_v28 }
 0x5ec   :  { %3627 = vmatpush1.bf16.msra.mxu1 %v5215_v29  ;;  %3587 = vmatprep.subr.bf16.mxu0 %v5220_v30 }
 0x5ed   :  { %3628 = vmatprep.subr.bf16.mxu1 %v5223_v31 }
 0x5ef   :  { %3588 = vmatpush1.bf16.msra.mxu0 %v5218_v32  ;;  %v2837_v32 = vld [vmem:[#allocation10 + $0x3] ss:$4 sm:$0xf] }
 0x5f0   :  { %3629 = vmatpush1.bf16.msra.mxu1 %v5221_v33  ;;  %3589 = vmatprep.subr.bf16.mxu0 %v5226_v34  ;;  %v2846_v33 = vrot.slane %v2837_v32, %v5685_v39  ;;  %v2842_v34 = vrot.slane %v2837_v32, %v5681_v36 }
 0x5f1   :  { %3630 = vmatprep.subr.bf16.mxu1 %v5229_v35 }
 0x5f3   :  { %3590 = vmatpush1.bf16.msra.mxu0 %v5224_v38 }
 0x5f4   :  { %3631 = vmatpush1.bf16.msra.mxu1 %v5227_v18  ;;  %3591 = vmatprep.subr.bf16.mxu0 %v5232_v41  ;;  %v2854_v41 = vrot.slane %v2837_v32, %v5690_v43 }
 0x5f5   :  { %3632 = vmatprep.subr.bf16.mxu1 %v5235_v42 }
 0x5f7   :  { %3592 = vmatpush1.bf16.msra.mxu0 %v5230_v44 }
 0x5f8   :  { %3633 = vmatpush1.bf16.msra.mxu1 %v5233_v45  ;;  %3593 = vmatprep.subr.bf16.mxu0 %v5238_v48 }
 0x5f9   :  { %3634 = vmatprep.subr.bf16.mxu1 %v5241_v49 }
 0x5fb   :  { %3594 = vmatpush1.bf16.msra.mxu0 %v5236_v51 }
 0x5fc   :  { %3635 = vmatpush1.bf16.msra.mxu1 %v5239_v53  ;;  %3595 = vmatprep.subr.bf16.mxu0 %v5244_v55 }
 0x5fd   :  { %3636 = vmatprep.subr.bf16.mxu1 %v5247_v56 }
 0x5ff   :  { %3596 = vmatpush1.bf16.msra.mxu0 %v5242_v57 }
 0x600   :  { %3637 = vmatpush1.bf16.msra.mxu1 %v5245_v59  ;;  %3597 = vmatprep.subr.bf16.mxu0 %v5250_v62 }
 0x601   :  { %3638 = vmatprep.subr.bf16.mxu1 %v5253_v63 }
 0x603   :  { %3598 = vmatpush2.bf16.msra.mxu0 %v5248_v0 }
 0x604   :  { %3639 = vmatpush2.bf16.msra.mxu1 %v5251_v1  ;;  %3599 = vmatprep.subr.bf16.mxu0 %v5256_v50 }
 0x605   :  { %3640 = vmatprep.subr.bf16.mxu1 %v5259_v2 }
 0x607   :  { %3600 = vmatpush2.bf16.msra.mxu0 %v5254_v40 }
 0x608   :  { %3641 = vmatpush2.bf16.msra.mxu1 %v5257_v46  ;;  %3601 = vmatprep.subr.bf16.mxu0 %v5262_v20 }
 0x609   :  { %3642 = vmatprep.subr.bf16.mxu1 %v5265_v21 }
 0x60b   :  { %3602 = vmatpush2.bf16.msra.mxu0 %v5260_v19 }
 0x60c   :  { %3643 = vmatpush2.bf16.msra.mxu1 %v5263_v61  ;;  %3603 = vmatprep.subr.bf16.mxu0 %v5268_v58  ;;  %v5296_v61 = vld [vmem:[#allocation8 + $0x78] sm:$0xff]  }
 0x60d   :  { %3644 = vmatprep.subr.bf16.mxu1 %v5271_v54  ;;  %v5297_v58 = vld [vmem:[#allocation8 + $0xf8] sm:$0xff]  }
 0x60e   :  { %v5298_v54 = vld [vmem:[#allocation8 + $0x38] sm:$0xff]  }
 0x60f   :  { %3604 = vmatpush2.bf16.msra.mxu0 %v5266_v60  ;;  %v5299_v60 = vld [vmem:[#allocation8 + $0xb8] sm:$0xff]  }
 0x610   :  { %3645 = vmatpush2.bf16.msra.mxu1 %v5269_v52  ;;  %3605 = vmatprep.subr.bf16.mxu0 %v5274_v3  ;;  %v5300_v52 = vld [vmem:[#allocation8 + $0x70] sm:$0xff]  }
 0x611   :  { %3646 = vmatprep.subr.bf16.mxu1 %v5277_v47  ;;  %v5301_v3 = vld [vmem:[#allocation8 + $0xf0] sm:$0xff]  }
 0x612   :  { %v5302_v47 = vld [vmem:[#allocation8 + $0x30] sm:$0xff]  }
 0x613   :  { %3606 = vmatpush2.bf16.msra.mxu0 %v5272_v4  ;;  %v5303_v4 = vld [vmem:[#allocation8 + $0xb0] sm:$0xff]  }
 0x614   :  { %3647 = vmatpush2.bf16.msra.mxu1 %v5275_v5  ;;  %3607 = vmatprep.subr.bf16.mxu0 %v5280_v6  ;;  %v5304_v5 = vld [vmem:[#allocation8 + $0x68] sm:$0xff]  }
 0x615   :  { %3648 = vmatprep.subr.bf16.mxu1 %v5283_v7  ;;  %v5305_v6 = vld [vmem:[#allocation8 + $0xe8] sm:$0xff]  }
 0x616   :  { %v5306_v7 = vld [vmem:[#allocation8 + $0x28] sm:$0xff]  }
 0x617   :  { %3608 = vmatpush2.bf16.msra.mxu0 %v5278_v8  ;;  %v5307_v8 = vld [vmem:[#allocation8 + $0xa8] sm:$0xff]  }
 0x618   :  { %3649 = vmatpush2.bf16.msra.mxu1 %v5281_v9  ;;  %3609 = vmatprep.subr.bf16.mxu0 %v5286_v10  ;;  %v5308_v9 = vld [vmem:[#allocation8 + $0x60] sm:$0xff]  }
 0x619   :  { %3650 = vmatprep.subr.bf16.mxu1 %v5289_v11  ;;  %v5309_v10 = vld [vmem:[#allocation8 + $0xe0] sm:$0xff]  }
 0x61a   :  { %v5310_v11 = vld [vmem:[#allocation8 + $0x20] sm:$0xff]  }
 0x61b   :  { %3610 = vmatpush2.bf16.msra.mxu0 %v5284_v12  ;;  %v5311_v12 = vld [vmem:[#allocation8 + $0xa0] sm:$0xff]  }
 0x61c   :  { %3651 = vmatpush2.bf16.msra.mxu1 %v5287_v13  ;;  %3611 = vmatprep.subr.bf16.mxu0 %v5292_v14  ;;  %v5312_v13 = vld [vmem:[#allocation8 + $0x58] sm:$0xff]  }
 0x61d   :  { %3652 = vmatprep.subr.bf16.mxu1 %v5295_v15  ;;  %v5313_v14 = vld [vmem:[#allocation8 + $0xd8] sm:$0xff]  }
 0x61e   :  { %v5314_v15 = vld [vmem:[#allocation8 + $0x18] sm:$0xff]  }
 0x61f   :  { %3612 = vmatpush2.bf16.msra.mxu0 %v5290_v22  ;;  %v5315_v22 = vld [vmem:[#allocation8 + $0x98] sm:$0xff]  }
 0x620   :  { %3653 = vmatpush2.bf16.msra.mxu1 %v5293_v23  ;;  %4614 = vmatprep.subr.bf16.mxu0 %v5296_v61  ;;  %v5316_v23 = vld [vmem:[#allocation8 + $0x50] sm:$0xff]  }
 0x621   :  { %4636 = vmatprep.subr.bf16.mxu1 %v5297_v58 }
 0x622   :  { %3614 = vmatmul.mubr.bf16.vlgmr.msra.gmra.mxu0 %v5813_v16  ;;  %v2850_v16 = vrot.slane %v2837_v32, %v5683_v37  ;;  %v5325_v32 = vld [vmem:[#allocation8 + $0xc0] sm:$0xff]  }
 0x623   :  { %3655 = vmatmul.mubr.bf16.vlgmr.msra.gmra.mxu1 %v5815_v17  ;;  %4615 = vmatpush3.bf16.msra.mxu0 %v5298_v54 }
 0x624   :  { %4637 = vmatpush3.bf16.msra.mxu1 %v5299_v60  ;;  %4616 = vmatprep.subr.bf16.mxu0 %v5300_v52 }
 0x625   :  { %4638 = vmatprep.subr.bf16.mxu1 %v5301_v3 }
 0x627   :  { %4617 = vmatpush3.bf16.msra.mxu0 %v5302_v47 }
 0x628   :  { %4639 = vmatpush3.bf16.msra.mxu1 %v5303_v4  ;;  %4618 = vmatprep.subr.bf16.mxu0 %v5304_v5 }
 0x629   :  { %4640 = vmatprep.subr.bf16.mxu1 %v5305_v6 }
 0x62b   :  { %4619 = vmatpush3.bf16.msra.mxu0 %v5306_v7 }
 0x62c   :  { %4641 = vmatpush3.bf16.msra.mxu1 %v5307_v8  ;;  %4620 = vmatprep.subr.bf16.mxu0 %v5308_v9 }
 0x62d   :  { %4642 = vmatprep.subr.bf16.mxu1 %v5309_v10 }
 0x62f   :  { %4621 = vmatpush3.bf16.msra.mxu0 %v5310_v11 }
 0x630   :  { %4643 = vmatpush3.bf16.msra.mxu1 %v5311_v12  ;;  %4622 = vmatprep.subr.bf16.mxu0 %v5312_v13 }
 0x631   :  { %4644 = vmatprep.subr.bf16.mxu1 %v5313_v14 }
 0x633   :  { %4623 = vmatpush3.bf16.msra.mxu0 %v5314_v15 }
 0x634   :  { %4645 = vmatpush3.bf16.msra.mxu1 %v5315_v22  ;;  %4624 = vmatprep.subr.bf16.mxu0 %v5316_v23 }
 0x6a2   :  { %v3533_v24 = vpop.f32.mrf.mxu0 }
 0x6a3   :  { %v3574_v25 = vpop.f32.mrf.mxu1  ;;  %v3534_v38 = vadd.f32 %v3533_v24, %v2842_v34  ;;  %v5317_v24 = vld [vmem:[#allocation8 + $0xd0] sm:$0xff]   ;;  %v5327_v34 = vld [vmem:[#allocation8 + $0x80] sm:$0xff]  }
 0x6a4   :  { %v3535_v26 = vpop.f32.mrf.mxu0  ;;  %4646 = vmatprep.subr.bf16.mxu1 %v5317_v24 }
 0x6a5   :  { %v3576_v27 = vpop.f32.mrf.mxu1  ;;  %v3536_v35 = vadd.f32 %v3535_v26, %v2846_v33  ;;  %v5826_v17 = vadd.f32 %v3574_v25, %v3534_v38  ;;  %v5318_v25 = vld [vmem:[#allocation8 + $0x10] sm:$0xff]   ;;  %v5326_v33 = vld [vmem:[#allocation8] sm:$0xff]  }
 0x6a6   :  { %v3537_v28 = vpop.f32.mrf.mxu0  ;;  %v5319_v26 = vld [vmem:[#allocation8 + $0x90] sm:$0xff]   ;;  %4625 = vmatpush3.bf16.msra.mxu0 %v5318_v25 }
 0x6a7   :  { %v3578_v29 = vpop.f32.mrf.mxu1  ;;  %v5823_v18 = vadd.f32 %v3576_v27, %v3536_v35  ;;  %v3673_v51 = vmul.f32 %v5826_v17, %v5826_v17  ;;  %v5320_v27 = vld [vmem:[#allocation8 + $0x48] sm:$0xff]   ;;  %4647 = vmatpush3.bf16.msra.mxu1 %v5319_v26 }
 0x6a8   :  { %v3538_v30 = vpop.f32.mrf.mxu0  ;;  %v5321_v28 = vld [vmem:[#allocation8 + $0xc8] sm:$0xff]   ;;  %4626 = vmatprep.subr.bf16.mxu0 %v5320_v27 }
 0x6a9   :  { %v3579_v31 = vpop.f32.mrf.mxu1  ;;  %v3674_v44 = vmul.f32 %v5823_v18, %v5823_v18  ;;  %v3667_v53 = vadd.f32 %v5823_v18, %v5826_v17  ;;  %v5322_v29 = vld [vmem:[#allocation8 + $0x8] sm:$0xff]   ;;  %4648 = vmatprep.subr.bf16.mxu1 %v5321_v28 }
 0x6aa   :  { %v5323_v30 = vld [vmem:[#allocation8 + $0x88] sm:$0xff]   ;;  %v5324_v31 = vld [vmem:[#allocation8 + $0x40] sm:$0xff]   ;;  %4627 = vmatpush3.bf16.msra.mxu0 %v5322_v29 }
 0x6ab   :  { %v3677_v50 = vadd.f32 %v3674_v44, %v3673_v51  ;;  %4649 = vmatpush3.bf16.msra.mxu1 %v5323_v30  ;;  %4628 = vmatprep.subr.bf16.mxu0 %v5324_v31  ;;  %v3666_v51 = vld [vmem:[#allocation13 + $0x3] ss:$4 sm:$0xf] }
 0x6ac   :  { %4650 = vmatprep.subr.bf16.mxu1 %v5325_v32 }
 0x6ae   :  { %4629 = vmatpush3.bf16.msra.mxu0 %v5326_v33 }
 0x6af   :  { %4651 = vmatpush3.bf16.msra.mxu1 %v5327_v34 }
 0x6e2   :  { %v3615_v42 = vpop.f32.mrf.mxu0 }
 0x6e3   :  { %v3616_v45 = vadd.f32 %v3615_v42, %v2850_v16  ;;  %v3656_v48 = vpop.f32.mrf.mxu1 }
 0x6e4   :  { %v3617_v49 = vpop.f32.mrf.mxu0 }
 0x6e5   :  { %v5835_v55 = vadd.f32 %v3656_v48, %v3616_v45  ;;  %v3618_v56 = vadd.f32 %v3617_v49, %v2854_v41  ;;  %v3658_v57 = vpop.f32.mrf.mxu1  ;;  %v3664_v49 = vld [vmem:[#allocation11 + $0x3] ss:$4 sm:$0xf] }
 0x6e6   :  { %v3619_v59 = vpop.f32.mrf.mxu0 }
 0x6e7   :  { %v3675_v62 = vmul.f32 %v5835_v55, %v5835_v55  ;;  %v5839_v63 = vadd.f32 %v3658_v57, %v3618_v56  ;;  %v3660_v0 = vpop.f32.mrf.mxu1  ;;  %v3668_v1 = vadd.f32 %v3667_v53, %v5835_v55  ;;  %v3696_v53 = vrot.slane %v3664_v49, %v5685_v39 }
 0x6e8   :  { %v3620_v2 = vpop.f32.mrf.mxu0  ;;  %v3704_v56 = vrot.slane %v3664_v49, %v5690_v43  ;;  %v3692_v57 = vrot.slane %v3664_v49, %v5681_v36  ;;  %v3700_v59 = vrot.slane %v3664_v49, %v5683_v37  ;;  %v3725_v0 = vrot.slane %v3666_v51, %v5685_v39 }
 0x6e9   :  { %v3661_v40 = vpop.f32.mrf.mxu1  ;;  %v3669_v46 = vadd.f32 %v3668_v1, %v5839_v63  ;;  %v3676_v20 = vmul.f32 %v5839_v63, %v5839_v63  ;;  %v3678_v21 = vadd.f32 %v3677_v50, %v3675_v62  ;;  %v3733_v1 = vrot.slane %v3666_v51, %v5690_v43 }
 0x6eb   :  { %3670 = vadd.xlane.f32.xlu0 %v3669_v46  ;;  %v3679_v19 = vadd.f32 %v3678_v21, %v3676_v20  ;;  %v3721_v20 = vrot.slane %v3666_v51, %v5681_v36  ;;  %v3729_v21 = vrot.slane %v3666_v51, %v5683_v37 }
 0x6ed   :  { %3680 = vadd.xlane.f32.xlu1 %v3679_v19 }
 0x774   :  { %v3671_v35 = vpop.xlane.xlu0 %3670 }
 0x775   :  { %v3672_v38 = vmul.f32 0.001953125, %v3671_v35 }
 0x776   :  { %v3681_v16 = vpop.xlane.xlu1 %3680 }
 0x777   :  { %v3682_v41 = vmul.f32 0.001953125, %v3681_v16  ;;  %v3683_v42 = vmul.f32 %v3672_v38, %v3672_v38 }
 0x779   :  { %v3684_v44 = vsub.f32 %v3682_v41, %v3683_v42 }
 0x77b   :  { %v3685_v45 = vmax.f32 %v3684_v44, 0.0  ;;  %v4581_v44 = vld [vmem:[#allocation14] ss:$0 sm:$0xff] }
 0x77d   :  { %v3686_v48 = vadd.f32 1e-05, %v3685_v45 }
 0x77f   :  { %5382 = vrsqrt.f32 %v3686_v48 }
 0x78c   :  { %v5383_v62 = vpop.eup %5382 }
 0x78d   :  { %v3710_v50 = vmul.f32 %v5383_v62, %v3696_v53  ;;  %v3712_v2 = vmul.f32 %v5383_v62, %v3704_v56  ;;  %v3709_v40 = vmul.f32 %v5383_v62, %v3692_v57  ;;  %v3711_v46 = vmul.f32 %v5383_v62, %v3700_v59 }
 0x78f   :  { %v3714_v19 = vmul.f32 %v3710_v50, %v3672_v38  ;;  %v3716_v61 = vmul.f32 %v3712_v2, %v3672_v38  ;;  %v3713_v58 = vmul.f32 %v3709_v40, %v3672_v38  ;;  %v3715_v54 = vmul.f32 %v3711_v46, %v3672_v38 }
 0x790   :  { %v3743_v52 = vmul.f32 %v3710_v50, %v5823_v18  ;;  %v3745_v39 = vmul.f32 %v3712_v2, %v5839_v63  ;;  %v3742_v43 = vmul.f32 %v3709_v40, %v5826_v17  ;;  %v3744_v5 = vmul.f32 %v3711_v46, %v5835_v55 }
 0x791   :  { %v3739_v60 = vsub.f32 %v3725_v0, %v3714_v19  ;;  %v3741_v3 = vsub.f32 %v3733_v1, %v3716_v61  ;;  %v3738_v47 = vsub.f32 %v3721_v20, %v3713_v58  ;;  %v3740_v4 = vsub.f32 %v3729_v21, %v3715_v54 }
 0x793   :  { %v3747_v6 = vadd.f32 %v3743_v52, %v3739_v60  ;;  %v3749_v36 = vadd.f32 %v3745_v39, %v3741_v3  ;;  %v3746_v7 = vadd.f32 %v3742_v43, %v3738_v47  ;;  %v3748_v37 = vadd.f32 %v3744_v5, %v3740_v4 }
 0x795   :  { %v3751_v8 = vpack.c.bf16 %v3747_v6, %v3747_v6  ;;  %v3753_v9 = vpack.c.bf16 %v3749_v36, %v3749_v36  ;;  %v3750_v10 = vpack.c.bf16 %v3746_v7, %v3746_v7  ;;  %v3752_v11 = vpack.c.bf16 %v3748_v37, %v3748_v37 }
 0x797   :  { %v4578_v12 = vmul.bf16 3216621497, %v3751_v8  ;;  %v4580_v13 = vmul.bf16 3216621497, %v3753_v9  ;;  %v4577_v18 = vmul.bf16 3216621497, %v3750_v10 }
 0x798   :  { %v4579_v14 = vmul.bf16 3216621497, %v3752_v11 }
 0x799   :  { %5384 = vpow.bf16 %v4578_v12 }
 0x79a   :  { %5386 = vpow.bf16 %v4580_v13 }
 0x79b   :  { %5388 = vpow.bf16 %v4577_v18 }
 0x79c   :  { %5390 = vpow.bf16 %v4579_v14 }
 0x7a7   :  { %v5385_v17 = vpop.eup %5384 }
 0x7a8   :  { %v5387_v63 = vpop.eup %5386  ;;  %v3771_v15 = vadd.bf16 1065369472, %v5385_v17 }
 0x7a9   :  { %v5389_v55 = vpop.eup %5388  ;;  %v3773_v22 = vadd.bf16 1065369472, %v5387_v63 }
 0x7aa   :  { %v5391_v23 = vpop.eup %5390  ;;  %5392 = vrcp.bf16 %v3771_v15  ;;  %v3770_v24 = vadd.bf16 1065369472, %v5389_v55 }
 0x7ab   :  { %5394 = vrcp.bf16 %v3773_v22  ;;  %v3772_v25 = vadd.bf16 1065369472, %v5391_v23 }
 0x7ac   :  { %5396 = vrcp.bf16 %v3770_v24 }
 0x7ad   :  { %5398 = vrcp.bf16 %v3772_v25 }
 0x7b8   :  { %v5393_v26 = vpop.eup %5392 }
 0x7b9   :  { %v5395_v27 = vpop.eup %5394  ;;  %v3777_v28 = vmul.bf16 1065369472, %v5393_v26 }
 0x7ba   :  { %v5397_v29 = vpop.eup %5396  ;;  %v3781_v30 = vmul.bf16 1065369472, %v5395_v27 }
 0x7bb   :  { %v5399_v31 = vpop.eup %5398  ;;  %v3783_v32 = vmul.bf16 %v3777_v28, %v3751_v8  ;;  %v3775_v33 = vmul.bf16 1065369472, %v5397_v29 }
 0x7bc   :  { %v3785_v34 = vmul.bf16 %v3781_v30, %v3753_v9  ;;  %v3779_v35 = vmul.bf16 1065369472, %v5399_v31 }
 0x7bd   :  { %4081 = vmatprep.mubr.bf16.mxu0 %v3783_v32  ;;  %v3782_v38 = vmul.bf16 %v3775_v33, %v3750_v10 }
 0x7be   :  { %4121 = vmatprep.mubr.bf16.mxu1 %v3785_v34  ;;  %v3784_v16 = vmul.bf16 %v3779_v35, %v3752_v11 }
 0x7bf   :  { %4082 = vmatmul.mubr.bf16.vlgmr.msra.gmra.mxu0 %v3782_v38 }
 0x7c0   :  { %4122 = vmatmul.mubr.bf16.vlgmr.msra.gmra.mxu1 %v3784_v16 }
 0x87f   :  { %v4630_v41 = vpop.f32.mrf.mxu0 }
 0x880   :  { %v4652_v42 = vpop.f32.mrf.mxu1 }
 0x881   :  { %v4631_v45 = vpop.f32.mrf.mxu0 }
 0x882   :  { %v4632_v48 = vadd.f32 %v4631_v45, %v4630_v41  ;;  %v4653_v49 = vpop.f32.mrf.mxu1 }
 0x883   :  { %v4633_v51 = vpop.f32.mrf.mxu0  ;;  %v4654_v56 = vadd.f32 %v4653_v49, %v4652_v42 }
 0x884   :  { %v4084_v53 = vadd.f32 %v4632_v48, %v4581_v44  ;;  %v4655_v57 = vpop.f32.mrf.mxu1 }
 0x885   :  { %v4634_v59 = vpop.f32.mrf.mxu0 }
 0x886   :  { %v4124_v62 = vadd.f32 %v4654_v56, %v4084_v53  ;;  %v4656_v0 = vpop.f32.mrf.mxu1 }
 0x888   :  { %4129 = vst [vmem:[#allocation16] sm:$0xff] %v4124_v62 }
 0x889   :  { %5571 = shalt.err (!%p5568_p2)
}
 0x88a   :  { %4139 = dma.vmem_to_hbm [thread:$0]  %s4137_s7, 128, %s5868_s8, [#allocation4]  }
 0x88b   :  { %5590 = dma.done.wait [#allocation4], 128  }
 0x88c   :  { %5591 = vsyncadd [#allocation4], 4294967168 }
 0x88d   :  { %4143 = vsyncpa [#allocation3], 1 }
 0x88e   :  { %4144 = vsyncpa [#allocation6], 1 }
 0x88f   :  { %4145 = vsyncpa [#allocation9], 1 }
 0x890   :  { %4146 = vsyncpa [#allocation12], 1 }
 0x891   :  { %4147 = vsyncpa [#allocation15], 1 }
 0x892   :  { %4148 = vsyncpa [#allocation4], 1 }

// kernel: tpu_custom_call.1
= control target key start
LH: loop header
LB: loop body
LE: loop exit
PB: predicated region body
PF: predicated region fallthrough
CT: control target
= control target key end

     0   :  { %13 = vsyncpa [#allocation3], 0  ;;  %s5860_s0 = inlined_call_operand.hbm [shape: bf16[8,128], index: 0, kind: input, shape index: {}]   ;;  %s5861_s1 = inlined_call_operand.hbm [shape: bf16[128,512], index: 1, kind: input, shape index: {}]   ;;  %s5862_s2 = inlined_call_operand.hbm [shape: bf16[3,512,512], index: 2, kind: input, shape index: {}]   ;;  %s5863_s3 = inlined_call_operand.hbm [shape: bf16[512,128], index: 3, kind: input, shape index: {}]   ;;  %s5864_s4 = inlined_call_operand.hbm [shape: f32[4,512], index: 4, kind: input, shape index: {}]   ;;  %s5865_s5 = inlined_call_operand.hbm [shape: f32[4,512], index: 5, kind: input, shape index: {}]   ;;  %s5866_s6 = inlined_call_operand.hbm [shape: f32[4,512], index: 6, kind: input, shape index: {}]   ;;  %s5867_s7 = inlined_call_operand.hbm [shape: f32[1,128], index: 7, kind: input, shape index: {}]   ;;  %s5868_s8 = inlined_call_operand.hbm [shape: f32[8,128], index: 8, kind: output, shape index: {}]  }
   0x1   :  { %14 = vsyncpa [#allocation6], 0 }
   0x2   :  { %15 = vsyncpa [#allocation9], 0 }
   0x3   :  { %16 = vsyncpa [#allocation12], 0 }
   0x4   :  { %17 = vsyncpa [#allocation15], 0 }
   0x5   :  { %18 = vsyncpa [#allocation4], 0  ;;  %s5592_s27 = smov [#allocation5]  }
   0x6   :  { %s34_s28 = sshll.u32 %s5592_s27, 4  ;;  %s35_s28 = int_to_ptr.vmem [resolvable:$true] %s34_s28 }
   0x7   :  { %s5408_s29 = scalar_lea.vmem %s35_s28, 4096  ;;  %p5413_p1 = scmp.lt.s32.totalorder %s35_s28, %s35_s28 }
   0x8   :  { %p5409_p0 = scmp.ne.s32.totalorder %s35_s28, %s5408_s29  ;;  %p5414_p2 = scmp.lt.s32.totalorder %s5408_s29, %s5408_s29 }
   0xa   :  { %p5415_p3 = por %p5414_p2, %p5413_p1 }
   0xc   :  { %p5416_p4 = pnand %p5415_p3, %p5409_p0 }
   0xe   :  { %5419 = shalt.err (!%p5416_p4)
}
   0xf   :  { %s5593_s30 = smov 256   ;;  %s5594_s9 = smov 16  }
  0x10   :  { %40 = dma.hbm_to_vmem [thread:$0]  %s5861_s1, 4096, %s35_s28, [#allocation6], %s5593_s30, %s5593_s30, %s5594_s9  }
  0x11   :  { %s5595_s12 = smov [#allocation8]  }
  0x12   :  { %s58_s13 = sshll.u32 %s5595_s12, 4  ;;  %s59_s13 = int_to_ptr.vmem [resolvable:$true] %s58_s13 }
  0x13   :  { %s5428_s14 = scalar_lea.vmem %s59_s13, 4096  ;;  %p5433_p6 = scmp.lt.s32.totalorder %s59_s13, %s59_s13 }
  0x14   :  { %p5429_p5 = scmp.ne.s32.totalorder %s59_s13, %s5428_s14  ;;  %p5434_p7 = scmp.lt.s32.totalorder %s5428_s14, %s5428_s14 }
  0x16   :  { %p5435_p8 = por %p5434_p7, %p5433_p6 }
  0x18   :  { %p5436_p9 = pnand %p5435_p8, %p5429_p5 }
  0x1a   :  { %5439 = shalt.err (!%p5436_p9)
}
  0x1b   :  { %s5596_s15 = smov 64   ;;  %s5597_s16 = smov 4  }
  0x1c   :  { %64 = dma.hbm_to_vmem [thread:$0]  %s5863_s3, 4096, %s59_s13, [#allocation9], %s5596_s15, %s5596_s15, %s5597_s16  }
  0x1d   :  { %s5598_s19 = smov [#allocation11]   ;;  %s5599_s21 = smov [#allocation2]  }
  0x1e   :  { %s81_s20 = sshll.u32 %s5598_s19, 4  ;;  %s25_s1 = sshll.u32 %s5599_s21, 4  ;;  %s82_s20 = int_to_ptr.vmem [resolvable:$true] %s81_s20  ;;  %s26_s1 = int_to_ptr.vmem [resolvable:$true] %s25_s1 }
  0x1f   :  { %s5448_s22 = scalar_lea.vmem %s82_s20, 256  ;;  %p5453_p11 = scmp.lt.s32.totalorder %s82_s20, %s82_s20 }
  0x20   :  { %p5449_p10 = scmp.ne.s32.totalorder %s82_s20, %s5448_s22  ;;  %p5454_p12 = scmp.lt.s32.totalorder %s5448_s22, %s5448_s22 }
  0x22   :  { %p5455_p13 = por %p5454_p12, %p5453_p11 }
  0x24   :  { %p5456_p0 = pnand %p5455_p13, %p5449_p10 }
  0x26   :  { %5459 = shalt.err (!%p5456_p0)
}
  0x27   :  { %84 = dma.hbm_to_vmem [thread:$0]  %s5865_s5, 256, %s82_s20, [#allocation12]  }
  0x28   :  { %s5468_s25 = scalar_lea.vmem %s26_s1, 64  ;;  %p5473_p2 = scmp.lt.s32.totalorder %s26_s1, %s26_s1 }
  0x29   :  { %p5469_p1 = scmp.ne.s32.totalorder %s26_s1, %s5468_s25  ;;  %p5474_p3 = scmp.lt.s32.totalorder %s5468_s25, %s5468_s25 }
  0x2b   :  { %p5475_p4 = por %p5474_p3, %p5473_p2 }
  0x2d   :  { %p5476_p5 = pnand %p5475_p4, %p5469_p1 }
  0x2f   :  { %5479 = shalt.err (!%p5476_p5)
}
  0x30   :  { %28 = dma.hbm_to_vmem [thread:$0]  %s5860_s0, 64, %s26_s1, [#allocation3]  }
  0x31   :  { %s5600_s27 = smov [#allocation7]   ;;  %s5601_s29 = smov [#allocation10]  }
  0x32   :  { %s46_s28 = sshll.u32 %s5600_s27, 4  ;;  %s71_s10 = sshll.u32 %s5601_s29, 4  ;;  %s47_s28 = int_to_ptr.vmem [resolvable:$true] %s46_s28  ;;  %s72_s10 = int_to_ptr.vmem [resolvable:$true] %s71_s10 }
  0x33   :  { %s5488_s11 = scalar_lea.vmem %s47_s28, 49152  ;;  %p5493_p7 = scmp.lt.s32.totalorder %s47_s28, %s47_s28 }
  0x34   :  { %p5489_p6 = scmp.ne.s32.totalorder %s47_s28, %s5488_s11  ;;  %p5494_p8 = scmp.lt.s32.totalorder %s5488_s11, %s5488_s11 }
  0x36   :  { %p5495_p9 = por %p5494_p8, %p5493_p7 }
  0x38   :  { %p5496_p10 = pnand %p5495_p9, %p5489_p6 }
  0x3a   :  { %5499 = shalt.err (!%p5496_p10)
}
  0x3b   :  { %52 = dma.hbm_to_vmem [thread:$0]  %s5862_s2, 49152, %s47_s28, [#allocation6], %s5593_s30, %s5593_s30, %s5594_s9  }
  0x3c   :  { %s5508_s0 = scalar_lea.vmem %s72_s10, 256  ;;  %p5513_p12 = scmp.lt.s32.totalorder %s72_s10, %s72_s10 }
  0x3d   :  { %p5509_p11 = scmp.ne.s32.totalorder %s72_s10, %s5508_s0  ;;  %p5514_p13 = scmp.lt.s32.totalorder %s5508_s0, %s5508_s0 }
  0x3f   :  { %p5515_p0 = por %p5514_p13, %p5513_p12 }
  0x41   :  { %p5516_p1 = pnand %p5515_p0, %p5509_p11 }
  0x43   :  { %5519 = shalt.err (!%p5516_p1)
}
  0x44   :  { %74 = dma.hbm_to_vmem [thread:$0]  %s5864_s4, 256, %s72_s10, [#allocation9]  }
  0x45   :  { %s5602_s15 = smov [#allocation13]   ;;  %s5603_s17 = smov [#allocation14]  }
  0x46   :  { %s91_s16 = sshll.u32 %s5602_s15, 4  ;;  %s101_s18 = sshll.u32 %s5603_s17, 4  ;;  %s92_s16 = int_to_ptr.vmem [resolvable:$true] %s91_s16  ;;  %s102_s18 = int_to_ptr.vmem [resolvable:$true] %s101_s18 }
  0x47   :  { %s5528_s19 = scalar_lea.vmem %s92_s16, 256  ;;  %p5533_p3 = scmp.lt.s32.totalorder %s92_s16, %s92_s16 }
  0x48   :  { %p5529_p2 = scmp.ne.s32.totalorder %s92_s16, %s5528_s19  ;;  %p5534_p4 = scmp.lt.s32.totalorder %s5528_s19, %s5528_s19 }
  0x4a   :  { %p5535_p5 = por %p5534_p4, %p5533_p3 }
  0x4c   :  { %p5536_p6 = pnand %p5535_p5, %p5529_p2 }
  0x4e   :  { %5539 = shalt.err (!%p5536_p6)
}
  0x4f   :  { %94 = dma.hbm_to_vmem [thread:$0]  %s5866_s6, 256, %s92_s16, [#allocation12]  }
  0x50   :  { %s5548_s9 = scalar_lea.vmem %s102_s18, 16  ;;  %s5552_s4 = scalar_lea.vmem %s102_s18, 32 }
  0x51   :  { %p5549_p7 = scmp.ne.s32.totalorder %s102_s18, %s5548_s9  ;;  %p5553_p8 = scmp.lt.s32.totalorder %s102_s18, %s102_s18 }
  0x52   :  { %p5554_p9 = scmp.lt.s32.totalorder %s5552_s4, %s5548_s9 }
  0x54   :  { %p5555_p10 = por %p5554_p9, %p5553_p8 }
  0x56   :  { %p5556_p11 = pnand %p5555_p10, %p5549_p7 }
  0x58   :  { %5559 = shalt.err (!%p5556_p11)
}
  0x59   :  { %104 = dma.hbm_to_vmem [thread:$0]  %s5867_s7, 16, %s102_s18, [#allocation15]  }
  0x5a   :  { %5580 = dma.done.wait [#allocation3], 64  }
  0x5b   :  { %5581 = vsyncadd [#allocation3], 4294967232 }
  0x5c   :  { %5582 = dma.done.wait [#allocation6], 53248  }
  0x5d   :  { %5583 = vsyncadd [#allocation6], 4294914048 }
  0x5e   :  { %5584 = dma.done.wait [#allocation9], 4352  }
  0x5f   :  { %5585 = vsyncadd [#allocation9], 4294962944 }
  0x60   :  { %5586 = dma.done.wait [#allocation12], 512  }
  0x61   :  { %5587 = vsyncadd [#allocation12], 4294966784 }
  0x62   :  { %5588 = dma.done.wait [#allocation15], 16  }
  0x63   :  { %5589 = vsyncadd [#allocation15], 4294967280  ;;  %v5604_v0 = vmov 0   ;;  %v4672_v1 = vld [vmem:[#allocation5 + $0xe4] ss:$16 sps:$4 sm:$0xff]   ;;  %v166_v34 = vlaneseq  ;;  %s5605_s6 = smov [#allocation16]  }
  0x64   :  { %378 = vmatprep.mubr.bf16.mxu0 %v5604_v0  ;;  %419 = vmatprep.mubr.bf16.mxu1 %v5604_v0  ;;  %v4674_v2 = vld [vmem:[#allocation5 + $0xec] ss:$16 sps:$4 sm:$0xff]   ;;  %v4676_v3 = vld [vmem:[#allocation5 + $0xe0] ss:$16 sps:$4 sm:$0xff]   ;;  %v4677_v4 = vld [vmem:[#allocation5 + $0xe8] ss:$16 sps:$4 sm:$0xff]  }
  0x65   :  { %346 = vmatprep.subr.bf16.mxu0 %v4672_v1  ;;  %387 = vmatprep.subr.bf16.mxu1 %v4674_v2  ;;  %v4678_v5 = vld [vmem:[#allocation5 + $0xc4] ss:$16 sps:$4 sm:$0xff]   ;;  %v4680_v6 = vld [vmem:[#allocation5 + $0xcc] ss:$16 sps:$4 sm:$0xff]   ;;  %v4682_v7 = vld [vmem:[#allocation5 + $0xc0] ss:$16 sps:$4 sm:$0xff]  }
  0x66   :  { %347 = vmatpush1.bf16.msra.mxu0 %v4676_v3  ;;  %388 = vmatpush1.bf16.msra.mxu1 %v4677_v4  ;;  %v4683_v8 = vld [vmem:[#allocation5 + $0xc8] ss:$16 sps:$4 sm:$0xff]   ;;  %v4684_v9 = vld [vmem:[#allocation5 + $0xa4] ss:$16 sps:$4 sm:$0xff]   ;;  %v4686_v10 = vld [vmem:[#allocation5 + $0xac] ss:$16 sps:$4 sm:$0xff]  }
  0x67   :  { %348 = vmatprep.subr.bf16.mxu0 %v4678_v5  ;;  %389 = vmatprep.subr.bf16.mxu1 %v4680_v6  ;;  %v4688_v11 = vld [vmem:[#allocation5 + $0xa0] ss:$16 sps:$4 sm:$0xff]   ;;  %v4689_v12 = vld [vmem:[#allocation5 + $0xa8] ss:$16 sps:$4 sm:$0xff]   ;;  %v4690_v13 = vld [vmem:[#allocation5 + $0x84] ss:$16 sps:$4 sm:$0xff]  }
  0x68   :  { %v4692_v14 = vld [vmem:[#allocation5 + $0x8c] ss:$16 sps:$4 sm:$0xff]   ;;  %v4694_v15 = vld [vmem:[#allocation5 + $0x80] ss:$16 sps:$4 sm:$0xff]   ;;  %v4695_v16 = vld [vmem:[#allocation5 + $0x88] ss:$16 sps:$4 sm:$0xff]  }
  0x69   :  { %v4696_v17 = vld [vmem:[#allocation5 + $0x64] ss:$16 sps:$4 sm:$0xff]   ;;  %v4698_v18 = vld [vmem:[#allocation5 + $0x6c] ss:$16 sps:$4 sm:$0xff]   ;;  %v4700_v19 = vld [vmem:[#allocation5 + $0x60] ss:$16 sps:$4 sm:$0xff]  }
  0x6a   :  { %349 = vmatpush1.bf16.msra.mxu0 %v4682_v7  ;;  %390 = vmatpush1.bf16.msra.mxu1 %v4683_v8  ;;  %v4701_v20 = vld [vmem:[#allocation5 + $0x68] ss:$16 sps:$4 sm:$0xff]   ;;  %v4702_v21 = vld [vmem:[#allocation5 + $0x44] ss:$16 sps:$4 sm:$0xff]   ;;  %v4704_v22 = vld [vmem:[#allocation5 + $0x4c] ss:$16 sps:$4 sm:$0xff]  }
  0x6b   :  { %350 = vmatprep.subr.bf16.mxu0 %v4684_v9  ;;  %391 = vmatprep.subr.bf16.mxu1 %v4686_v10  ;;  %v4706_v23 = vld [vmem:[#allocation5 + $0x40] ss:$16 sps:$4 sm:$0xff]   ;;  %v4707_v24 = vld [vmem:[#allocation5 + $0x48] ss:$16 sps:$4 sm:$0xff]   ;;  %v4708_v25 = vld [vmem:[#allocation5 + $0x24] ss:$16 sps:$4 sm:$0xff]  }
  0x6c   :  { %v4710_v26 = vld [vmem:[#allocation5 + $0x2c] ss:$16 sps:$4 sm:$0xff]   ;;  %v4712_v27 = vld [vmem:[#allocation5 + $0x20] ss:$16 sps:$4 sm:$0xff]   ;;  %v4713_v28 = vld [vmem:[#allocation5 + $0x28] ss:$16 sps:$4 sm:$0xff]  }
  0x6d   :  { %v4714_v29 = vld [vmem:[#allocation5 + $0x4] ss:$16 sps:$4 sm:$0xff]   ;;  %v4716_v30 = vld [vmem:[#allocation5 + $0xc] ss:$16 sps:$4 sm:$0xff]   ;;  %v4718_v31 = vld [vmem:[#allocation5] ss:$16 sps:$4 sm:$0xff]  }
  0x6e   :  { %351 = vmatpush1.bf16.msra.mxu0 %v4688_v11  ;;  %392 = vmatpush1.bf16.msra.mxu1 %v4689_v12  ;;  %v4719_v32 = vld [vmem:[#allocation5 + $0x8] ss:$16 sps:$4 sm:$0xff]   ;;  %v131_v33 = vld [vmem:[#allocation2] sm:$0xf]  ;;  %v167_v35 = vshrl.u32 %v166_v34, 7  ;;  %s4136_s7 = sshll.u32 %s5605_s6, 4  ;;  %s4137_s7 = int_to_ptr.vmem [resolvable:$true] %s4136_s7 }
  0x6f   :  { %352 = vmatprep.subr.bf16.mxu0 %v4690_v13  ;;  %393 = vmatprep.subr.bf16.mxu1 %v4692_v14  ;;  %v164_v38 = vld [vmem:[#allocation10] ss:$4 sm:$0xf]  ;;  %s5560_s1 = scalar_lea.vmem %s4137_s7, 128  ;;  %p5565_p13 = scmp.lt.s32.totalorder %s4137_s7, %s4137_s7 }
  0x70   :  { %v5681_v36 = vsub.s32 0, %v167_v35  ;;  %v5683_v37 = vsub.s32 2, %v167_v35  ;;  %v5685_v39 = vsub.s32 1, %v167_v35  ;;  %v5690_v43 = vsub.s32 3, %v167_v35  ;;  %v4722_v3 = vld [vmem:[#allocation7 + $0xe4] ss:$16 sps:$4 sm:$0xff]   ;;  %p5561_p12 = scmp.ne.s32.totalorder %s4137_s7, %s5560_s1  ;;  %p5566_p0 = scmp.lt.s32.totalorder %s5560_s1, %s5560_s1 }
  0x71   :  { %v4725_v4 = vld [vmem:[#allocation7 + $0x2e4] ss:$16 sps:$4 sm:$0xff]   ;;  %v4720_v5 = vld [vmem:[#allocation7 + $0xe0] ss:$16 sps:$4 sm:$0xff]  }
  0x72   :  { %353 = vmatpush1.bf16.msra.mxu0 %v4694_v15  ;;  %394 = vmatpush1.bf16.msra.mxu1 %v4695_v16  ;;  %v169_v40 = vrot.slane %v164_v38, %v5681_v36  ;;  %v177_v41 = vrot.slane %v164_v38, %v5683_v37  ;;  %v173_v42 = vrot.slane %v164_v38, %v5685_v39  ;;  %v4723_v6 = vld [vmem:[#allocation7 + $0x2e0] ss:$16 sps:$4 sm:$0xff]   ;;  %v4728_v8 = vld [vmem:[#allocation7 + $0xc4] ss:$16 sps:$4 sm:$0xff]   ;;  %p5567_p1 = por %p5566_p0, %p5565_p13 }
  0x73   :  { %354 = vmatprep.subr.bf16.mxu0 %v4696_v17  ;;  %395 = vmatprep.subr.bf16.mxu1 %v4698_v18  ;;  %v181_v51 = vrot.slane %v164_v38, %v5690_v43  ;;  %v4726_v7 = vld [vmem:[#allocation7 + $0xc0] ss:$16 sps:$4 sm:$0xff]   ;;  %v4731_v10 = vld [vmem:[#allocation7 + $0x2c4] ss:$16 sps:$4 sm:$0xff]  }
  0x74   :  { %v4729_v9 = vld [vmem:[#allocation7 + $0x2c0] ss:$16 sps:$4 sm:$0xff]   ;;  %v4734_v11 = vld [vmem:[#allocation7 + $0xa4] ss:$16 sps:$4 sm:$0xff]   ;;  %p5568_p2 = pnand %p5567_p1, %p5561_p12 }
  0x75   :  { %v4737_v12 = vld [vmem:[#allocation7 + $0x2a4] ss:$16 sps:$4 sm:$0xff]   ;;  %v4732_v13 = vld [vmem:[#allocation7 + $0xa0] ss:$16 sps:$4 sm:$0xff]  }
  0x76   :  { %355 = vmatpush1.bf16.msra.mxu0 %v4700_v19  ;;  %396 = vmatpush1.bf16.msra.mxu1 %v4701_v20  ;;  %v4735_v14 = vld [vmem:[#allocation7 + $0x2a0] ss:$16 sps:$4 sm:$0xff]   ;;  %v4740_v15 = vld [vmem:[#allocation7 + $0x84] ss:$16 sps:$4 sm:$0xff]  }
  0x77   :  { %356 = vmatprep.subr.bf16.mxu0 %v4702_v21  ;;  %397 = vmatprep.subr.bf16.mxu1 %v4704_v22  ;;  %v4743_v16 = vld [vmem:[#allocation7 + $0x284] ss:$16 sps:$4 sm:$0xff]   ;;  %v4738_v17 = vld [vmem:[#allocation7 + $0x80] ss:$16 sps:$4 sm:$0xff]  }
  0x78   :  { %v4741_v18 = vld [vmem:[#allocation7 + $0x280] ss:$16 sps:$4 sm:$0xff]   ;;  %v4746_v19 = vld [vmem:[#allocation7 + $0x64] ss:$16 sps:$4 sm:$0xff]  }
  0x79   :  { %v4749_v20 = vld [vmem:[#allocation7 + $0x264] ss:$16 sps:$4 sm:$0xff]   ;;  %v4744_v21 = vld [vmem:[#allocation7 + $0x60] ss:$16 sps:$4 sm:$0xff]  }
  0x7a   :  { %357 = vmatpush1.bf16.msra.mxu0 %v4706_v23  ;;  %398 = vmatpush1.bf16.msra.mxu1 %v4707_v24  ;;  %v4747_v22 = vld [vmem:[#allocation7 + $0x260] ss:$16 sps:$4 sm:$0xff]   ;;  %v4752_v23 = vld [vmem:[#allocation7 + $0x44] ss:$16 sps:$4 sm:$0xff]  }
  0x7b   :  { %358 = vmatprep.subr.bf16.mxu0 %v4708_v25  ;;  %399 = vmatprep.subr.bf16.mxu1 %v4710_v26  ;;  %v4755_v24 = vld [vmem:[#allocation7 + $0x244] ss:$16 sps:$4 sm:$0xff]   ;;  %v4750_v25 = vld [vmem:[#allocation7 + $0x40] ss:$16 sps:$4 sm:$0xff]  }
  0x7c   :  { %v4753_v26 = vld [vmem:[#allocation7 + $0x240] ss:$16 sps:$4 sm:$0xff]   ;;  %v4770_v35 = vld [vmem:[#allocation7 + $0x1e4] ss:$16 sps:$4 sm:$0xff]  }
  0x7d   :  { %v4765_v34 = vld [vmem:[#allocation7 + $0x200] ss:$16 sps:$4 sm:$0xff]   ;;  %v4773_v38 = vld [vmem:[#allocation7 + $0x3e4] ss:$16 sps:$4 sm:$0xff]  }
  0x7e   :  { %359 = vmatpush1.bf16.msra.mxu0 %v4712_v27  ;;  %400 = vmatpush1.bf16.msra.mxu1 %v4713_v28  ;;  %v4758_v27 = vld [vmem:[#allocation7 + $0x24] ss:$16 sps:$4 sm:$0xff]  }
  0x7f   :  { %360 = vmatprep.subr.bf16.mxu0 %v4714_v29  ;;  %401 = vmatprep.subr.bf16.mxu1 %v4716_v30  ;;  %v4761_v28 = vld [vmem:[#allocation7 + $0x224] ss:$16 sps:$4 sm:$0xff]   ;;  %v4756_v29 = vld [vmem:[#allocation7 + $0x20] ss:$16 sps:$4 sm:$0xff]  }
  0x80   :  { %v4759_v30 = vld [vmem:[#allocation7 + $0x220] ss:$16 sps:$4 sm:$0xff]  }
  0x82   :  { %361 = vmatpush1.bf16.msra.mxu0 %v4718_v31  ;;  %402 = vmatpush1.bf16.msra.mxu1 %v4719_v32  ;;  %v4764_v31 = vld [vmem:[#allocation7 + $0x4] ss:$16 sps:$4 sm:$0xff]  }
  0x83   :  { %1341 = vmatprep.subr.bf16.mxu0 %v4722_v3  ;;  %1382 = vmatprep.subr.bf16.mxu1 %v4725_v4  ;;  %v4767_v32 = vld [vmem:[#allocation7 + $0x204] ss:$16 sps:$4 sm:$0xff]  }
  0x84   :  { %v4806_v3 = vld [vmem:[#allocation7 + $0x124] ss:$16 sps:$4 sm:$0xff]  }
  0x85   :  { %379 = vmatmul.mubr.bf16.vlgmr.msra.gmra.mxu0 %v131_v33  ;;  %420 = vmatmul.mubr.bf16.vlgmr.msra.gmra.mxu1 %v131_v33  ;;  %v4762_v33 = vld [vmem:[#allocation7] ss:$16 sps:$4 sm:$0xff]   ;;  %v4809_v4 = vld [vmem:[#allocation7 + $0x324] ss:$16 sps:$4 sm:$0xff]  }
  0x86   :  { %1342 = vmatpush1.bf16.msra.mxu0 %v4720_v5  ;;  %1383 = vmatpush1.bf16.msra.mxu1 %v4723_v6  ;;  %v4804_v5 = vld [vmem:[#allocation7 + $0x120] ss:$16 sps:$4 sm:$0xff]  }
  0x87   :  { %1343 = vmatprep.subr.bf16.mxu0 %v4728_v8  ;;  %1384 = vmatprep.subr.bf16.mxu1 %v4731_v10  ;;  %v4807_v6 = vld [vmem:[#allocation7 + $0x320] ss:$16 sps:$4 sm:$0xff]   ;;  %v4815_v8 = vld [vmem:[#allocation7 + $0x304] ss:$16 sps:$4 sm:$0xff]  }
  0x88   :  { %v4813_v10 = vld [vmem:[#allocation7 + $0x300] ss:$16 sps:$4 sm:$0xff]  }
  0x8a   :  { %1344 = vmatpush1.bf16.msra.mxu0 %v4726_v7  ;;  %1385 = vmatpush1.bf16.msra.mxu1 %v4729_v9  ;;  %v4812_v7 = vld [vmem:[#allocation7 + $0x104] ss:$16 sps:$4 sm:$0xff]   ;;  %v4810_v9 = vld [vmem:[#allocation7 + $0x100] ss:$16 sps:$4 sm:$0xff]  }
  0x8b   :  { %1345 = vmatprep.subr.bf16.mxu0 %v4734_v11  ;;  %1386 = vmatprep.subr.bf16.mxu1 %v4737_v12  ;;  %v4818_v11 = vld [vmem:[#allocation7 + $0xec] ss:$16 sps:$4 sm:$0xff]  }
  0x8c   :  { %v4821_v12 = vld [vmem:[#allocation7 + $0x2ec] ss:$16 sps:$4 sm:$0xff]  }
  0x8e   :  { %1346 = vmatpush1.bf16.msra.mxu0 %v4732_v13  ;;  %1387 = vmatpush1.bf16.msra.mxu1 %v4735_v14 }
  0x8f   :  { %1347 = vmatprep.subr.bf16.mxu0 %v4740_v15  ;;  %1388 = vmatprep.subr.bf16.mxu1 %v4743_v16 }
  0x92   :  { %1348 = vmatpush1.bf16.msra.mxu0 %v4738_v17  ;;  %1389 = vmatpush1.bf16.msra.mxu1 %v4741_v18 }
  0x93   :  { %1349 = vmatprep.subr.bf16.mxu0 %v4746_v19  ;;  %1390 = vmatprep.subr.bf16.mxu1 %v4749_v20 }
  0x96   :  { %1350 = vmatpush1.bf16.msra.mxu0 %v4744_v21  ;;  %1391 = vmatpush1.bf16.msra.mxu1 %v4747_v22  ;;  %v428_v21 = vld [vmem:[#allocation11] ss:$4 sm:$0xf]  ;;  %v429_v22 = vld [vmem:[#allocation13] ss:$4 sm:$0xf] }
  0x97   :  { %1351 = vmatprep.subr.bf16.mxu0 %v4752_v23  ;;  %1392 = vmatprep.subr.bf16.mxu1 %v4755_v24  ;;  %v460_v23 = vrot.slane %v428_v21, %v5685_v39  ;;  %v468_v24 = vrot.slane %v428_v21, %v5690_v43 }
  0x9a   :  { %1352 = vmatpush1.bf16.msra.mxu0 %v4750_v25  ;;  %1393 = vmatpush1.bf16.msra.mxu1 %v4753_v26  ;;  %v456_v25 = vrot.slane %v428_v21, %v5681_v36  ;;  %v464_v26 = vrot.slane %v428_v21, %v5683_v37 }
  0x9b   :  { %1353 = vmatprep.subr.bf16.mxu0 %v4758_v27  ;;  %1394 = vmatprep.subr.bf16.mxu1 %v4761_v28  ;;  %v489_v28 = vrot.slane %v429_v22, %v5685_v39 }
  0x9e   :  { %1354 = vmatpush1.bf16.msra.mxu0 %v4756_v29  ;;  %1395 = vmatpush1.bf16.msra.mxu1 %v4759_v30  ;;  %v497_v29 = vrot.slane %v429_v22, %v5690_v43 }
  0x9f   :  { %1355 = vmatprep.subr.bf16.mxu0 %v4764_v31  ;;  %1396 = vmatprep.subr.bf16.mxu1 %v4767_v32 }
  0xa2   :  { %1356 = vmatpush1.bf16.msra.mxu0 %v4762_v33  ;;  %1397 = vmatpush1.bf16.msra.mxu1 %v4765_v34  ;;  %v485_v34 = vrot.slane %v429_v22, %v5681_v36 }
  0xa3   :  { %1357 = vmatprep.subr.bf16.mxu0 %v4770_v35  ;;  %1398 = vmatprep.subr.bf16.mxu1 %v4773_v38  ;;  %v493_v35 = vrot.slane %v429_v22, %v5683_v37  ;;  %v4824_v22 = vld [vmem:[#allocation7 + $0xcc] ss:$16 sps:$4 sm:$0xff]  }
 0x145   :  { %v380_v44 = vpop.f32.mrf.mxu0  ;;  %v421_v45 = vpop.f32.mrf.mxu1 }
 0x146   :  { %v5692_v46 = vadd.f32 %v380_v44, %v169_v40  ;;  %v5694_v47 = vadd.f32 %v421_v45, %v177_v41  ;;  %v4768_v40 = vld [vmem:[#allocation7 + $0x1e0] ss:$16 sps:$4 sm:$0xff]   ;;  %v4779_v44 = vld [vmem:[#allocation7 + $0x3c4] ss:$16 sps:$4 sm:$0xff]  }
 0x147   :  { %v382_v48 = vpop.f32.mrf.mxu0  ;;  %v423_v49 = vpop.f32.mrf.mxu1  ;;  %v4771_v41 = vld [vmem:[#allocation7 + $0x3e0] ss:$16 sps:$4 sm:$0xff]   ;;  %1358 = vmatpush2.bf16.msra.mxu0 %v4768_v40 }
 0x148   :  { %v5696_v50 = vadd.f32 %v382_v48, %v173_v42  ;;  %v437_v54 = vmul.f32 %v5692_v46, %v5692_v46  ;;  %v439_v55 = vmul.f32 %v5694_v47, %v5694_v47  ;;  %v5707_v60 = vadd.f32 %v423_v49, %v181_v51  ;;  %v4776_v42 = vld [vmem:[#allocation7 + $0x1c4] ss:$16 sps:$4 sm:$0xff]   ;;  %v4774_v45 = vld [vmem:[#allocation7 + $0x1c0] ss:$16 sps:$4 sm:$0xff]   ;;  %1399 = vmatpush2.bf16.msra.mxu1 %v4771_v41 }
 0x149   :  { %v384_v52 = vpop.f32.mrf.mxu0  ;;  %v425_v53 = vpop.f32.mrf.mxu1  ;;  %1359 = vmatprep.subr.bf16.mxu0 %v4776_v42  ;;  %v4777_v48 = vld [vmem:[#allocation7 + $0x3c0] ss:$16 sps:$4 sm:$0xff]   ;;  %v4782_v49 = vld [vmem:[#allocation7 + $0x1a4] ss:$16 sps:$4 sm:$0xff]   ;;  %1400 = vmatprep.subr.bf16.mxu1 %v4779_v44 }
 0x14a   :  { %v438_v56 = vmul.f32 %v5696_v50, %v5696_v50  ;;  %v430_v57 = vadd.f32 %v5696_v50, %v5692_v46  ;;  %v440_v1 = vmul.f32 %v5707_v60, %v5707_v60  ;;  %v4785_v51 = vld [vmem:[#allocation7 + $0x3a4] ss:$16 sps:$4 sm:$0xff]   ;;  %v4780_v52 = vld [vmem:[#allocation7 + $0x1a0] ss:$16 sps:$4 sm:$0xff]  }
 0x14b   :  { %v385_v58 = vpop.f32.mrf.mxu0  ;;  %v426_v59 = vpop.f32.mrf.mxu1  ;;  %1360 = vmatpush2.bf16.msra.mxu0 %v4774_v45  ;;  %v4783_v53 = vld [vmem:[#allocation7 + $0x3a0] ss:$16 sps:$4 sm:$0xff]  }
 0x14c   :  { %v431_v61 = vadd.f32 %v430_v57, %v5694_v47  ;;  %v441_v62 = vadd.f32 %v438_v56, %v437_v54  ;;  %1401 = vmatpush2.bf16.msra.mxu1 %v4777_v48  ;;  %1361 = vmatprep.subr.bf16.mxu0 %v4782_v49  ;;  %v4788_v54 = vld [vmem:[#allocation7 + $0x184] ss:$16 sps:$4 sm:$0xff]   ;;  %v4786_v56 = vld [vmem:[#allocation7 + $0x180] ss:$16 sps:$4 sm:$0xff]  }
 0x14d   :  { %1402 = vmatprep.subr.bf16.mxu1 %v4785_v51  ;;  %v4789_v57 = vld [vmem:[#allocation7 + $0x380] ss:$16 sps:$4 sm:$0xff]   ;;  %v4794_v58 = vld [vmem:[#allocation7 + $0x164] ss:$16 sps:$4 sm:$0xff]  }
 0x14e   :  { %v432_v63 = vadd.f32 %v431_v61, %v5707_v60  ;;  %v442_v0 = vadd.f32 %v441_v62, %v439_v55  ;;  %v4791_v55 = vld [vmem:[#allocation7 + $0x384] ss:$16 sps:$4 sm:$0xff]   ;;  %v4792_v61 = vld [vmem:[#allocation7 + $0x160] ss:$16 sps:$4 sm:$0xff]  }
 0x14f   :  { %1362 = vmatpush2.bf16.msra.mxu0 %v4780_v52  ;;  %v4797_v59 = vld [vmem:[#allocation7 + $0x364] ss:$16 sps:$4 sm:$0xff]   ;;  %v4795_v62 = vld [vmem:[#allocation7 + $0x360] ss:$16 sps:$4 sm:$0xff]  }
 0x150   :  { %433 = vadd.xlane.f32.xlu0 %v432_v63  ;;  %v443_v2 = vadd.f32 %v442_v0, %v440_v1  ;;  %1403 = vmatpush2.bf16.msra.mxu1 %v4783_v53  ;;  %v4800_v63 = vld [vmem:[#allocation7 + $0x144] ss:$16 sps:$4 sm:$0xff]   ;;  %v4798_v1 = vld [vmem:[#allocation7 + $0x140] ss:$16 sps:$4 sm:$0xff]  }
 0x151   :  { %1363 = vmatprep.subr.bf16.mxu0 %v4788_v54  ;;  %1404 = vmatprep.subr.bf16.mxu1 %v4791_v55  ;;  %v4803_v0 = vld [vmem:[#allocation7 + $0x344] ss:$16 sps:$4 sm:$0xff]  }
 0x153   :  { %1364 = vmatpush2.bf16.msra.mxu0 %v4786_v56 }
 0x154   :  { %444 = vadd.xlane.f32.xlu0 %v443_v2  ;;  %1405 = vmatpush2.bf16.msra.mxu1 %v4789_v57  ;;  %v4801_v2 = vld [vmem:[#allocation7 + $0x340] ss:$16 sps:$4 sm:$0xff]  }
 0x155   :  { %1365 = vmatprep.subr.bf16.mxu0 %v4794_v58  ;;  %1406 = vmatprep.subr.bf16.mxu1 %v4797_v59 }
 0x157   :  { %1366 = vmatpush2.bf16.msra.mxu0 %v4792_v61 }
 0x158   :  { %1407 = vmatpush2.bf16.msra.mxu1 %v4795_v62  ;;  %1367 = vmatprep.subr.bf16.mxu0 %v4800_v63 }
 0x159   :  { %1408 = vmatprep.subr.bf16.mxu1 %v4803_v0 }
 0x15b   :  { %1368 = vmatpush2.bf16.msra.mxu0 %v4798_v1 }
 0x15c   :  { %1409 = vmatpush2.bf16.msra.mxu1 %v4801_v2  ;;  %1369 = vmatprep.subr.bf16.mxu0 %v4806_v3 }
 0x15d   :  { %1410 = vmatprep.subr.bf16.mxu1 %v4809_v4 }
 0x15f   :  { %1370 = vmatpush2.bf16.msra.mxu0 %v4804_v5 }
 0x160   :  { %1411 = vmatpush2.bf16.msra.mxu1 %v4807_v6  ;;  %1371 = vmatprep.subr.bf16.mxu0 %v4812_v7 }
 0x161   :  { %1412 = vmatprep.subr.bf16.mxu1 %v4815_v8 }
 0x163   :  { %1372 = vmatpush2.bf16.msra.mxu0 %v4810_v9 }
 0x164   :  { %1413 = vmatpush2.bf16.msra.mxu1 %v4813_v10  ;;  %1423 = vmatprep.subr.bf16.mxu0 %v4818_v11 }
 0x165   :  { %1464 = vmatprep.subr.bf16.mxu1 %v4821_v12 }
 0x1d9   :  { %v434_v13 = vpop.xlane.xlu0 %433 }
 0x1da   :  { %v436_v14 = vmul.f32 0.001953125, %v434_v13 }
 0x1dc   :  { %v447_v16 = vmul.f32 %v436_v14, %v436_v14 }
 0x1dd   :  { %v445_v15 = vpop.xlane.xlu0 %444 }
 0x1de   :  { %v446_v17 = vmul.f32 0.001953125, %v445_v15 }
 0x1e0   :  { %v448_v18 = vsub.f32 %v446_v17, %v447_v16  ;;  %v4816_v17 = vld [vmem:[#allocation7 + $0xe8] ss:$16 sps:$4 sm:$0xff]  }
 0x1e2   :  { %v449_v19 = vmax.f32 %v448_v18, 0.0 }
 0x1e4   :  { %v450_v20 = vadd.f32 1e-05, %v449_v19  ;;  %v4819_v19 = vld [vmem:[#allocation7 + $0x2e8] ss:$16 sps:$4 sm:$0xff]  }
 0x1e6   :  { %5328 = vrsqrt.f32 %v450_v20 }
 0x1f3   :  { %v5329_v27 = vpop.eup %5328 }
 0x1f4   :  { %v474_v30 = vmul.f32 %v5329_v27, %v460_v23  ;;  %v476_v31 = vmul.f32 %v5329_v27, %v468_v24  ;;  %v473_v32 = vmul.f32 %v5329_v27, %v456_v25  ;;  %v475_v33 = vmul.f32 %v5329_v27, %v464_v26  ;;  %v4827_v23 = vld [vmem:[#allocation7 + $0x2cc] ss:$16 sps:$4 sm:$0xff]   ;;  %v4822_v24 = vld [vmem:[#allocation7 + $0xc8] ss:$16 sps:$4 sm:$0xff]  }
 0x1f5   :  { %v4825_v25 = vld [vmem:[#allocation7 + $0x2c8] ss:$16 sps:$4 sm:$0xff]   ;;  %v4830_v26 = vld [vmem:[#allocation7 + $0xac] ss:$16 sps:$4 sm:$0xff]  }
 0x1f6   :  { %v478_v38 = vmul.f32 %v474_v30, %v436_v14  ;;  %v480_v40 = vmul.f32 %v476_v31, %v436_v14  ;;  %v477_v41 = vmul.f32 %v473_v32, %v436_v14  ;;  %v479_v42 = vmul.f32 %v475_v33, %v436_v14  ;;  %v4833_v27 = vld [vmem:[#allocation7 + $0x2ac] ss:$16 sps:$4 sm:$0xff]  }
 0x1f7   :  { %v507_v45 = vmul.f32 %v474_v30, %v5696_v50  ;;  %v509_v49 = vmul.f32 %v476_v31, %v5707_v60  ;;  %v506_v52 = vmul.f32 %v473_v32, %v5692_v46  ;;  %v508_v54 = vmul.f32 %v475_v33, %v5694_v47  ;;  %v4836_v30 = vld [vmem:[#allocation7 + $0x8c] ss:$16 sps:$4 sm:$0xff]   ;;  %v4834_v32 = vld [vmem:[#allocation7 + $0x88] ss:$16 sps:$4 sm:$0xff]  }
 0x1f8   :  { %v503_v44 = vsub.f32 %v489_v28, %v478_v38  ;;  %v505_v48 = vsub.f32 %v497_v29, %v480_v40  ;;  %v502_v51 = vsub.f32 %v485_v34, %v477_v41  ;;  %v504_v53 = vsub.f32 %v493_v35, %v479_v42  ;;  %v4828_v28 = vld [vmem:[#allocation7 + $0xa8] ss:$16 sps:$4 sm:$0xff]   ;;  %v4839_v31 = vld [vmem:[#allocation7 + $0x28c] ss:$16 sps:$4 sm:$0xff]  }
 0x1f9   :  { %v4831_v29 = vld [vmem:[#allocation7 + $0x2a8] ss:$16 sps:$4 sm:$0xff]   ;;  %v4842_v34 = vld [vmem:[#allocation7 + $0x6c] ss:$16 sps:$4 sm:$0xff]  }
 0x1fa   :  { %v511_v55 = vadd.f32 %v507_v45, %v503_v44  ;;  %v513_v56 = vadd.f32 %v509_v49, %v505_v48  ;;  %v510_v57 = vadd.f32 %v506_v52, %v502_v51  ;;  %v512_v58 = vadd.f32 %v508_v54, %v504_v53  ;;  %v4837_v33 = vld [vmem:[#allocation7 + $0x288] ss:$16 sps:$4 sm:$0xff]   ;;  %v4845_v35 = vld [vmem:[#allocation7 + $0x26c] ss:$16 sps:$4 sm:$0xff]  }
 0x1fb   :  { %v4840_v38 = vld [vmem:[#allocation7 + $0x68] ss:$16 sps:$4 sm:$0xff]   ;;  %v4848_v41 = vld [vmem:[#allocation7 + $0x4c] ss:$16 sps:$4 sm:$0xff]  }
 0x1fc   :  { %v515_v59 = vpack.c.bf16 %v511_v55, %v511_v55  ;;  %v517_v61 = vpack.c.bf16 %v513_v56, %v513_v56  ;;  %v514_v62 = vpack.c.bf16 %v510_v57, %v510_v57  ;;  %v516_v63 = vpack.c.bf16 %v512_v58, %v512_v58  ;;  %v4843_v40 = vld [vmem:[#allocation7 + $0x268] ss:$16 sps:$4 sm:$0xff]   ;;  %v4851_v42 = vld [vmem:[#allocation7 + $0x24c] ss:$16 sps:$4 sm:$0xff]  }
 0x1fd   :  { %v4846_v44 = vld [vmem:[#allocation7 + $0x48] ss:$16 sps:$4 sm:$0xff]   ;;  %v4854_v48 = vld [vmem:[#allocation7 + $0x2c] ss:$16 sps:$4 sm:$0xff]  }
 0x1fe   :  { %v4182_v0 = vmul.bf16 3216621497, %v515_v59  ;;  %v4184_v1 = vmul.bf16 3216621497, %v517_v61  ;;  %v4181_v50 = vmul.bf16 3216621497, %v514_v62 }
 0x1ff   :  { %v4183_v2 = vmul.bf16 3216621497, %v516_v63  ;;  %v4849_v45 = vld [vmem:[#allocation7 + $0x248] ss:$16 sps:$4 sm:$0xff]   ;;  %v4857_v49 = vld [vmem:[#allocation7 + $0x22c] ss:$16 sps:$4 sm:$0xff]  }
 0x200   :  { %5330 = vpow.bf16 %v4182_v0  ;;  %v4852_v51 = vld [vmem:[#allocation7 + $0x28] ss:$16 sps:$4 sm:$0xff]   ;;  %v4860_v53 = vld [vmem:[#allocation7 + $0xc] ss:$16 sps:$4 sm:$0xff]  }
 0x201   :  { %5332 = vpow.bf16 %v4184_v1  ;;  %v4855_v52 = vld [vmem:[#allocation7 + $0x228] ss:$16 sps:$4 sm:$0xff]   ;;  %v4863_v54 = vld [vmem:[#allocation7 + $0x20c] ss:$16 sps:$4 sm:$0xff]  }
 0x202   :  { %5334 = vpow.bf16 %v4181_v50  ;;  %v4858_v55 = vld [vmem:[#allocation7 + $0x8] ss:$16 sps:$4 sm:$0xff]   ;;  %v4866_v57 = vld [vmem:[#allocation7 + $0x1ec] ss:$16 sps:$4 sm:$0xff]  }
 0x203   :  { %5336 = vpow.bf16 %v4183_v2  ;;  %v4861_v56 = vld [vmem:[#allocation7 + $0x208] ss:$16 sps:$4 sm:$0xff]   ;;  %v4869_v58 = vld [vmem:[#allocation7 + $0x3ec] ss:$16 sps:$4 sm:$0xff]  }
 0x204   :  { %v4870_v0 = vld [vmem:[#allocation7 + $0x1c8] ss:$16 sps:$4 sm:$0xff]   ;;  %v4878_v50 = vld [vmem:[#allocation7 + $0x1ac] ss:$16 sps:$4 sm:$0xff]  }
 0x205   :  { %v4873_v1 = vld [vmem:[#allocation7 + $0x3c8] ss:$16 sps:$4 sm:$0xff]   ;;  %v4881_v2 = vld [vmem:[#allocation7 + $0x3ac] ss:$16 sps:$4 sm:$0xff]  }
 0x20e   :  { %v5331_v46 = vpop.eup %5330 }
 0x20f   :  { %v5333_v60 = vpop.eup %5332  ;;  %v535_v3 = vadd.bf16 1065369472, %v5331_v46  ;;  %v4876_v46 = vld [vmem:[#allocation7 + $0x1a8] ss:$16 sps:$4 sm:$0xff]  }
 0x210   :  { %v5335_v47 = vpop.eup %5334  ;;  %v537_v4 = vadd.bf16 1065369472, %v5333_v60  ;;  %v4879_v60 = vld [vmem:[#allocation7 + $0x3a8] ss:$16 sps:$4 sm:$0xff]  }
 0x211   :  { %v5337_v5 = vpop.eup %5336  ;;  %5338 = vrcp.bf16 %v535_v3  ;;  %v534_v6 = vadd.bf16 1065369472, %v5335_v47  ;;  %v4884_v3 = vld [vmem:[#allocation7 + $0x18c] ss:$16 sps:$4 sm:$0xff]  }
 0x212   :  { %5340 = vrcp.bf16 %v537_v4  ;;  %v536_v7 = vadd.bf16 1065369472, %v5337_v5  ;;  %v4887_v47 = vld [vmem:[#allocation7 + $0x38c] ss:$16 sps:$4 sm:$0xff]   ;;  %v4882_v4 = vld [vmem:[#allocation7 + $0x188] ss:$16 sps:$4 sm:$0xff]  }
 0x213   :  { %5342 = vrcp.bf16 %v534_v6  ;;  %v4885_v5 = vld [vmem:[#allocation7 + $0x388] ss:$16 sps:$4 sm:$0xff]   ;;  %v4890_v6 = vld [vmem:[#allocation7 + $0x16c] ss:$16 sps:$4 sm:$0xff]  }
 0x214   :  { %5344 = vrcp.bf16 %v536_v7  ;;  %v4893_v7 = vld [vmem:[#allocation7 + $0x36c] ss:$16 sps:$4 sm:$0xff]  }
 0x21f   :  { %v5339_v8 = vpop.eup %5338 }
 0x220   :  { %v5341_v9 = vpop.eup %5340  ;;  %v541_v10 = vmul.bf16 1065369472, %v5339_v8  ;;  %v4888_v8 = vld [vmem:[#allocation7 + $0x168] ss:$16 sps:$4 sm:$0xff]  }
 0x221   :  { %v5343_v11 = vpop.eup %5342  ;;  %v545_v12 = vmul.bf16 1065369472, %v5341_v9  ;;  %v4891_v9 = vld [vmem:[#allocation7 + $0x368] ss:$16 sps:$4 sm:$0xff]  }
 0x222   :  { %v5345_v13 = vpop.eup %5344  ;;  %v547_v14 = vmul.bf16 %v541_v10, %v515_v59  ;;  %v539_v15 = vmul.bf16 1065369472, %v5343_v11  ;;  %v4864_v59 = vld [vmem:[#allocation7 + $0x1e8] ss:$16 sps:$4 sm:$0xff]   ;;  %v4896_v10 = vld [vmem:[#allocation7 + $0x14c] ss:$16 sps:$4 sm:$0xff]  }
 0x223   :  { %v549_v16 = vmul.bf16 %v545_v12, %v517_v61  ;;  %v543_v18 = vmul.bf16 1065369472, %v5345_v13  ;;  %v4867_v61 = vld [vmem:[#allocation7 + $0x3e8] ss:$16 sps:$4 sm:$0xff]   ;;  %v4899_v11 = vld [vmem:[#allocation7 + $0x34c] ss:$16 sps:$4 sm:$0xff]  }
 0x224   :  { %1373 = vmatprep.mubr.bf16.mxu0 %v547_v14  ;;  %v5725_v20 = vmul.bf16 %v539_v15, %v514_v62  ;;  %v4872_v62 = vld [vmem:[#allocation7 + $0x1cc] ss:$16 sps:$4 sm:$0xff]   ;;  %v4894_v12 = vld [vmem:[#allocation7 + $0x148] ss:$16 sps:$4 sm:$0xff]  }
 0x225   :  { %1414 = vmatprep.mubr.bf16.mxu1 %v549_v16  ;;  %v5727_v21 = vmul.bf16 %v543_v18, %v516_v63  ;;  %v4875_v63 = vld [vmem:[#allocation7 + $0x3cc] ss:$16 sps:$4 sm:$0xff]   ;;  %v4897_v13 = vld [vmem:[#allocation7 + $0x348] ss:$16 sps:$4 sm:$0xff]  }
 0x226   :  { %1374 = vmatmul.mubr.bf16.vlgmr.msra.gmra.mxu0 %v5725_v20  ;;  %v4905_v15 = vld [vmem:[#allocation7 + $0x32c] ss:$16 sps:$4 sm:$0xff]  }
 0x227   :  { %1415 = vmatmul.mubr.bf16.vlgmr.msra.gmra.mxu1 %v5727_v21  ;;  %1424 = vmatpush1.bf16.msra.mxu0 %v4816_v17  ;;  %v4903_v17 = vld [vmem:[#allocation7 + $0x328] ss:$16 sps:$4 sm:$0xff]   ;;  %v4908_v18 = vld [vmem:[#allocation7 + $0x10c] ss:$16 sps:$4 sm:$0xff]  }
 0x228   :  { %1465 = vmatpush1.bf16.msra.mxu1 %v4819_v19  ;;  %1455 = vmatprep.mubr.bf16.mxu0 %v547_v14  ;;  %v4902_v14 = vld [vmem:[#allocation7 + $0x12c] ss:$16 sps:$4 sm:$0xff]  }
 0x229   :  { %1496 = vmatprep.mubr.bf16.mxu1 %v549_v16  ;;  %1425 = vmatprep.subr.bf16.mxu0 %v4824_v22  ;;  %v4900_v16 = vld [vmem:[#allocation7 + $0x128] ss:$16 sps:$4 sm:$0xff]   ;;  %v4911_v19 = vld [vmem:[#allocation7 + $0x30c] ss:$16 sps:$4 sm:$0xff]  }
 0x22a   :  { %1466 = vmatprep.subr.bf16.mxu1 %v4827_v23  ;;  %v4906_v22 = vld [vmem:[#allocation7 + $0x108] ss:$16 sps:$4 sm:$0xff]  }
 0x22b   :  { %1426 = vmatpush1.bf16.msra.mxu0 %v4822_v24  ;;  %v4909_v23 = vld [vmem:[#allocation7 + $0x308] ss:$16 sps:$4 sm:$0xff]  }
 0x22c   :  { %1467 = vmatpush1.bf16.msra.mxu1 %v4825_v25  ;;  %1427 = vmatprep.subr.bf16.mxu0 %v4830_v26 }
 0x22d   :  { %1468 = vmatprep.subr.bf16.mxu1 %v4833_v27 }
 0x22f   :  { %1428 = vmatpush1.bf16.msra.mxu0 %v4828_v28 }
 0x230   :  { %1469 = vmatpush1.bf16.msra.mxu1 %v4831_v29  ;;  %1429 = vmatprep.subr.bf16.mxu0 %v4836_v30 }
 0x231   :  { %1470 = vmatprep.subr.bf16.mxu1 %v4839_v31 }
 0x233   :  { %1430 = vmatpush1.bf16.msra.mxu0 %v4834_v32  ;;  %v679_v32 = vld [vmem:[#allocation10 + $0x1] ss:$4 sm:$0xf] }
 0x234   :  { %1471 = vmatpush1.bf16.msra.mxu1 %v4837_v33  ;;  %1431 = vmatprep.subr.bf16.mxu0 %v4842_v34  ;;  %v688_v33 = vrot.slane %v679_v32, %v5685_v39  ;;  %v684_v34 = vrot.slane %v679_v32, %v5681_v36 }
 0x235   :  { %1472 = vmatprep.subr.bf16.mxu1 %v4845_v35 }
 0x237   :  { %1432 = vmatpush1.bf16.msra.mxu0 %v4840_v38 }
 0x238   :  { %1473 = vmatpush1.bf16.msra.mxu1 %v4843_v40  ;;  %1433 = vmatprep.subr.bf16.mxu0 %v4848_v41  ;;  %v696_v41 = vrot.slane %v679_v32, %v5690_v43 }
 0x239   :  { %1474 = vmatprep.subr.bf16.mxu1 %v4851_v42 }
 0x23b   :  { %1434 = vmatpush1.bf16.msra.mxu0 %v4846_v44 }
 0x23c   :  { %1475 = vmatpush1.bf16.msra.mxu1 %v4849_v45  ;;  %1435 = vmatprep.subr.bf16.mxu0 %v4854_v48 }
 0x23d   :  { %1476 = vmatprep.subr.bf16.mxu1 %v4857_v49 }
 0x23f   :  { %1436 = vmatpush1.bf16.msra.mxu0 %v4852_v51 }
 0x240   :  { %1477 = vmatpush1.bf16.msra.mxu1 %v4855_v52  ;;  %1437 = vmatprep.subr.bf16.mxu0 %v4860_v53 }
 0x241   :  { %1478 = vmatprep.subr.bf16.mxu1 %v4863_v54 }
 0x243   :  { %1438 = vmatpush1.bf16.msra.mxu0 %v4858_v55 }
 0x244   :  { %1479 = vmatpush1.bf16.msra.mxu1 %v4861_v56  ;;  %1439 = vmatprep.subr.bf16.mxu0 %v4866_v57 }
 0x245   :  { %1480 = vmatprep.subr.bf16.mxu1 %v4869_v58 }
 0x247   :  { %1440 = vmatpush2.bf16.msra.mxu0 %v4864_v59 }
 0x248   :  { %1481 = vmatpush2.bf16.msra.mxu1 %v4867_v61  ;;  %1441 = vmatprep.subr.bf16.mxu0 %v4872_v62 }
 0x249   :  { %1482 = vmatprep.subr.bf16.mxu1 %v4875_v63 }
 0x24b   :  { %1442 = vmatpush2.bf16.msra.mxu0 %v4870_v0 }
 0x24c   :  { %1483 = vmatpush2.bf16.msra.mxu1 %v4873_v1  ;;  %1443 = vmatprep.subr.bf16.mxu0 %v4878_v50 }
 0x24d   :  { %1484 = vmatprep.subr.bf16.mxu1 %v4881_v2 }
 0x24f   :  { %1444 = vmatpush2.bf16.msra.mxu0 %v4876_v46 }
 0x250   :  { %1485 = vmatpush2.bf16.msra.mxu1 %v4879_v60  ;;  %1445 = vmatprep.subr.bf16.mxu0 %v4884_v3  ;;  %v4914_v60 = vld [vmem:[#allocation7 + $0x4e4] ss:$16 sps:$4 sm:$0xff]  }
 0x251   :  { %1486 = vmatprep.subr.bf16.mxu1 %v4887_v47  ;;  %v4917_v3 = vld [vmem:[#allocation7 + $0x6e4] ss:$16 sps:$4 sm:$0xff]   ;;  %v4912_v47 = vld [vmem:[#allocation7 + $0x4e0] ss:$16 sps:$4 sm:$0xff]  }
 0x253   :  { %1446 = vmatpush2.bf16.msra.mxu0 %v4882_v4  ;;  %v4915_v4 = vld [vmem:[#allocation7 + $0x6e0] ss:$16 sps:$4 sm:$0xff]  }
 0x254   :  { %1487 = vmatpush2.bf16.msra.mxu1 %v4885_v5  ;;  %1447 = vmatprep.subr.bf16.mxu0 %v4890_v6  ;;  %v4918_v5 = vld [vmem:[#allocation7 + $0x4c0] ss:$16 sps:$4 sm:$0xff]   ;;  %v4920_v6 = vld [vmem:[#allocation7 + $0x4c4] ss:$16 sps:$4 sm:$0xff]  }
 0x255   :  { %1488 = vmatprep.subr.bf16.mxu1 %v4893_v7  ;;  %v4921_v7 = vld [vmem:[#allocation7 + $0x6c0] ss:$16 sps:$4 sm:$0xff]  }
 0x257   :  { %1448 = vmatpush2.bf16.msra.mxu0 %v4888_v8  ;;  %v4923_v8 = vld [vmem:[#allocation7 + $0x6c4] ss:$16 sps:$4 sm:$0xff]  }
 0x258   :  { %1489 = vmatpush2.bf16.msra.mxu1 %v4891_v9  ;;  %1449 = vmatprep.subr.bf16.mxu0 %v4896_v10  ;;  %v4926_v9 = vld [vmem:[#allocation7 + $0x4a4] ss:$16 sps:$4 sm:$0xff]  }
 0x259   :  { %1490 = vmatprep.subr.bf16.mxu1 %v4899_v11  ;;  %v4929_v10 = vld [vmem:[#allocation7 + $0x6a4] ss:$16 sps:$4 sm:$0xff]   ;;  %v4924_v11 = vld [vmem:[#allocation7 + $0x4a0] ss:$16 sps:$4 sm:$0xff]  }
 0x25b   :  { %1450 = vmatpush2.bf16.msra.mxu0 %v4894_v12  ;;  %v4927_v12 = vld [vmem:[#allocation7 + $0x6a0] ss:$16 sps:$4 sm:$0xff]  }
 0x25c   :  { %1491 = vmatpush2.bf16.msra.mxu1 %v4897_v13  ;;  %1451 = vmatprep.subr.bf16.mxu0 %v4902_v14  ;;  %v4932_v13 = vld [vmem:[#allocation7 + $0x484] ss:$16 sps:$4 sm:$0xff]  }
 0x25d   :  { %1492 = vmatprep.subr.bf16.mxu1 %v4905_v15  ;;  %v4935_v14 = vld [vmem:[#allocation7 + $0x684] ss:$16 sps:$4 sm:$0xff]   ;;  %v4930_v15 = vld [vmem:[#allocation7 + $0x480] ss:$16 sps:$4 sm:$0xff]  }
 0x25f   :  { %1452 = vmatpush2.bf16.msra.mxu0 %v4900_v16  ;;  %v4933_v16 = vld [vmem:[#allocation7 + $0x680] ss:$16 sps:$4 sm:$0xff]  }
 0x260   :  { %1493 = vmatpush2.bf16.msra.mxu1 %v4903_v17  ;;  %1453 = vmatprep.subr.bf16.mxu0 %v4908_v18  ;;  %v4938_v17 = vld [vmem:[#allocation7 + $0x464] ss:$16 sps:$4 sm:$0xff]  }
 0x261   :  { %1494 = vmatprep.subr.bf16.mxu1 %v4911_v19  ;;  %v4941_v18 = vld [vmem:[#allocation7 + $0x664] ss:$16 sps:$4 sm:$0xff]   ;;  %v4936_v19 = vld [vmem:[#allocation7 + $0x460] ss:$16 sps:$4 sm:$0xff]  }
 0x263   :  { %1454 = vmatpush2.bf16.msra.mxu0 %v4906_v22  ;;  %v4939_v22 = vld [vmem:[#allocation7 + $0x660] ss:$16 sps:$4 sm:$0xff]  }
 0x264   :  { %1495 = vmatpush2.bf16.msra.mxu1 %v4909_v23  ;;  %2420 = vmatprep.subr.bf16.mxu0 %v4914_v60  ;;  %v4944_v23 = vld [vmem:[#allocation7 + $0x444] ss:$16 sps:$4 sm:$0xff]  }
 0x265   :  { %2461 = vmatprep.subr.bf16.mxu1 %v4917_v3  ;;  %v4998_v60 = vld [vmem:[#allocation7 + $0x524] ss:$16 sps:$4 sm:$0xff]  }
 0x266   :  { %1456 = vmatmul.mubr.bf16.vlgmr.msra.gmra.mxu0 %v5725_v20  ;;  %v692_v20 = vrot.slane %v679_v32, %v5683_v37  ;;  %v4959_v32 = vld [vmem:[#allocation7 + $0x604] ss:$16 sps:$4 sm:$0xff]  }
 0x267   :  { %1497 = vmatmul.mubr.bf16.vlgmr.msra.gmra.mxu1 %v5727_v21  ;;  %2421 = vmatpush1.bf16.msra.mxu0 %v4912_v47  ;;  %v5001_v3 = vld [vmem:[#allocation7 + $0x724] ss:$16 sps:$4 sm:$0xff]   ;;  %v4996_v47 = vld [vmem:[#allocation7 + $0x520] ss:$16 sps:$4 sm:$0xff]  }
 0x268   :  { %2462 = vmatpush1.bf16.msra.mxu1 %v4915_v4  ;;  %2422 = vmatprep.subr.bf16.mxu0 %v4920_v6  ;;  %v4999_v4 = vld [vmem:[#allocation7 + $0x720] ss:$16 sps:$4 sm:$0xff]   ;;  %v5007_v6 = vld [vmem:[#allocation7 + $0x704] ss:$16 sps:$4 sm:$0xff]  }
 0x269   :  { %2463 = vmatprep.subr.bf16.mxu1 %v4923_v8  ;;  %v5005_v8 = vld [vmem:[#allocation7 + $0x700] ss:$16 sps:$4 sm:$0xff]  }
 0x26b   :  { %2423 = vmatpush1.bf16.msra.mxu0 %v4918_v5  ;;  %v5004_v5 = vld [vmem:[#allocation7 + $0x504] ss:$16 sps:$4 sm:$0xff]  }
 0x26c   :  { %2464 = vmatpush1.bf16.msra.mxu1 %v4921_v7  ;;  %2424 = vmatprep.subr.bf16.mxu0 %v4926_v9  ;;  %v5002_v7 = vld [vmem:[#allocation7 + $0x500] ss:$16 sps:$4 sm:$0xff]   ;;  %v5010_v9 = vld [vmem:[#allocation7 + $0x4ec] ss:$16 sps:$4 sm:$0xff]  }
 0x26d   :  { %2465 = vmatprep.subr.bf16.mxu1 %v4929_v10  ;;  %v5013_v10 = vld [vmem:[#allocation7 + $0x6ec] ss:$16 sps:$4 sm:$0xff]  }
 0x26f   :  { %2425 = vmatpush1.bf16.msra.mxu0 %v4924_v11 }
 0x270   :  { %2466 = vmatpush1.bf16.msra.mxu1 %v4927_v12  ;;  %2426 = vmatprep.subr.bf16.mxu0 %v4932_v13 }
 0x271   :  { %2467 = vmatprep.subr.bf16.mxu1 %v4935_v14 }
 0x273   :  { %2427 = vmatpush1.bf16.msra.mxu0 %v4930_v15 }
 0x274   :  { %2468 = vmatpush1.bf16.msra.mxu1 %v4933_v16  ;;  %2428 = vmatprep.subr.bf16.mxu0 %v4938_v17 }
 0x275   :  { %2469 = vmatprep.subr.bf16.mxu1 %v4941_v18 }
 0x277   :  { %2429 = vmatpush1.bf16.msra.mxu0 %v4936_v19  ;;  %v1506_v19 = vld [vmem:[#allocation11 + $0x1] ss:$4 sm:$0xf] }
 0x278   :  { %2470 = vmatpush1.bf16.msra.mxu1 %v4939_v22  ;;  %2430 = vmatprep.subr.bf16.mxu0 %v4944_v23  ;;  %v1508_v22 = vld [vmem:[#allocation13 + $0x1] ss:$4 sm:$0xf]  ;;  %v1538_v23 = vrot.slane %v1506_v19, %v5685_v39 }
 0x2e6   :  { %v1375_v24 = vpop.f32.mrf.mxu0 }
 0x2e7   :  { %v1416_v25 = vpop.f32.mrf.mxu1  ;;  %v1376_v38 = vadd.f32 %v1375_v24, %v684_v34  ;;  %v4947_v24 = vld [vmem:[#allocation7 + $0x644] ss:$16 sps:$4 sm:$0xff]   ;;  %v4957_v34 = vld [vmem:[#allocation7 + $0x600] ss:$16 sps:$4 sm:$0xff]  }
 0x2e8   :  { %v1377_v26 = vpop.f32.mrf.mxu0  ;;  %2471 = vmatprep.subr.bf16.mxu1 %v4947_v24  ;;  %v1546_v24 = vrot.slane %v1506_v19, %v5690_v43 }
 0x2e9   :  { %v1418_v27 = vpop.f32.mrf.mxu1  ;;  %v1378_v35 = vadd.f32 %v1377_v26, %v688_v33  ;;  %v5738_v21 = vadd.f32 %v1416_v25, %v1376_v38  ;;  %v4942_v25 = vld [vmem:[#allocation7 + $0x440] ss:$16 sps:$4 sm:$0xff]   ;;  %v4965_v38 = vld [vmem:[#allocation7 + $0x7e4] ss:$16 sps:$4 sm:$0xff]  }
 0x2ea   :  { %v1379_v28 = vpop.f32.mrf.mxu0  ;;  %v4945_v26 = vld [vmem:[#allocation7 + $0x640] ss:$16 sps:$4 sm:$0xff]   ;;  %2431 = vmatpush1.bf16.msra.mxu0 %v4942_v25  ;;  %v1534_v25 = vrot.slane %v1506_v19, %v5681_v36 }
 0x2eb   :  { %v1420_v29 = vpop.f32.mrf.mxu1  ;;  %v5735_v40 = vadd.f32 %v1418_v27, %v1378_v35  ;;  %v1515_v51 = vmul.f32 %v5738_v21, %v5738_v21  ;;  %v4950_v27 = vld [vmem:[#allocation7 + $0x424] ss:$16 sps:$4 sm:$0xff]   ;;  %2472 = vmatpush1.bf16.msra.mxu1 %v4945_v26  ;;  %v4954_v33 = vld [vmem:[#allocation7 + $0x400] ss:$16 sps:$4 sm:$0xff]   ;;  %v1542_v26 = vrot.slane %v1506_v19, %v5683_v37 }
 0x2ec   :  { %v1380_v30 = vpop.f32.mrf.mxu0  ;;  %v4953_v28 = vld [vmem:[#allocation7 + $0x624] ss:$16 sps:$4 sm:$0xff]   ;;  %v4948_v29 = vld [vmem:[#allocation7 + $0x420] ss:$16 sps:$4 sm:$0xff]   ;;  %2432 = vmatprep.subr.bf16.mxu0 %v4950_v27 }
 0x2ed   :  { %v1421_v31 = vpop.f32.mrf.mxu1  ;;  %v1516_v44 = vmul.f32 %v5735_v40, %v5735_v40  ;;  %v1509_v55 = vadd.f32 %v5735_v40, %v5738_v21  ;;  %v4951_v30 = vld [vmem:[#allocation7 + $0x620] ss:$16 sps:$4 sm:$0xff]   ;;  %2473 = vmatprep.subr.bf16.mxu1 %v4953_v28  ;;  %v4962_v35 = vld [vmem:[#allocation7 + $0x5e4] ss:$16 sps:$4 sm:$0xff]   ;;  %v1567_v28 = vrot.slane %v1508_v22, %v5685_v39 }
 0x2ee   :  { %v4956_v31 = vld [vmem:[#allocation7 + $0x404] ss:$16 sps:$4 sm:$0xff]   ;;  %2433 = vmatpush1.bf16.msra.mxu0 %v4948_v29  ;;  %v1575_v29 = vrot.slane %v1508_v22, %v5690_v43 }
 0x2ef   :  { %v1519_v62 = vadd.f32 %v1516_v44, %v1515_v51  ;;  %2474 = vmatpush1.bf16.msra.mxu1 %v4951_v30  ;;  %2434 = vmatprep.subr.bf16.mxu0 %v4956_v31  ;;  %v4971_v44 = vld [vmem:[#allocation7 + $0x7c4] ss:$16 sps:$4 sm:$0xff]  }
 0x2f0   :  { %2475 = vmatprep.subr.bf16.mxu1 %v4959_v32  ;;  %v4977_v51 = vld [vmem:[#allocation7 + $0x7a4] ss:$16 sps:$4 sm:$0xff]  }
 0x2f2   :  { %2435 = vmatpush1.bf16.msra.mxu0 %v4954_v33 }
 0x2f3   :  { %2476 = vmatpush1.bf16.msra.mxu1 %v4957_v34  ;;  %2436 = vmatprep.subr.bf16.mxu0 %v4962_v35  ;;  %v1563_v34 = vrot.slane %v1508_v22, %v5681_v36  ;;  %v1571_v35 = vrot.slane %v1508_v22, %v5683_v37  ;;  %v5016_v22 = vld [vmem:[#allocation7 + $0x4cc] ss:$16 sps:$4 sm:$0xff]  }
 0x2f4   :  { %2477 = vmatprep.subr.bf16.mxu1 %v4965_v38 }
 0x326   :  { %v1457_v42 = vpop.f32.mrf.mxu0 }
 0x327   :  { %v1458_v45 = vadd.f32 %v1457_v42, %v692_v20  ;;  %v1498_v48 = vpop.f32.mrf.mxu1  ;;  %v4960_v20 = vld [vmem:[#allocation7 + $0x5e0] ss:$16 sps:$4 sm:$0xff]   ;;  %v4968_v42 = vld [vmem:[#allocation7 + $0x5c4] ss:$16 sps:$4 sm:$0xff]  }
 0x328   :  { %v1459_v49 = vpop.f32.mrf.mxu0  ;;  %2437 = vmatpush2.bf16.msra.mxu0 %v4960_v20 }
 0x329   :  { %v5745_v52 = vadd.f32 %v1498_v48, %v1458_v45  ;;  %v1460_v53 = vadd.f32 %v1459_v49, %v696_v41  ;;  %v1500_v54 = vpop.f32.mrf.mxu1  ;;  %v4963_v41 = vld [vmem:[#allocation7 + $0x7e0] ss:$16 sps:$4 sm:$0xff]   ;;  %2438 = vmatprep.subr.bf16.mxu0 %v4968_v42  ;;  %v4974_v49 = vld [vmem:[#allocation7 + $0x5a4] ss:$16 sps:$4 sm:$0xff]  }
 0x32a   :  { %v1461_v56 = vpop.f32.mrf.mxu0  ;;  %2478 = vmatpush2.bf16.msra.mxu1 %v4963_v41  ;;  %v4966_v45 = vld [vmem:[#allocation7 + $0x5c0] ss:$16 sps:$4 sm:$0xff]  }
 0x32b   :  { %v1517_v57 = vmul.f32 %v5745_v52, %v5745_v52  ;;  %v5751_v58 = vadd.f32 %v1500_v54, %v1460_v53  ;;  %v1502_v59 = vpop.f32.mrf.mxu1  ;;  %v1510_v61 = vadd.f32 %v1509_v55, %v5745_v52  ;;  %v4969_v48 = vld [vmem:[#allocation7 + $0x7c0] ss:$16 sps:$4 sm:$0xff]   ;;  %2479 = vmatprep.subr.bf16.mxu1 %v4971_v44  ;;  %v4980_v55 = vld [vmem:[#allocation7 + $0x584] ss:$16 sps:$4 sm:$0xff]  }
 0x32c   :  { %v1462_v63 = vpop.f32.mrf.mxu0  ;;  %2439 = vmatpush2.bf16.msra.mxu0 %v4966_v45  ;;  %v4972_v53 = vld [vmem:[#allocation7 + $0x5a0] ss:$16 sps:$4 sm:$0xff]   ;;  %v4983_v56 = vld [vmem:[#allocation7 + $0x784] ss:$16 sps:$4 sm:$0xff]  }
 0x32d   :  { %v1503_v0 = vpop.f32.mrf.mxu1  ;;  %v1511_v1 = vadd.f32 %v1510_v61, %v5751_v58  ;;  %v1518_v50 = vmul.f32 %v5751_v58, %v5751_v58  ;;  %v1520_v2 = vadd.f32 %v1519_v62, %v1517_v57  ;;  %v4975_v54 = vld [vmem:[#allocation7 + $0x7a0] ss:$16 sps:$4 sm:$0xff]   ;;  %2440 = vmatprep.subr.bf16.mxu0 %v4974_v49  ;;  %v4986_v61 = vld [vmem:[#allocation7 + $0x564] ss:$16 sps:$4 sm:$0xff]  }
 0x32e   :  { %2480 = vmatpush2.bf16.msra.mxu1 %v4969_v48  ;;  %v4978_v57 = vld [vmem:[#allocation7 + $0x580] ss:$16 sps:$4 sm:$0xff]   ;;  %v4989_v62 = vld [vmem:[#allocation7 + $0x764] ss:$16 sps:$4 sm:$0xff]  }
 0x32f   :  { %1512 = vadd.xlane.f32.xlu1 %v1511_v1  ;;  %v1521_v46 = vadd.f32 %v1520_v2, %v1518_v50  ;;  %2481 = vmatprep.subr.bf16.mxu1 %v4977_v51  ;;  %v4981_v59 = vld [vmem:[#allocation7 + $0x780] ss:$16 sps:$4 sm:$0xff]   ;;  %v4992_v1 = vld [vmem:[#allocation7 + $0x544] ss:$16 sps:$4 sm:$0xff]  }
 0x330   :  { %2441 = vmatpush2.bf16.msra.mxu0 %v4972_v53  ;;  %v4984_v63 = vld [vmem:[#allocation7 + $0x560] ss:$16 sps:$4 sm:$0xff]   ;;  %v4995_v50 = vld [vmem:[#allocation7 + $0x744] ss:$16 sps:$4 sm:$0xff]  }
 0x331   :  { %2442 = vmatprep.subr.bf16.mxu0 %v4980_v55  ;;  %v4987_v0 = vld [vmem:[#allocation7 + $0x760] ss:$16 sps:$4 sm:$0xff]  }
 0x332   :  { %2482 = vmatpush2.bf16.msra.mxu1 %v4975_v54  ;;  %v4990_v2 = vld [vmem:[#allocation7 + $0x540] ss:$16 sps:$4 sm:$0xff]  }
 0x333   :  { %1522 = vadd.xlane.f32.xlu1 %v1521_v46  ;;  %2483 = vmatprep.subr.bf16.mxu1 %v4983_v56  ;;  %v4993_v46 = vld [vmem:[#allocation7 + $0x740] ss:$16 sps:$4 sm:$0xff]  }
 0x334   :  { %2443 = vmatpush2.bf16.msra.mxu0 %v4978_v57 }
 0x335   :  { %2444 = vmatprep.subr.bf16.mxu0 %v4986_v61 }
 0x336   :  { %2484 = vmatpush2.bf16.msra.mxu1 %v4981_v59 }
 0x337   :  { %2485 = vmatprep.subr.bf16.mxu1 %v4989_v62 }
 0x338   :  { %2445 = vmatpush2.bf16.msra.mxu0 %v4984_v63 }
 0x339   :  { %2446 = vmatprep.subr.bf16.mxu0 %v4992_v1 }
 0x33a   :  { %2486 = vmatpush2.bf16.msra.mxu1 %v4987_v0 }
 0x33b   :  { %2487 = vmatprep.subr.bf16.mxu1 %v4995_v50 }
 0x33c   :  { %2447 = vmatpush2.bf16.msra.mxu0 %v4990_v2 }
 0x33d   :  { %2448 = vmatprep.subr.bf16.mxu0 %v4998_v60 }
 0x33e   :  { %2488 = vmatpush2.bf16.msra.mxu1 %v4993_v46 }
 0x33f   :  { %2489 = vmatprep.subr.bf16.mxu1 %v5001_v3 }
 0x340   :  { %2449 = vmatpush2.bf16.msra.mxu0 %v4996_v47 }
 0x341   :  { %2450 = vmatprep.subr.bf16.mxu0 %v5004_v5 }
 0x342   :  { %2490 = vmatpush2.bf16.msra.mxu1 %v4999_v4 }
 0x343   :  { %2491 = vmatprep.subr.bf16.mxu1 %v5007_v6 }
 0x344   :  { %2451 = vmatpush2.bf16.msra.mxu0 %v5002_v7 }
 0x345   :  { %2502 = vmatprep.subr.bf16.mxu0 %v5010_v9 }
 0x346   :  { %2492 = vmatpush2.bf16.msra.mxu1 %v5005_v8 }
 0x347   :  { %2543 = vmatprep.subr.bf16.mxu1 %v5013_v10 }
 0x3b8   :  { %v1513_v11 = vpop.xlane.xlu1 %1512 }
 0x3b9   :  { %v1514_v12 = vmul.f32 0.001953125, %v1513_v11 }
 0x3bb   :  { %v1525_v14 = vmul.f32 %v1514_v12, %v1514_v12 }
 0x3bc   :  { %v1523_v13 = vpop.xlane.xlu1 %1522 }
 0x3bd   :  { %v1524_v15 = vmul.f32 0.001953125, %v1523_v13 }
 0x3bf   :  { %v1526_v16 = vsub.f32 %v1524_v15, %v1525_v14  ;;  %v5008_v15 = vld [vmem:[#allocation7 + $0x4e8] ss:$16 sps:$4 sm:$0xff]  }
 0x3c1   :  { %v1527_v17 = vmax.f32 %v1526_v16, 0.0 }
 0x3c3   :  { %v1528_v18 = vadd.f32 1e-05, %v1527_v17  ;;  %v5011_v17 = vld [vmem:[#allocation7 + $0x6e8] ss:$16 sps:$4 sm:$0xff]  }
 0x3c5   :  { %5346 = vrsqrt.f32 %v1528_v18 }
 0x3d2   :  { %v5347_v27 = vpop.eup %5346 }
 0x3d3   :  { %v1552_v30 = vmul.f32 %v5347_v27, %v1538_v23  ;;  %v1554_v31 = vmul.f32 %v5347_v27, %v1546_v24  ;;  %v1551_v32 = vmul.f32 %v5347_v27, %v1534_v25  ;;  %v1553_v33 = vmul.f32 %v5347_v27, %v1542_v26  ;;  %v5019_v23 = vld [vmem:[#allocation7 + $0x6cc] ss:$16 sps:$4 sm:$0xff]   ;;  %v5014_v24 = vld [vmem:[#allocation7 + $0x4c8] ss:$16 sps:$4 sm:$0xff]  }
 0x3d4   :  { %v5017_v25 = vld [vmem:[#allocation7 + $0x6c8] ss:$16 sps:$4 sm:$0xff]   ;;  %v5022_v26 = vld [vmem:[#allocation7 + $0x4ac] ss:$16 sps:$4 sm:$0xff]  }
 0x3d5   :  { %v1556_v38 = vmul.f32 %v1552_v30, %v1514_v12  ;;  %v1558_v20 = vmul.f32 %v1554_v31, %v1514_v12  ;;  %v1555_v41 = vmul.f32 %v1551_v32, %v1514_v12  ;;  %v1557_v42 = vmul.f32 %v1553_v33, %v1514_v12  ;;  %v5025_v27 = vld [vmem:[#allocation7 + $0x6ac] ss:$16 sps:$4 sm:$0xff]  }
 0x3d6   :  { %v1585_v45 = vmul.f32 %v1552_v30, %v5735_v40  ;;  %v1587_v49 = vmul.f32 %v1554_v31, %v5751_v58  ;;  %v1584_v53 = vmul.f32 %v1551_v32, %v5738_v21  ;;  %v1586_v55 = vmul.f32 %v1553_v33, %v5745_v52  ;;  %v5028_v30 = vld [vmem:[#allocation7 + $0x48c] ss:$16 sps:$4 sm:$0xff]   ;;  %v5026_v32 = vld [vmem:[#allocation7 + $0x488] ss:$16 sps:$4 sm:$0xff]  }
 0x3d7   :  { %v1581_v44 = vsub.f32 %v1567_v28, %v1556_v38  ;;  %v1583_v48 = vsub.f32 %v1575_v29, %v1558_v20  ;;  %v1580_v51 = vsub.f32 %v1563_v34, %v1555_v41  ;;  %v1582_v54 = vsub.f32 %v1571_v35, %v1557_v42  ;;  %v5020_v28 = vld [vmem:[#allocation7 + $0x4a8] ss:$16 sps:$4 sm:$0xff]   ;;  %v5031_v31 = vld [vmem:[#allocation7 + $0x68c] ss:$16 sps:$4 sm:$0xff]  }
 0x3d8   :  { %v5023_v29 = vld [vmem:[#allocation7 + $0x6a8] ss:$16 sps:$4 sm:$0xff]   ;;  %v5034_v34 = vld [vmem:[#allocation7 + $0x46c] ss:$16 sps:$4 sm:$0xff]  }
 0x3d9   :  { %v1589_v56 = vadd.f32 %v1585_v45, %v1581_v44  ;;  %v1591_v57 = vadd.f32 %v1587_v49, %v1583_v48  ;;  %v1588_v59 = vadd.f32 %v1584_v53, %v1580_v51  ;;  %v1590_v61 = vadd.f32 %v1586_v55, %v1582_v54  ;;  %v5029_v33 = vld [vmem:[#allocation7 + $0x688] ss:$16 sps:$4 sm:$0xff]   ;;  %v5037_v35 = vld [vmem:[#allocation7 + $0x66c] ss:$16 sps:$4 sm:$0xff]  }
 0x3da   :  { %v5032_v38 = vld [vmem:[#allocation7 + $0x468] ss:$16 sps:$4 sm:$0xff]   ;;  %v5040_v41 = vld [vmem:[#allocation7 + $0x44c] ss:$16 sps:$4 sm:$0xff]  }
 0x3db   :  { %v1593_v62 = vpack.c.bf16 %v1589_v56, %v1589_v56  ;;  %v1595_v63 = vpack.c.bf16 %v1591_v57, %v1591_v57  ;;  %v1592_v0 = vpack.c.bf16 %v1588_v59, %v1588_v59  ;;  %v1594_v1 = vpack.c.bf16 %v1590_v61, %v1590_v61  ;;  %v5035_v20 = vld [vmem:[#allocation7 + $0x668] ss:$16 sps:$4 sm:$0xff]   ;;  %v5043_v42 = vld [vmem:[#allocation7 + $0x64c] ss:$16 sps:$4 sm:$0xff]  }
 0x3dc   :  { %v5038_v44 = vld [vmem:[#allocation7 + $0x448] ss:$16 sps:$4 sm:$0xff]   ;;  %v5046_v48 = vld [vmem:[#allocation7 + $0x42c] ss:$16 sps:$4 sm:$0xff]  }
 0x3dd   :  { %v4314_v50 = vmul.bf16 3216621497, %v1593_v62  ;;  %v4316_v2 = vmul.bf16 3216621497, %v1595_v63  ;;  %v4313_v40 = vmul.bf16 3216621497, %v1592_v0 }
 0x3de   :  { %v4315_v46 = vmul.bf16 3216621497, %v1594_v1  ;;  %v5041_v45 = vld [vmem:[#allocation7 + $0x648] ss:$16 sps:$4 sm:$0xff]   ;;  %v5049_v49 = vld [vmem:[#allocation7 + $0x62c] ss:$16 sps:$4 sm:$0xff]  }
 0x3df   :  { %5348 = vpow.bf16 %v4314_v50  ;;  %v5044_v51 = vld [vmem:[#allocation7 + $0x428] ss:$16 sps:$4 sm:$0xff]   ;;  %v5052_v54 = vld [vmem:[#allocation7 + $0x40c] ss:$16 sps:$4 sm:$0xff]  }
 0x3e0   :  { %5350 = vpow.bf16 %v4316_v2  ;;  %v5047_v53 = vld [vmem:[#allocation7 + $0x628] ss:$16 sps:$4 sm:$0xff]   ;;  %v5055_v55 = vld [vmem:[#allocation7 + $0x60c] ss:$16 sps:$4 sm:$0xff]  }
 0x3e1   :  { %5352 = vpow.bf16 %v4313_v40  ;;  %v5050_v56 = vld [vmem:[#allocation7 + $0x408] ss:$16 sps:$4 sm:$0xff]   ;;  %v5058_v59 = vld [vmem:[#allocation7 + $0x5ec] ss:$16 sps:$4 sm:$0xff]  }
 0x3e2   :  { %5354 = vpow.bf16 %v4315_v46  ;;  %v5053_v57 = vld [vmem:[#allocation7 + $0x608] ss:$16 sps:$4 sm:$0xff]   ;;  %v5061_v61 = vld [vmem:[#allocation7 + $0x7ec] ss:$16 sps:$4 sm:$0xff]  }
 0x3e3   :  { %v5062_v50 = vld [vmem:[#allocation7 + $0x5c8] ss:$16 sps:$4 sm:$0xff]   ;;  %v5070_v40 = vld [vmem:[#allocation7 + $0x5ac] ss:$16 sps:$4 sm:$0xff]  }
 0x3e4   :  { %v5065_v2 = vld [vmem:[#allocation7 + $0x7c8] ss:$16 sps:$4 sm:$0xff]   ;;  %v5073_v46 = vld [vmem:[#allocation7 + $0x7ac] ss:$16 sps:$4 sm:$0xff]  }
 0x3ed   :  { %v5349_v21 = vpop.eup %5348 }
 0x3ee   :  { %v5351_v58 = vpop.eup %5350  ;;  %v1613_v60 = vadd.bf16 1065369472, %v5349_v21  ;;  %v5068_v21 = vld [vmem:[#allocation7 + $0x5a8] ss:$16 sps:$4 sm:$0xff]  }
 0x3ef   :  { %v5353_v52 = vpop.eup %5352  ;;  %v1615_v3 = vadd.bf16 1065369472, %v5351_v58  ;;  %v5071_v58 = vld [vmem:[#allocation7 + $0x7a8] ss:$16 sps:$4 sm:$0xff]  }
 0x3f0   :  { %v5355_v47 = vpop.eup %5354  ;;  %5356 = vrcp.bf16 %v1613_v60  ;;  %v1612_v4 = vadd.bf16 1065369472, %v5353_v52  ;;  %v5076_v60 = vld [vmem:[#allocation7 + $0x58c] ss:$16 sps:$4 sm:$0xff]  }
 0x3f1   :  { %5358 = vrcp.bf16 %v1615_v3  ;;  %v1614_v5 = vadd.bf16 1065369472, %v5355_v47  ;;  %v5079_v52 = vld [vmem:[#allocation7 + $0x78c] ss:$16 sps:$4 sm:$0xff]   ;;  %v5074_v3 = vld [vmem:[#allocation7 + $0x588] ss:$16 sps:$4 sm:$0xff]  }
 0x3f2   :  { %5360 = vrcp.bf16 %v1612_v4  ;;  %v5077_v47 = vld [vmem:[#allocation7 + $0x788] ss:$16 sps:$4 sm:$0xff]   ;;  %v5082_v4 = vld [vmem:[#allocation7 + $0x56c] ss:$16 sps:$4 sm:$0xff]  }
 0x3f3   :  { %5362 = vrcp.bf16 %v1614_v5  ;;  %v5085_v5 = vld [vmem:[#allocation7 + $0x76c] ss:$16 sps:$4 sm:$0xff]  }
 0x3fe   :  { %v5357_v6 = vpop.eup %5356 }
 0x3ff   :  { %v5359_v7 = vpop.eup %5358  ;;  %v1619_v8 = vmul.bf16 1065369472, %v5357_v6  ;;  %v5080_v6 = vld [vmem:[#allocation7 + $0x568] ss:$16 sps:$4 sm:$0xff]  }
 0x400   :  { %v5361_v9 = vpop.eup %5360  ;;  %v1623_v10 = vmul.bf16 1065369472, %v5359_v7  ;;  %v5083_v7 = vld [vmem:[#allocation7 + $0x768] ss:$16 sps:$4 sm:$0xff]  }
 0x401   :  { %v5363_v11 = vpop.eup %5362  ;;  %v1625_v12 = vmul.bf16 %v1619_v8, %v1593_v62  ;;  %v1617_v13 = vmul.bf16 1065369472, %v5361_v9  ;;  %v5056_v62 = vld [vmem:[#allocation7 + $0x5e8] ss:$16 sps:$4 sm:$0xff]   ;;  %v5088_v8 = vld [vmem:[#allocation7 + $0x54c] ss:$16 sps:$4 sm:$0xff]  }
 0x402   :  { %v1627_v14 = vmul.bf16 %v1623_v10, %v1595_v63  ;;  %v1621_v16 = vmul.bf16 1065369472, %v5363_v11  ;;  %v5059_v63 = vld [vmem:[#allocation7 + $0x7e8] ss:$16 sps:$4 sm:$0xff]   ;;  %v5091_v9 = vld [vmem:[#allocation7 + $0x74c] ss:$16 sps:$4 sm:$0xff]  }
 0x403   :  { %2452 = vmatprep.mubr.bf16.mxu0 %v1625_v12  ;;  %v5769_v18 = vmul.bf16 %v1617_v13, %v1592_v0  ;;  %v5064_v0 = vld [vmem:[#allocation7 + $0x5cc] ss:$16 sps:$4 sm:$0xff]   ;;  %v5086_v10 = vld [vmem:[#allocation7 + $0x548] ss:$16 sps:$4 sm:$0xff]  }
 0x404   :  { %2493 = vmatprep.mubr.bf16.mxu1 %v1627_v14  ;;  %v5771_v19 = vmul.bf16 %v1621_v16, %v1594_v1  ;;  %v5067_v1 = vld [vmem:[#allocation7 + $0x7cc] ss:$16 sps:$4 sm:$0xff]   ;;  %v5089_v11 = vld [vmem:[#allocation7 + $0x748] ss:$16 sps:$4 sm:$0xff]  }
 0x405   :  { %2453 = vmatmul.mubr.bf16.vlgmr.msra.gmra.mxu0 %v5769_v18  ;;  %v5097_v13 = vld [vmem:[#allocation7 + $0x72c] ss:$16 sps:$4 sm:$0xff]  }
 0x406   :  { %2494 = vmatmul.mubr.bf16.vlgmr.msra.gmra.mxu1 %v5771_v19  ;;  %2503 = vmatpush1.bf16.msra.mxu0 %v5008_v15  ;;  %v5095_v15 = vld [vmem:[#allocation7 + $0x728] ss:$16 sps:$4 sm:$0xff]   ;;  %v5100_v16 = vld [vmem:[#allocation7 + $0x50c] ss:$16 sps:$4 sm:$0xff]  }
 0x407   :  { %2544 = vmatpush1.bf16.msra.mxu1 %v5011_v17  ;;  %2534 = vmatprep.mubr.bf16.mxu0 %v1625_v12  ;;  %v5094_v12 = vld [vmem:[#allocation7 + $0x52c] ss:$16 sps:$4 sm:$0xff]  }
 0x408   :  { %2575 = vmatprep.mubr.bf16.mxu1 %v1627_v14  ;;  %2504 = vmatprep.subr.bf16.mxu0 %v5016_v22  ;;  %v5092_v14 = vld [vmem:[#allocation7 + $0x528] ss:$16 sps:$4 sm:$0xff]   ;;  %v5103_v17 = vld [vmem:[#allocation7 + $0x70c] ss:$16 sps:$4 sm:$0xff]  }
 0x409   :  { %2545 = vmatprep.subr.bf16.mxu1 %v5019_v23  ;;  %v5098_v22 = vld [vmem:[#allocation7 + $0x508] ss:$16 sps:$4 sm:$0xff]  }
 0x40a   :  { %2505 = vmatpush1.bf16.msra.mxu0 %v5014_v24  ;;  %v5101_v23 = vld [vmem:[#allocation7 + $0x708] ss:$16 sps:$4 sm:$0xff]  }
 0x40b   :  { %2546 = vmatpush1.bf16.msra.mxu1 %v5017_v25  ;;  %2506 = vmatprep.subr.bf16.mxu0 %v5022_v26 }
 0x40c   :  { %2547 = vmatprep.subr.bf16.mxu1 %v5025_v27 }
 0x40e   :  { %2507 = vmatpush1.bf16.msra.mxu0 %v5020_v28 }
 0x40f   :  { %2548 = vmatpush1.bf16.msra.mxu1 %v5023_v29  ;;  %2508 = vmatprep.subr.bf16.mxu0 %v5028_v30 }
 0x410   :  { %2549 = vmatprep.subr.bf16.mxu1 %v5031_v31 }
 0x412   :  { %2509 = vmatpush1.bf16.msra.mxu0 %v5026_v32  ;;  %v1758_v32 = vld [vmem:[#allocation10 + $0x2] ss:$4 sm:$0xf] }
 0x413   :  { %2550 = vmatpush1.bf16.msra.mxu1 %v5029_v33  ;;  %2510 = vmatprep.subr.bf16.mxu0 %v5034_v34  ;;  %v1767_v33 = vrot.slane %v1758_v32, %v5685_v39  ;;  %v1763_v34 = vrot.slane %v1758_v32, %v5681_v36 }
 0x414   :  { %2551 = vmatprep.subr.bf16.mxu1 %v5037_v35 }
 0x416   :  { %2511 = vmatpush1.bf16.msra.mxu0 %v5032_v38 }
 0x417   :  { %2552 = vmatpush1.bf16.msra.mxu1 %v5035_v20  ;;  %2512 = vmatprep.subr.bf16.mxu0 %v5040_v41  ;;  %v1775_v41 = vrot.slane %v1758_v32, %v5690_v43 }
 0x418   :  { %2553 = vmatprep.subr.bf16.mxu1 %v5043_v42 }
 0x41a   :  { %2513 = vmatpush1.bf16.msra.mxu0 %v5038_v44 }
 0x41b   :  { %2554 = vmatpush1.bf16.msra.mxu1 %v5041_v45  ;;  %2514 = vmatprep.subr.bf16.mxu0 %v5046_v48 }
 0x41c   :  { %2555 = vmatprep.subr.bf16.mxu1 %v5049_v49 }
 0x41e   :  { %2515 = vmatpush1.bf16.msra.mxu0 %v5044_v51 }
 0x41f   :  { %2556 = vmatpush1.bf16.msra.mxu1 %v5047_v53  ;;  %2516 = vmatprep.subr.bf16.mxu0 %v5052_v54 }
 0x420   :  { %2557 = vmatprep.subr.bf16.mxu1 %v5055_v55 }
 0x422   :  { %2517 = vmatpush1.bf16.msra.mxu0 %v5050_v56 }
 0x423   :  { %2558 = vmatpush1.bf16.msra.mxu1 %v5053_v57  ;;  %2518 = vmatprep.subr.bf16.mxu0 %v5058_v59 }
 0x424   :  { %2559 = vmatprep.subr.bf16.mxu1 %v5061_v61 }
 0x426   :  { %2519 = vmatpush2.bf16.msra.mxu0 %v5056_v62 }
 0x427   :  { %2560 = vmatpush2.bf16.msra.mxu1 %v5059_v63  ;;  %2520 = vmatprep.subr.bf16.mxu0 %v5064_v0 }
 0x428   :  { %2561 = vmatprep.subr.bf16.mxu1 %v5067_v1 }
 0x42a   :  { %2521 = vmatpush2.bf16.msra.mxu0 %v5062_v50 }
 0x42b   :  { %2562 = vmatpush2.bf16.msra.mxu1 %v5065_v2  ;;  %2522 = vmatprep.subr.bf16.mxu0 %v5070_v40 }
 0x42c   :  { %2563 = vmatprep.subr.bf16.mxu1 %v5073_v46 }
 0x42e   :  { %2523 = vmatpush2.bf16.msra.mxu0 %v5068_v21 }
 0x42f   :  { %2564 = vmatpush2.bf16.msra.mxu1 %v5071_v58  ;;  %2524 = vmatprep.subr.bf16.mxu0 %v5076_v60  ;;  %v5106_v58 = vld [vmem:[#allocation7 + $0x8e4] ss:$16 sps:$4 sm:$0xff]  }
 0x430   :  { %2565 = vmatprep.subr.bf16.mxu1 %v5079_v52  ;;  %v5109_v60 = vld [vmem:[#allocation7 + $0xae4] ss:$16 sps:$4 sm:$0xff]   ;;  %v5104_v52 = vld [vmem:[#allocation7 + $0x8e0] ss:$16 sps:$4 sm:$0xff]  }
 0x432   :  { %2525 = vmatpush2.bf16.msra.mxu0 %v5074_v3  ;;  %v5107_v3 = vld [vmem:[#allocation7 + $0xae0] ss:$16 sps:$4 sm:$0xff]  }
 0x433   :  { %2566 = vmatpush2.bf16.msra.mxu1 %v5077_v47  ;;  %2526 = vmatprep.subr.bf16.mxu0 %v5082_v4  ;;  %v5110_v47 = vld [vmem:[#allocation7 + $0x8c0] ss:$16 sps:$4 sm:$0xff]   ;;  %v5112_v4 = vld [vmem:[#allocation7 + $0x8c4] ss:$16 sps:$4 sm:$0xff]  }
 0x434   :  { %2567 = vmatprep.subr.bf16.mxu1 %v5085_v5  ;;  %v5113_v5 = vld [vmem:[#allocation7 + $0xac0] ss:$16 sps:$4 sm:$0xff]  }
 0x436   :  { %2527 = vmatpush2.bf16.msra.mxu0 %v5080_v6  ;;  %v5115_v6 = vld [vmem:[#allocation7 + $0xac4] ss:$16 sps:$4 sm:$0xff]  }
 0x437   :  { %2568 = vmatpush2.bf16.msra.mxu1 %v5083_v7  ;;  %2528 = vmatprep.subr.bf16.mxu0 %v5088_v8  ;;  %v5118_v7 = vld [vmem:[#allocation7 + $0x8a4] ss:$16 sps:$4 sm:$0xff]  }
 0x438   :  { %2569 = vmatprep.subr.bf16.mxu1 %v5091_v9  ;;  %v5121_v8 = vld [vmem:[#allocation7 + $0xaa4] ss:$16 sps:$4 sm:$0xff]   ;;  %v5116_v9 = vld [vmem:[#allocation7 + $0x8a0] ss:$16 sps:$4 sm:$0xff]  }
 0x43a   :  { %2529 = vmatpush2.bf16.msra.mxu0 %v5086_v10  ;;  %v5119_v10 = vld [vmem:[#allocation7 + $0xaa0] ss:$16 sps:$4 sm:$0xff]  }
 0x43b   :  { %2570 = vmatpush2.bf16.msra.mxu1 %v5089_v11  ;;  %2530 = vmatprep.subr.bf16.mxu0 %v5094_v12  ;;  %v5124_v11 = vld [vmem:[#allocation7 + $0x884] ss:$16 sps:$4 sm:$0xff]  }
 0x43c   :  { %2571 = vmatprep.subr.bf16.mxu1 %v5097_v13  ;;  %v5127_v12 = vld [vmem:[#allocation7 + $0xa84] ss:$16 sps:$4 sm:$0xff]   ;;  %v5122_v13 = vld [vmem:[#allocation7 + $0x880] ss:$16 sps:$4 sm:$0xff]  }
 0x43e   :  { %2531 = vmatpush2.bf16.msra.mxu0 %v5092_v14  ;;  %v5125_v14 = vld [vmem:[#allocation7 + $0xa80] ss:$16 sps:$4 sm:$0xff]  }
 0x43f   :  { %2572 = vmatpush2.bf16.msra.mxu1 %v5095_v15  ;;  %2532 = vmatprep.subr.bf16.mxu0 %v5100_v16  ;;  %v5130_v15 = vld [vmem:[#allocation7 + $0x864] ss:$16 sps:$4 sm:$0xff]  }
 0x440   :  { %2573 = vmatprep.subr.bf16.mxu1 %v5103_v17  ;;  %v5133_v16 = vld [vmem:[#allocation7 + $0xa64] ss:$16 sps:$4 sm:$0xff]   ;;  %v5128_v17 = vld [vmem:[#allocation7 + $0x860] ss:$16 sps:$4 sm:$0xff]  }
 0x442   :  { %2533 = vmatpush2.bf16.msra.mxu0 %v5098_v22  ;;  %v5131_v22 = vld [vmem:[#allocation7 + $0xa60] ss:$16 sps:$4 sm:$0xff]  }
 0x443   :  { %2574 = vmatpush2.bf16.msra.mxu1 %v5101_v23  ;;  %3499 = vmatprep.subr.bf16.mxu0 %v5106_v58  ;;  %v5136_v23 = vld [vmem:[#allocation7 + $0x844] ss:$16 sps:$4 sm:$0xff]  }
 0x444   :  { %3540 = vmatprep.subr.bf16.mxu1 %v5109_v60  ;;  %v5190_v58 = vld [vmem:[#allocation7 + $0x924] ss:$16 sps:$4 sm:$0xff]  }
 0x445   :  { %2535 = vmatmul.mubr.bf16.vlgmr.msra.gmra.mxu0 %v5769_v18  ;;  %v1771_v18 = vrot.slane %v1758_v32, %v5683_v37  ;;  %v5151_v32 = vld [vmem:[#allocation7 + $0xa04] ss:$16 sps:$4 sm:$0xff]  }
 0x446   :  { %2576 = vmatmul.mubr.bf16.vlgmr.msra.gmra.mxu1 %v5771_v19  ;;  %3500 = vmatpush1.bf16.msra.mxu0 %v5104_v52  ;;  %v5193_v60 = vld [vmem:[#allocation7 + $0xb24] ss:$16 sps:$4 sm:$0xff]   ;;  %v5188_v52 = vld [vmem:[#allocation7 + $0x920] ss:$16 sps:$4 sm:$0xff]  }
 0x447   :  { %3541 = vmatpush1.bf16.msra.mxu1 %v5107_v3  ;;  %3501 = vmatprep.subr.bf16.mxu0 %v5112_v4  ;;  %v5191_v3 = vld [vmem:[#allocation7 + $0xb20] ss:$16 sps:$4 sm:$0xff]   ;;  %v5199_v4 = vld [vmem:[#allocation7 + $0xb04] ss:$16 sps:$4 sm:$0xff]  }
 0x448   :  { %3542 = vmatprep.subr.bf16.mxu1 %v5115_v6  ;;  %v5197_v6 = vld [vmem:[#allocation7 + $0xb00] ss:$16 sps:$4 sm:$0xff]  }
 0x44a   :  { %3502 = vmatpush1.bf16.msra.mxu0 %v5110_v47  ;;  %v5196_v47 = vld [vmem:[#allocation7 + $0x904] ss:$16 sps:$4 sm:$0xff]  }
 0x44b   :  { %3543 = vmatpush1.bf16.msra.mxu1 %v5113_v5  ;;  %3503 = vmatprep.subr.bf16.mxu0 %v5118_v7  ;;  %v5194_v5 = vld [vmem:[#allocation7 + $0x900] ss:$16 sps:$4 sm:$0xff]   ;;  %v5202_v7 = vld [vmem:[#allocation7 + $0x8ec] ss:$16 sps:$4 sm:$0xff]  }
 0x44c   :  { %3544 = vmatprep.subr.bf16.mxu1 %v5121_v8  ;;  %v5205_v8 = vld [vmem:[#allocation7 + $0xaec] ss:$16 sps:$4 sm:$0xff]  }
 0x44e   :  { %3504 = vmatpush1.bf16.msra.mxu0 %v5116_v9 }
 0x44f   :  { %3545 = vmatpush1.bf16.msra.mxu1 %v5119_v10  ;;  %3505 = vmatprep.subr.bf16.mxu0 %v5124_v11 }
 0x450   :  { %3546 = vmatprep.subr.bf16.mxu1 %v5127_v12 }
 0x452   :  { %3506 = vmatpush1.bf16.msra.mxu0 %v5122_v13 }
 0x453   :  { %3547 = vmatpush1.bf16.msra.mxu1 %v5125_v14  ;;  %3507 = vmatprep.subr.bf16.mxu0 %v5130_v15 }
 0x454   :  { %3548 = vmatprep.subr.bf16.mxu1 %v5133_v16 }
 0x456   :  { %3508 = vmatpush1.bf16.msra.mxu0 %v5128_v17  ;;  %v2585_v17 = vld [vmem:[#allocation11 + $0x2] ss:$4 sm:$0xf] }
 0x457   :  { %3549 = vmatpush1.bf16.msra.mxu1 %v5131_v22  ;;  %3509 = vmatprep.subr.bf16.mxu0 %v5136_v23  ;;  %v2587_v22 = vld [vmem:[#allocation13 + $0x2] ss:$4 sm:$0xf]  ;;  %v2617_v23 = vrot.slane %v2585_v17, %v5685_v39 }
 0x4c5   :  { %v2454_v24 = vpop.f32.mrf.mxu0 }
 0x4c6   :  { %v2495_v25 = vpop.f32.mrf.mxu1  ;;  %v2455_v38 = vadd.f32 %v2454_v24, %v1763_v34  ;;  %v5139_v24 = vld [vmem:[#allocation7 + $0xa44] ss:$16 sps:$4 sm:$0xff]   ;;  %v5149_v34 = vld [vmem:[#allocation7 + $0xa00] ss:$16 sps:$4 sm:$0xff]  }
 0x4c7   :  { %v2456_v26 = vpop.f32.mrf.mxu0  ;;  %3550 = vmatprep.subr.bf16.mxu1 %v5139_v24  ;;  %v2625_v24 = vrot.slane %v2585_v17, %v5690_v43 }
 0x4c8   :  { %v2497_v27 = vpop.f32.mrf.mxu1  ;;  %v2457_v35 = vadd.f32 %v2456_v26, %v1767_v33  ;;  %v5782_v19 = vadd.f32 %v2495_v25, %v2455_v38  ;;  %v5134_v25 = vld [vmem:[#allocation7 + $0x840] ss:$16 sps:$4 sm:$0xff]   ;;  %v5157_v38 = vld [vmem:[#allocation7 + $0xbe4] ss:$16 sps:$4 sm:$0xff]  }
 0x4c9   :  { %v2458_v28 = vpop.f32.mrf.mxu0  ;;  %v5137_v26 = vld [vmem:[#allocation7 + $0xa40] ss:$16 sps:$4 sm:$0xff]   ;;  %3510 = vmatpush1.bf16.msra.mxu0 %v5134_v25  ;;  %v2613_v25 = vrot.slane %v2585_v17, %v5681_v36 }
 0x4ca   :  { %v2499_v29 = vpop.f32.mrf.mxu1  ;;  %v5779_v20 = vadd.f32 %v2497_v27, %v2457_v35  ;;  %v2594_v51 = vmul.f32 %v5782_v19, %v5782_v19  ;;  %v5142_v27 = vld [vmem:[#allocation7 + $0x824] ss:$16 sps:$4 sm:$0xff]   ;;  %3551 = vmatpush1.bf16.msra.mxu1 %v5137_v26  ;;  %v5146_v33 = vld [vmem:[#allocation7 + $0x800] ss:$16 sps:$4 sm:$0xff]   ;;  %v2621_v26 = vrot.slane %v2585_v17, %v5683_v37 }
 0x4cb   :  { %v2459_v30 = vpop.f32.mrf.mxu0  ;;  %v5145_v28 = vld [vmem:[#allocation7 + $0xa24] ss:$16 sps:$4 sm:$0xff]   ;;  %v5140_v29 = vld [vmem:[#allocation7 + $0x820] ss:$16 sps:$4 sm:$0xff]   ;;  %3511 = vmatprep.subr.bf16.mxu0 %v5142_v27 }
 0x4cc   :  { %v2500_v31 = vpop.f32.mrf.mxu1  ;;  %v2595_v44 = vmul.f32 %v5779_v20, %v5779_v20  ;;  %v2588_v53 = vadd.f32 %v5779_v20, %v5782_v19  ;;  %v5143_v30 = vld [vmem:[#allocation7 + $0xa20] ss:$16 sps:$4 sm:$0xff]   ;;  %3552 = vmatprep.subr.bf16.mxu1 %v5145_v28  ;;  %v5154_v35 = vld [vmem:[#allocation7 + $0x9e4] ss:$16 sps:$4 sm:$0xff]   ;;  %v2646_v28 = vrot.slane %v2587_v22, %v5685_v39 }
 0x4cd   :  { %v5148_v31 = vld [vmem:[#allocation7 + $0x804] ss:$16 sps:$4 sm:$0xff]   ;;  %3512 = vmatpush1.bf16.msra.mxu0 %v5140_v29  ;;  %v2654_v29 = vrot.slane %v2587_v22, %v5690_v43 }
 0x4ce   :  { %v2598_v0 = vadd.f32 %v2595_v44, %v2594_v51  ;;  %3553 = vmatpush1.bf16.msra.mxu1 %v5143_v30  ;;  %3513 = vmatprep.subr.bf16.mxu0 %v5148_v31  ;;  %v5163_v44 = vld [vmem:[#allocation7 + $0xbc4] ss:$16 sps:$4 sm:$0xff]  }
 0x4cf   :  { %3554 = vmatprep.subr.bf16.mxu1 %v5151_v32  ;;  %v5169_v51 = vld [vmem:[#allocation7 + $0xba4] ss:$16 sps:$4 sm:$0xff]  }
 0x4d1   :  { %3514 = vmatpush1.bf16.msra.mxu0 %v5146_v33 }
 0x4d2   :  { %3555 = vmatpush1.bf16.msra.mxu1 %v5149_v34  ;;  %3515 = vmatprep.subr.bf16.mxu0 %v5154_v35  ;;  %v2642_v34 = vrot.slane %v2587_v22, %v5681_v36  ;;  %v2650_v35 = vrot.slane %v2587_v22, %v5683_v37  ;;  %v5208_v22 = vld [vmem:[#allocation7 + $0x8cc] ss:$16 sps:$4 sm:$0xff]  }
 0x4d3   :  { %3556 = vmatprep.subr.bf16.mxu1 %v5157_v38 }
 0x505   :  { %v2536_v42 = vpop.f32.mrf.mxu0 }
 0x506   :  { %v2537_v45 = vadd.f32 %v2536_v42, %v1771_v18  ;;  %v2577_v48 = vpop.f32.mrf.mxu1  ;;  %v5152_v18 = vld [vmem:[#allocation7 + $0x9e0] ss:$16 sps:$4 sm:$0xff]   ;;  %v5160_v42 = vld [vmem:[#allocation7 + $0x9c4] ss:$16 sps:$4 sm:$0xff]  }
 0x507   :  { %v2538_v49 = vpop.f32.mrf.mxu0  ;;  %3516 = vmatpush2.bf16.msra.mxu0 %v5152_v18 }
 0x508   :  { %v5791_v54 = vadd.f32 %v2577_v48, %v2537_v45  ;;  %v2539_v55 = vadd.f32 %v2538_v49, %v1775_v41  ;;  %v2579_v56 = vpop.f32.mrf.mxu1  ;;  %v5155_v41 = vld [vmem:[#allocation7 + $0xbe0] ss:$16 sps:$4 sm:$0xff]   ;;  %3517 = vmatprep.subr.bf16.mxu0 %v5160_v42  ;;  %v5166_v49 = vld [vmem:[#allocation7 + $0x9a4] ss:$16 sps:$4 sm:$0xff]  }
 0x509   :  { %v2540_v57 = vpop.f32.mrf.mxu0  ;;  %3557 = vmatpush2.bf16.msra.mxu1 %v5155_v41  ;;  %v5158_v45 = vld [vmem:[#allocation7 + $0x9c0] ss:$16 sps:$4 sm:$0xff]  }
 0x50a   :  { %v2596_v59 = vmul.f32 %v5791_v54, %v5791_v54  ;;  %v5795_v61 = vadd.f32 %v2579_v56, %v2539_v55  ;;  %v2581_v62 = vpop.f32.mrf.mxu1  ;;  %v2589_v63 = vadd.f32 %v2588_v53, %v5791_v54  ;;  %v5161_v48 = vld [vmem:[#allocation7 + $0xbc0] ss:$16 sps:$4 sm:$0xff]   ;;  %3558 = vmatprep.subr.bf16.mxu1 %v5163_v44  ;;  %v5172_v56 = vld [vmem:[#allocation7 + $0x984] ss:$16 sps:$4 sm:$0xff]  }
 0x50b   :  { %v2541_v1 = vpop.f32.mrf.mxu0  ;;  %3518 = vmatpush2.bf16.msra.mxu0 %v5158_v45  ;;  %v5164_v53 = vld [vmem:[#allocation7 + $0x9a0] ss:$16 sps:$4 sm:$0xff]   ;;  %v5175_v57 = vld [vmem:[#allocation7 + $0xb84] ss:$16 sps:$4 sm:$0xff]  }
 0x50c   :  { %v2582_v50 = vpop.f32.mrf.mxu1  ;;  %v2590_v2 = vadd.f32 %v2589_v63, %v5795_v61  ;;  %v2597_v40 = vmul.f32 %v5795_v61, %v5795_v61  ;;  %v2599_v46 = vadd.f32 %v2598_v0, %v2596_v59  ;;  %v5167_v55 = vld [vmem:[#allocation7 + $0xba0] ss:$16 sps:$4 sm:$0xff]   ;;  %3519 = vmatprep.subr.bf16.mxu0 %v5166_v49  ;;  %v5178_v63 = vld [vmem:[#allocation7 + $0x964] ss:$16 sps:$4 sm:$0xff]  }
 0x50d   :  { %3559 = vmatpush2.bf16.msra.mxu1 %v5161_v48  ;;  %v5170_v59 = vld [vmem:[#allocation7 + $0x980] ss:$16 sps:$4 sm:$0xff]   ;;  %v5181_v0 = vld [vmem:[#allocation7 + $0xb64] ss:$16 sps:$4 sm:$0xff]  }
 0x50e   :  { %2591 = vadd.xlane.f32.xlu0 %v2590_v2  ;;  %v2600_v21 = vadd.f32 %v2599_v46, %v2597_v40  ;;  %3560 = vmatprep.subr.bf16.mxu1 %v5169_v51  ;;  %v5173_v62 = vld [vmem:[#allocation7 + $0xb80] ss:$16 sps:$4 sm:$0xff]   ;;  %v5184_v2 = vld [vmem:[#allocation7 + $0x944] ss:$16 sps:$4 sm:$0xff]  }
 0x50f   :  { %3520 = vmatpush2.bf16.msra.mxu0 %v5164_v53  ;;  %v5176_v1 = vld [vmem:[#allocation7 + $0x960] ss:$16 sps:$4 sm:$0xff]   ;;  %v5187_v40 = vld [vmem:[#allocation7 + $0xb44] ss:$16 sps:$4 sm:$0xff]  }
 0x510   :  { %2601 = vadd.xlane.f32.xlu1 %v2600_v21  ;;  %3521 = vmatprep.subr.bf16.mxu0 %v5172_v56  ;;  %v5179_v50 = vld [vmem:[#allocation7 + $0xb60] ss:$16 sps:$4 sm:$0xff]  }
 0x511   :  { %3561 = vmatpush2.bf16.msra.mxu1 %v5167_v55  ;;  %v5182_v46 = vld [vmem:[#allocation7 + $0x940] ss:$16 sps:$4 sm:$0xff]  }
 0x512   :  { %3562 = vmatprep.subr.bf16.mxu1 %v5175_v57  ;;  %v5185_v21 = vld [vmem:[#allocation7 + $0xb40] ss:$16 sps:$4 sm:$0xff]  }
 0x513   :  { %3522 = vmatpush2.bf16.msra.mxu0 %v5170_v59 }
 0x514   :  { %3523 = vmatprep.subr.bf16.mxu0 %v5178_v63 }
 0x515   :  { %3563 = vmatpush2.bf16.msra.mxu1 %v5173_v62 }
 0x516   :  { %3564 = vmatprep.subr.bf16.mxu1 %v5181_v0 }
 0x517   :  { %3524 = vmatpush2.bf16.msra.mxu0 %v5176_v1 }
 0x518   :  { %3525 = vmatprep.subr.bf16.mxu0 %v5184_v2 }
 0x519   :  { %3565 = vmatpush2.bf16.msra.mxu1 %v5179_v50 }
 0x51a   :  { %3566 = vmatprep.subr.bf16.mxu1 %v5187_v40 }
 0x51b   :  { %3526 = vmatpush2.bf16.msra.mxu0 %v5182_v46 }
 0x51c   :  { %3527 = vmatprep.subr.bf16.mxu0 %v5190_v58 }
 0x51d   :  { %3567 = vmatpush2.bf16.msra.mxu1 %v5185_v21 }
 0x51e   :  { %3568 = vmatprep.subr.bf16.mxu1 %v5193_v60 }
 0x51f   :  { %3528 = vmatpush2.bf16.msra.mxu0 %v5188_v52 }
 0x520   :  { %3529 = vmatprep.subr.bf16.mxu0 %v5196_v47 }
 0x521   :  { %3569 = vmatpush2.bf16.msra.mxu1 %v5191_v3 }
 0x522   :  { %3570 = vmatprep.subr.bf16.mxu1 %v5199_v4 }
 0x523   :  { %3530 = vmatpush2.bf16.msra.mxu0 %v5194_v5 }
 0x524   :  { %3581 = vmatprep.subr.bf16.mxu0 %v5202_v7 }
 0x525   :  { %3571 = vmatpush2.bf16.msra.mxu1 %v5197_v6 }
 0x526   :  { %3622 = vmatprep.subr.bf16.mxu1 %v5205_v8 }
 0x597   :  { %v2592_v9 = vpop.xlane.xlu0 %2591 }
 0x598   :  { %v2593_v10 = vmul.f32 0.001953125, %v2592_v9 }
 0x599   :  { %v2602_v11 = vpop.xlane.xlu1 %2601 }
 0x59a   :  { %v2603_v12 = vmul.f32 0.001953125, %v2602_v11  ;;  %v2604_v13 = vmul.f32 %v2593_v10, %v2593_v10 }
 0x59c   :  { %v2605_v14 = vsub.f32 %v2603_v12, %v2604_v13  ;;  %v5200_v13 = vld [vmem:[#allocation7 + $0x8e8] ss:$16 sps:$4 sm:$0xff]  }
 0x59e   :  { %v2606_v15 = vmax.f32 %v2605_v14, 0.0 }
 0x5a0   :  { %v2607_v16 = vadd.f32 1e-05, %v2606_v15  ;;  %v5203_v15 = vld [vmem:[#allocation7 + $0xae8] ss:$16 sps:$4 sm:$0xff]  }
 0x5a2   :  { %5364 = vrsqrt.f32 %v2607_v16 }
 0x5af   :  { %v5365_v27 = vpop.eup %5364 }
 0x5b0   :  { %v2631_v30 = vmul.f32 %v5365_v27, %v2617_v23  ;;  %v2633_v31 = vmul.f32 %v5365_v27, %v2625_v24  ;;  %v2630_v32 = vmul.f32 %v5365_v27, %v2613_v25  ;;  %v2632_v33 = vmul.f32 %v5365_v27, %v2621_v26  ;;  %v5211_v23 = vld [vmem:[#allocation7 + $0xacc] ss:$16 sps:$4 sm:$0xff]   ;;  %v5206_v24 = vld [vmem:[#allocation7 + $0x8c8] ss:$16 sps:$4 sm:$0xff]  }
 0x5b1   :  { %v5209_v25 = vld [vmem:[#allocation7 + $0xac8] ss:$16 sps:$4 sm:$0xff]   ;;  %v5214_v26 = vld [vmem:[#allocation7 + $0x8ac] ss:$16 sps:$4 sm:$0xff]  }
 0x5b2   :  { %v2635_v38 = vmul.f32 %v2631_v30, %v2593_v10  ;;  %v2637_v18 = vmul.f32 %v2633_v31, %v2593_v10  ;;  %v2634_v41 = vmul.f32 %v2630_v32, %v2593_v10  ;;  %v2636_v42 = vmul.f32 %v2632_v33, %v2593_v10  ;;  %v5217_v27 = vld [vmem:[#allocation7 + $0xaac] ss:$16 sps:$4 sm:$0xff]  }
 0x5b3   :  { %v2664_v45 = vmul.f32 %v2631_v30, %v5779_v20  ;;  %v2666_v49 = vmul.f32 %v2633_v31, %v5795_v61  ;;  %v2663_v53 = vmul.f32 %v2630_v32, %v5782_v19  ;;  %v2665_v56 = vmul.f32 %v2632_v33, %v5791_v54  ;;  %v5220_v30 = vld [vmem:[#allocation7 + $0x88c] ss:$16 sps:$4 sm:$0xff]   ;;  %v5218_v32 = vld [vmem:[#allocation7 + $0x888] ss:$16 sps:$4 sm:$0xff]  }
 0x5b4   :  { %v2660_v44 = vsub.f32 %v2646_v28, %v2635_v38  ;;  %v2662_v48 = vsub.f32 %v2654_v29, %v2637_v18  ;;  %v2659_v51 = vsub.f32 %v2642_v34, %v2634_v41  ;;  %v2661_v55 = vsub.f32 %v2650_v35, %v2636_v42  ;;  %v5212_v28 = vld [vmem:[#allocation7 + $0x8a8] ss:$16 sps:$4 sm:$0xff]   ;;  %v5223_v31 = vld [vmem:[#allocation7 + $0xa8c] ss:$16 sps:$4 sm:$0xff]  }
 0x5b5   :  { %v5215_v29 = vld [vmem:[#allocation7 + $0xaa8] ss:$16 sps:$4 sm:$0xff]   ;;  %v5226_v34 = vld [vmem:[#allocation7 + $0x86c] ss:$16 sps:$4 sm:$0xff]  }
 0x5b6   :  { %v2668_v57 = vadd.f32 %v2664_v45, %v2660_v44  ;;  %v2670_v59 = vadd.f32 %v2666_v49, %v2662_v48  ;;  %v2667_v62 = vadd.f32 %v2663_v53, %v2659_v51  ;;  %v2669_v63 = vadd.f32 %v2665_v56, %v2661_v55  ;;  %v5221_v33 = vld [vmem:[#allocation7 + $0xa88] ss:$16 sps:$4 sm:$0xff]   ;;  %v5229_v35 = vld [vmem:[#allocation7 + $0xa6c] ss:$16 sps:$4 sm:$0xff]  }
 0x5b7   :  { %v5224_v38 = vld [vmem:[#allocation7 + $0x868] ss:$16 sps:$4 sm:$0xff]   ;;  %v5232_v41 = vld [vmem:[#allocation7 + $0x84c] ss:$16 sps:$4 sm:$0xff]  }
 0x5b8   :  { %v2672_v0 = vpack.c.bf16 %v2668_v57, %v2668_v57  ;;  %v2674_v1 = vpack.c.bf16 %v2670_v59, %v2670_v59  ;;  %v2671_v50 = vpack.c.bf16 %v2667_v62, %v2667_v62  ;;  %v2673_v2 = vpack.c.bf16 %v2669_v63, %v2669_v63  ;;  %v5227_v18 = vld [vmem:[#allocation7 + $0xa68] ss:$16 sps:$4 sm:$0xff]   ;;  %v5235_v42 = vld [vmem:[#allocation7 + $0xa4c] ss:$16 sps:$4 sm:$0xff]  }
 0x5b9   :  { %v5230_v44 = vld [vmem:[#allocation7 + $0x848] ss:$16 sps:$4 sm:$0xff]   ;;  %v5238_v48 = vld [vmem:[#allocation7 + $0x82c] ss:$16 sps:$4 sm:$0xff]  }
 0x5ba   :  { %v4446_v40 = vmul.bf16 3216621497, %v2672_v0  ;;  %v4448_v46 = vmul.bf16 3216621497, %v2674_v1  ;;  %v4445_v20 = vmul.bf16 3216621497, %v2671_v50 }
 0x5bb   :  { %v4447_v21 = vmul.bf16 3216621497, %v2673_v2  ;;  %v5233_v45 = vld [vmem:[#allocation7 + $0xa48] ss:$16 sps:$4 sm:$0xff]   ;;  %v5241_v49 = vld [vmem:[#allocation7 + $0xa2c] ss:$16 sps:$4 sm:$0xff]  }
 0x5bc   :  { %5366 = vpow.bf16 %v4446_v40  ;;  %v5236_v51 = vld [vmem:[#allocation7 + $0x828] ss:$16 sps:$4 sm:$0xff]   ;;  %v5244_v55 = vld [vmem:[#allocation7 + $0x80c] ss:$16 sps:$4 sm:$0xff]  }
 0x5bd   :  { %5368 = vpow.bf16 %v4448_v46  ;;  %v5239_v53 = vld [vmem:[#allocation7 + $0xa28] ss:$16 sps:$4 sm:$0xff]   ;;  %v5247_v56 = vld [vmem:[#allocation7 + $0xa0c] ss:$16 sps:$4 sm:$0xff]  }
 0x5be   :  { %5370 = vpow.bf16 %v4445_v20  ;;  %v5242_v57 = vld [vmem:[#allocation7 + $0x808] ss:$16 sps:$4 sm:$0xff]   ;;  %v5250_v62 = vld [vmem:[#allocation7 + $0x9ec] ss:$16 sps:$4 sm:$0xff]  }
 0x5bf   :  { %5372 = vpow.bf16 %v4447_v21  ;;  %v5245_v59 = vld [vmem:[#allocation7 + $0xa08] ss:$16 sps:$4 sm:$0xff]   ;;  %v5253_v63 = vld [vmem:[#allocation7 + $0xbec] ss:$16 sps:$4 sm:$0xff]  }
 0x5c0   :  { %v5254_v40 = vld [vmem:[#allocation7 + $0x9c8] ss:$16 sps:$4 sm:$0xff]   ;;  %v5262_v20 = vld [vmem:[#allocation7 + $0x9ac] ss:$16 sps:$4 sm:$0xff]  }
 0x5c1   :  { %v5257_v46 = vld [vmem:[#allocation7 + $0xbc8] ss:$16 sps:$4 sm:$0xff]   ;;  %v5265_v21 = vld [vmem:[#allocation7 + $0xbac] ss:$16 sps:$4 sm:$0xff]  }
 0x5ca   :  { %v5367_v19 = vpop.eup %5366 }
 0x5cb   :  { %v5369_v61 = vpop.eup %5368  ;;  %v2692_v58 = vadd.bf16 1065369472, %v5367_v19  ;;  %v5260_v19 = vld [vmem:[#allocation7 + $0x9a8] ss:$16 sps:$4 sm:$0xff]  }
 0x5cc   :  { %v5371_v54 = vpop.eup %5370  ;;  %v2694_v60 = vadd.bf16 1065369472, %v5369_v61  ;;  %v5263_v61 = vld [vmem:[#allocation7 + $0xba8] ss:$16 sps:$4 sm:$0xff]  }
 0x5cd   :  { %v5373_v52 = vpop.eup %5372  ;;  %5374 = vrcp.bf16 %v2692_v58  ;;  %v2691_v3 = vadd.bf16 1065369472, %v5371_v54  ;;  %v5268_v58 = vld [vmem:[#allocation7 + $0x98c] ss:$16 sps:$4 sm:$0xff]  }
 0x5ce   :  { %5376 = vrcp.bf16 %v2694_v60  ;;  %v2693_v47 = vadd.bf16 1065369472, %v5373_v52  ;;  %v5271_v54 = vld [vmem:[#allocation7 + $0xb8c] ss:$16 sps:$4 sm:$0xff]   ;;  %v5266_v60 = vld [vmem:[#allocation7 + $0x988] ss:$16 sps:$4 sm:$0xff]  }
 0x5cf   :  { %5378 = vrcp.bf16 %v2691_v3  ;;  %v5269_v52 = vld [vmem:[#allocation7 + $0xb88] ss:$16 sps:$4 sm:$0xff]   ;;  %v5274_v3 = vld [vmem:[#allocation7 + $0x96c] ss:$16 sps:$4 sm:$0xff]  }
 0x5d0   :  { %5380 = vrcp.bf16 %v2693_v47  ;;  %v5277_v47 = vld [vmem:[#allocation7 + $0xb6c] ss:$16 sps:$4 sm:$0xff]  }
 0x5db   :  { %v5375_v4 = vpop.eup %5374 }
 0x5dc   :  { %v5377_v5 = vpop.eup %5376  ;;  %v2698_v6 = vmul.bf16 1065369472, %v5375_v4  ;;  %v5272_v4 = vld [vmem:[#allocation7 + $0x968] ss:$16 sps:$4 sm:$0xff]  }
 0x5dd   :  { %v5379_v7 = vpop.eup %5378  ;;  %v2702_v8 = vmul.bf16 1065369472, %v5377_v5  ;;  %v5275_v5 = vld [vmem:[#allocation7 + $0xb68] ss:$16 sps:$4 sm:$0xff]  }
 0x5de   :  { %v5381_v9 = vpop.eup %5380  ;;  %v2704_v10 = vmul.bf16 %v2698_v6, %v2672_v0  ;;  %v2696_v11 = vmul.bf16 1065369472, %v5379_v7  ;;  %v5248_v0 = vld [vmem:[#allocation7 + $0x9e8] ss:$16 sps:$4 sm:$0xff]   ;;  %v5280_v6 = vld [vmem:[#allocation7 + $0x94c] ss:$16 sps:$4 sm:$0xff]  }
 0x5df   :  { %v2706_v12 = vmul.bf16 %v2702_v8, %v2674_v1  ;;  %v2700_v14 = vmul.bf16 1065369472, %v5381_v9  ;;  %v5251_v1 = vld [vmem:[#allocation7 + $0xbe8] ss:$16 sps:$4 sm:$0xff]   ;;  %v5283_v7 = vld [vmem:[#allocation7 + $0xb4c] ss:$16 sps:$4 sm:$0xff]  }
 0x5e0   :  { %3531 = vmatprep.mubr.bf16.mxu0 %v2704_v10  ;;  %v5813_v16 = vmul.bf16 %v2696_v11, %v2671_v50  ;;  %v5256_v50 = vld [vmem:[#allocation7 + $0x9cc] ss:$16 sps:$4 sm:$0xff]   ;;  %v5278_v8 = vld [vmem:[#allocation7 + $0x948] ss:$16 sps:$4 sm:$0xff]  }
 0x5e1   :  { %3572 = vmatprep.mubr.bf16.mxu1 %v2706_v12  ;;  %v5815_v17 = vmul.bf16 %v2700_v14, %v2673_v2  ;;  %v5259_v2 = vld [vmem:[#allocation7 + $0xbcc] ss:$16 sps:$4 sm:$0xff]   ;;  %v5281_v9 = vld [vmem:[#allocation7 + $0xb48] ss:$16 sps:$4 sm:$0xff]  }
 0x5e2   :  { %3532 = vmatmul.mubr.bf16.vlgmr.msra.gmra.mxu0 %v5813_v16  ;;  %v5289_v11 = vld [vmem:[#allocation7 + $0xb2c] ss:$16 sps:$4 sm:$0xff]  }
 0x5e3   :  { %3573 = vmatmul.mubr.bf16.vlgmr.msra.gmra.mxu1 %v5815_v17  ;;  %3582 = vmatpush1.bf16.msra.mxu0 %v5200_v13  ;;  %v5287_v13 = vld [vmem:[#allocation7 + $0xb28] ss:$16 sps:$4 sm:$0xff]   ;;  %v5292_v14 = vld [vmem:[#allocation7 + $0x90c] ss:$16 sps:$4 sm:$0xff]  }
 0x5e4   :  { %3623 = vmatpush1.bf16.msra.mxu1 %v5203_v15  ;;  %3613 = vmatprep.mubr.bf16.mxu0 %v2704_v10  ;;  %v5286_v10 = vld [vmem:[#allocation7 + $0x92c] ss:$16 sps:$4 sm:$0xff]  }
 0x5e5   :  { %3654 = vmatprep.mubr.bf16.mxu1 %v2706_v12  ;;  %3583 = vmatprep.subr.bf16.mxu0 %v5208_v22  ;;  %v5284_v12 = vld [vmem:[#allocation7 + $0x928] ss:$16 sps:$4 sm:$0xff]   ;;  %v5295_v15 = vld [vmem:[#allocation7 + $0xb0c] ss:$16 sps:$4 sm:$0xff]  }
 0x5e6   :  { %3624 = vmatprep.subr.bf16.mxu1 %v5211_v23  ;;  %v5290_v22 = vld [vmem:[#allocation7 + $0x908] ss:$16 sps:$4 sm:$0xff]  }
 0x5e7   :  { %3584 = vmatpush1.bf16.msra.mxu0 %v5206_v24  ;;  %v5293_v23 = vld [vmem:[#allocation7 + $0xb08] ss:$16 sps:$4 sm:$0xff]  }
 0x5e8   :  { %3625 = vmatpush1.bf16.msra.mxu1 %v5209_v25  ;;  %3585 = vmatprep.subr.bf16.mxu0 %v5214_v26 }
 0x5e9   :  { %3626 = vmatprep.subr.bf16.mxu1 %v5217_v27 }
 0x5eb   :  { %3586 = vmatpush1.bf16.msra.mxu0 %v5212_v28 }
 0x5ec   :  { %3627 = vmatpush1.bf16.msra.mxu1 %v5215_v29  ;;  %3587 = vmatprep.subr.bf16.mxu0 %v5220_v30 }
 0x5ed   :  { %3628 = vmatprep.subr.bf16.mxu1 %v5223_v31 }
 0x5ef   :  { %3588 = vmatpush1.bf16.msra.mxu0 %v5218_v32  ;;  %v2837_v32 = vld [vmem:[#allocation10 + $0x3] ss:$4 sm:$0xf] }
 0x5f0   :  { %3629 = vmatpush1.bf16.msra.mxu1 %v5221_v33  ;;  %3589 = vmatprep.subr.bf16.mxu0 %v5226_v34  ;;  %v2846_v33 = vrot.slane %v2837_v32, %v5685_v39  ;;  %v2842_v34 = vrot.slane %v2837_v32, %v5681_v36 }
 0x5f1   :  { %3630 = vmatprep.subr.bf16.mxu1 %v5229_v35 }
 0x5f3   :  { %3590 = vmatpush1.bf16.msra.mxu0 %v5224_v38 }
 0x5f4   :  { %3631 = vmatpush1.bf16.msra.mxu1 %v5227_v18  ;;  %3591 = vmatprep.subr.bf16.mxu0 %v5232_v41  ;;  %v2854_v41 = vrot.slane %v2837_v32, %v5690_v43 }
 0x5f5   :  { %3632 = vmatprep.subr.bf16.mxu1 %v5235_v42 }
 0x5f7   :  { %3592 = vmatpush1.bf16.msra.mxu0 %v5230_v44 }
 0x5f8   :  { %3633 = vmatpush1.bf16.msra.mxu1 %v5233_v45  ;;  %3593 = vmatprep.subr.bf16.mxu0 %v5238_v48 }
 0x5f9   :  { %3634 = vmatprep.subr.bf16.mxu1 %v5241_v49 }
 0x5fb   :  { %3594 = vmatpush1.bf16.msra.mxu0 %v5236_v51 }
 0x5fc   :  { %3635 = vmatpush1.bf16.msra.mxu1 %v5239_v53  ;;  %3595 = vmatprep.subr.bf16.mxu0 %v5244_v55 }
 0x5fd   :  { %3636 = vmatprep.subr.bf16.mxu1 %v5247_v56 }
 0x5ff   :  { %3596 = vmatpush1.bf16.msra.mxu0 %v5242_v57 }
 0x600   :  { %3637 = vmatpush1.bf16.msra.mxu1 %v5245_v59  ;;  %3597 = vmatprep.subr.bf16.mxu0 %v5250_v62 }
 0x601   :  { %3638 = vmatprep.subr.bf16.mxu1 %v5253_v63 }
 0x603   :  { %3598 = vmatpush2.bf16.msra.mxu0 %v5248_v0 }
 0x604   :  { %3639 = vmatpush2.bf16.msra.mxu1 %v5251_v1  ;;  %3599 = vmatprep.subr.bf16.mxu0 %v5256_v50 }
 0x605   :  { %3640 = vmatprep.subr.bf16.mxu1 %v5259_v2 }
 0x607   :  { %3600 = vmatpush2.bf16.msra.mxu0 %v5254_v40 }
 0x608   :  { %3641 = vmatpush2.bf16.msra.mxu1 %v5257_v46  ;;  %3601 = vmatprep.subr.bf16.mxu0 %v5262_v20 }
 0x609   :  { %3642 = vmatprep.subr.bf16.mxu1 %v5265_v21 }
 0x60b   :  { %3602 = vmatpush2.bf16.msra.mxu0 %v5260_v19 }
 0x60c   :  { %3643 = vmatpush2.bf16.msra.mxu1 %v5263_v61  ;;  %3603 = vmatprep.subr.bf16.mxu0 %v5268_v58  ;;  %v5296_v61 = vld [vmem:[#allocation8 + $0x78] sm:$0xff]  }
 0x60d   :  { %3644 = vmatprep.subr.bf16.mxu1 %v5271_v54  ;;  %v5297_v58 = vld [vmem:[#allocation8 + $0xf8] sm:$0xff]  }
 0x60e   :  { %v5298_v54 = vld [vmem:[#allocation8 + $0x38] sm:$0xff]  }
 0x60f   :  { %3604 = vmatpush2.bf16.msra.mxu0 %v5266_v60  ;;  %v5299_v60 = vld [vmem:[#allocation8 + $0xb8] sm:$0xff]  }
 0x610   :  { %3645 = vmatpush2.bf16.msra.mxu1 %v5269_v52  ;;  %3605 = vmatprep.subr.bf16.mxu0 %v5274_v3  ;;  %v5300_v52 = vld [vmem:[#allocation8 + $0x70] sm:$0xff]  }
 0x611   :  { %3646 = vmatprep.subr.bf16.mxu1 %v5277_v47  ;;  %v5301_v3 = vld [vmem:[#allocation8 + $0xf0] sm:$0xff]  }
 0x612   :  { %v5302_v47 = vld [vmem:[#allocation8 + $0x30] sm:$0xff]  }
 0x613   :  { %3606 = vmatpush2.bf16.msra.mxu0 %v5272_v4  ;;  %v5303_v4 = vld [vmem:[#allocation8 + $0xb0] sm:$0xff]  }
 0x614   :  { %3647 = vmatpush2.bf16.msra.mxu1 %v5275_v5  ;;  %3607 = vmatprep.subr.bf16.mxu0 %v5280_v6  ;;  %v5304_v5 = vld [vmem:[#allocation8 + $0x68] sm:$0xff]  }
 0x615   :  { %3648 = vmatprep.subr.bf16.mxu1 %v5283_v7  ;;  %v5305_v6 = vld [vmem:[#allocation8 + $0xe8] sm:$0xff]  }
 0x616   :  { %v5306_v7 = vld [vmem:[#allocation8 + $0x28] sm:$0xff]  }
 0x617   :  { %3608 = vmatpush2.bf16.msra.mxu0 %v5278_v8  ;;  %v5307_v8 = vld [vmem:[#allocation8 + $0xa8] sm:$0xff]  }
 0x618   :  { %3649 = vmatpush2.bf16.msra.mxu1 %v5281_v9  ;;  %3609 = vmatprep.subr.bf16.mxu0 %v5286_v10  ;;  %v5308_v9 = vld [vmem:[#allocation8 + $0x60] sm:$0xff]  }
 0x619   :  { %3650 = vmatprep.subr.bf16.mxu1 %v5289_v11  ;;  %v5309_v10 = vld [vmem:[#allocation8 + $0xe0] sm:$0xff]  }
 0x61a   :  { %v5310_v11 = vld [vmem:[#allocation8 + $0x20] sm:$0xff]  }
 0x61b   :  { %3610 = vmatpush2.bf16.msra.mxu0 %v5284_v12  ;;  %v5311_v12 = vld [vmem:[#allocation8 + $0xa0] sm:$0xff]  }
 0x61c   :  { %3651 = vmatpush2.bf16.msra.mxu1 %v5287_v13  ;;  %3611 = vmatprep.subr.bf16.mxu0 %v5292_v14  ;;  %v5312_v13 = vld [vmem:[#allocation8 + $0x58] sm:$0xff]  }
 0x61d   :  { %3652 = vmatprep.subr.bf16.mxu1 %v5295_v15  ;;  %v5313_v14 = vld [vmem:[#allocation8 + $0xd8] sm:$0xff]  }
 0x61e   :  { %v5314_v15 = vld [vmem:[#allocation8 + $0x18] sm:$0xff]  }
 0x61f   :  { %3612 = vmatpush2.bf16.msra.mxu0 %v5290_v22  ;;  %v5315_v22 = vld [vmem:[#allocation8 + $0x98] sm:$0xff]  }
 0x620   :  { %3653 = vmatpush2.bf16.msra.mxu1 %v5293_v23  ;;  %4614 = vmatprep.subr.bf16.mxu0 %v5296_v61  ;;  %v5316_v23 = vld [vmem:[#allocation8 + $0x50] sm:$0xff]  }
 0x621   :  { %4636 = vmatprep.subr.bf16.mxu1 %v5297_v58 }
 0x622   :  { %3614 = vmatmul.mubr.bf16.vlgmr.msra.gmra.mxu0 %v5813_v16  ;;  %v2850_v16 = vrot.slane %v2837_v32, %v5683_v37  ;;  %v5325_v32 = vld [vmem:[#allocation8 + $0xc0] sm:$0xff]  }
 0x623   :  { %3655 = vmatmul.mubr.bf16.vlgmr.msra.gmra.mxu1 %v5815_v17  ;;  %4615 = vmatpush3.bf16.msra.mxu0 %v5298_v54 }
 0x624   :  { %4637 = vmatpush3.bf16.msra.mxu1 %v5299_v60  ;;  %4616 = vmatprep.subr.bf16.mxu0 %v5300_v52 }
 0x625   :  { %4638 = vmatprep.subr.bf16.mxu1 %v5301_v3 }
 0x627   :  { %4617 = vmatpush3.bf16.msra.mxu0 %v5302_v47 }
 0x628   :  { %4639 = vmatpush3.bf16.msra.mxu1 %v5303_v4  ;;  %4618 = vmatprep.subr.bf16.mxu0 %v5304_v5 }
 0x629   :  { %4640 = vmatprep.subr.bf16.mxu1 %v5305_v6 }
 0x62b   :  { %4619 = vmatpush3.bf16.msra.mxu0 %v5306_v7 }
 0x62c   :  { %4641 = vmatpush3.bf16.msra.mxu1 %v5307_v8  ;;  %4620 = vmatprep.subr.bf16.mxu0 %v5308_v9 }
 0x62d   :  { %4642 = vmatprep.subr.bf16.mxu1 %v5309_v10 }
 0x62f   :  { %4621 = vmatpush3.bf16.msra.mxu0 %v5310_v11 }
 0x630   :  { %4643 = vmatpush3.bf16.msra.mxu1 %v5311_v12  ;;  %4622 = vmatprep.subr.bf16.mxu0 %v5312_v13 }
 0x631   :  { %4644 = vmatprep.subr.bf16.mxu1 %v5313_v14 }
 0x633   :  { %4623 = vmatpush3.bf16.msra.mxu0 %v5314_v15 }
 0x634   :  { %4645 = vmatpush3.bf16.msra.mxu1 %v5315_v22  ;;  %4624 = vmatprep.subr.bf16.mxu0 %v5316_v23 }
 0x6a2   :  { %v3533_v24 = vpop.f32.mrf.mxu0 }
 0x6a3   :  { %v3574_v25 = vpop.f32.mrf.mxu1  ;;  %v3534_v38 = vadd.f32 %v3533_v24, %v2842_v34  ;;  %v5317_v24 = vld [vmem:[#allocation8 + $0xd0] sm:$0xff]   ;;  %v5327_v34 = vld [vmem:[#allocation8 + $0x80] sm:$0xff]  }
 0x6a4   :  { %v3535_v26 = vpop.f32.mrf.mxu0  ;;  %4646 = vmatprep.subr.bf16.mxu1 %v5317_v24 }
 0x6a5   :  { %v3576_v27 = vpop.f32.mrf.mxu1  ;;  %v3536_v35 = vadd.f32 %v3535_v26, %v2846_v33  ;;  %v5826_v17 = vadd.f32 %v3574_v25, %v3534_v38  ;;  %v5318_v25 = vld [vmem:[#allocation8 + $0x10] sm:$0xff]   ;;  %v5326_v33 = vld [vmem:[#allocation8] sm:$0xff]  }
 0x6a6   :  { %v3537_v28 = vpop.f32.mrf.mxu0  ;;  %v5319_v26 = vld [vmem:[#allocation8 + $0x90] sm:$0xff]   ;;  %4625 = vmatpush3.bf16.msra.mxu0 %v5318_v25 }
 0x6a7   :  { %v3578_v29 = vpop.f32.mrf.mxu1  ;;  %v5823_v18 = vadd.f32 %v3576_v27, %v3536_v35  ;;  %v3673_v51 = vmul.f32 %v5826_v17, %v5826_v17  ;;  %v5320_v27 = vld [vmem:[#allocation8 + $0x48] sm:$0xff]   ;;  %4647 = vmatpush3.bf16.msra.mxu1 %v5319_v26 }
 0x6a8   :  { %v3538_v30 = vpop.f32.mrf.mxu0  ;;  %v5321_v28 = vld [vmem:[#allocation8 + $0xc8] sm:$0xff]   ;;  %4626 = vmatprep.subr.bf16.mxu0 %v5320_v27 }
 0x6a9   :  { %v3579_v31 = vpop.f32.mrf.mxu1  ;;  %v3674_v44 = vmul.f32 %v5823_v18, %v5823_v18  ;;  %v3667_v53 = vadd.f32 %v5823_v18, %v5826_v17  ;;  %v5322_v29 = vld [vmem:[#allocation8 + $0x8] sm:$0xff]   ;;  %4648 = vmatprep.subr.bf16.mxu1 %v5321_v28 }
 0x6aa   :  { %v5323_v30 = vld [vmem:[#allocation8 + $0x88] sm:$0xff]   ;;  %v5324_v31 = vld [vmem:[#allocation8 + $0x40] sm:$0xff]   ;;  %4627 = vmatpush3.bf16.msra.mxu0 %v5322_v29 }
 0x6ab   :  { %v3677_v50 = vadd.f32 %v3674_v44, %v3673_v51  ;;  %4649 = vmatpush3.bf16.msra.mxu1 %v5323_v30  ;;  %4628 = vmatprep.subr.bf16.mxu0 %v5324_v31  ;;  %v3666_v51 = vld [vmem:[#allocation13 + $0x3] ss:$4 sm:$0xf] }
 0x6ac   :  { %4650 = vmatprep.subr.bf16.mxu1 %v5325_v32 }
 0x6ae   :  { %4629 = vmatpush3.bf16.msra.mxu0 %v5326_v33 }
 0x6af   :  { %4651 = vmatpush3.bf16.msra.mxu1 %v5327_v34 }
 0x6e2   :  { %v3615_v42 = vpop.f32.mrf.mxu0 }
 0x6e3   :  { %v3616_v45 = vadd.f32 %v3615_v42, %v2850_v16  ;;  %v3656_v48 = vpop.f32.mrf.mxu1 }
 0x6e4   :  { %v3617_v49 = vpop.f32.mrf.mxu0 }
 0x6e5   :  { %v5835_v55 = vadd.f32 %v3656_v48, %v3616_v45  ;;  %v3618_v56 = vadd.f32 %v3617_v49, %v2854_v41  ;;  %v3658_v57 = vpop.f32.mrf.mxu1  ;;  %v3664_v49 = vld [vmem:[#allocation11 + $0x3] ss:$4 sm:$0xf] }
 0x6e6   :  { %v3619_v59 = vpop.f32.mrf.mxu0 }
 0x6e7   :  { %v3675_v62 = vmul.f32 %v5835_v55, %v5835_v55  ;;  %v5839_v63 = vadd.f32 %v3658_v57, %v3618_v56  ;;  %v3660_v0 = vpop.f32.mrf.mxu1  ;;  %v3668_v1 = vadd.f32 %v3667_v53, %v5835_v55  ;;  %v3696_v53 = vrot.slane %v3664_v49, %v5685_v39 }
 0x6e8   :  { %v3620_v2 = vpop.f32.mrf.mxu0  ;;  %v3704_v56 = vrot.slane %v3664_v49, %v5690_v43  ;;  %v3692_v57 = vrot.slane %v3664_v49, %v5681_v36  ;;  %v3700_v59 = vrot.slane %v3664_v49, %v5683_v37  ;;  %v3725_v0 = vrot.slane %v3666_v51, %v5685_v39 }
 0x6e9   :  { %v3661_v40 = vpop.f32.mrf.mxu1  ;;  %v3669_v46 = vadd.f32 %v3668_v1, %v5839_v63  ;;  %v3676_v20 = vmul.f32 %v5839_v63, %v5839_v63  ;;  %v3678_v21 = vadd.f32 %v3677_v50, %v3675_v62  ;;  %v3733_v1 = vrot.slane %v3666_v51, %v5690_v43 }
 0x6eb   :  { %3670 = vadd.xlane.f32.xlu0 %v3669_v46  ;;  %v3679_v19 = vadd.f32 %v3678_v21, %v3676_v20  ;;  %v3721_v20 = vrot.slane %v3666_v51, %v5681_v36  ;;  %v3729_v21 = vrot.slane %v3666_v51, %v5683_v37 }
 0x6ed   :  { %3680 = vadd.xlane.f32.xlu1 %v3679_v19 }
 0x774   :  { %v3671_v35 = vpop.xlane.xlu0 %3670 }
 0x775   :  { %v3672_v38 = vmul.f32 0.001953125, %v3671_v35 }
 0x776   :  { %v3681_v16 = vpop.xlane.xlu1 %3680 }
 0x777   :  { %v3682_v41 = vmul.f32 0.001953125, %v3681_v16  ;;  %v3683_v42 = vmul.f32 %v3672_v38, %v3672_v38 }
 0x779   :  { %v3684_v44 = vsub.f32 %v3682_v41, %v3683_v42 }
 0x77b   :  { %v3685_v45 = vmax.f32 %v3684_v44, 0.0  ;;  %v4581_v44 = vld [vmem:[#allocation14] ss:$0 sm:$0xff] }
 0x77d   :  { %v3686_v48 = vadd.f32 1e-05, %v3685_v45 }
 0x77f   :  { %5382 = vrsqrt.f32 %v3686_v48 }
 0x78c   :  { %v5383_v62 = vpop.eup %5382 }
 0x78d   :  { %v3710_v50 = vmul.f32 %v5383_v62, %v3696_v53  ;;  %v3712_v2 = vmul.f32 %v5383_v62, %v3704_v56  ;;  %v3709_v40 = vmul.f32 %v5383_v62, %v3692_v57  ;;  %v3711_v46 = vmul.f32 %v5383_v62, %v3700_v59 }
 0x78f   :  { %v3714_v19 = vmul.f32 %v3710_v50, %v3672_v38  ;;  %v3716_v61 = vmul.f32 %v3712_v2, %v3672_v38  ;;  %v3713_v58 = vmul.f32 %v3709_v40, %v3672_v38  ;;  %v3715_v54 = vmul.f32 %v3711_v46, %v3672_v38 }
 0x790   :  { %v3743_v52 = vmul.f32 %v3710_v50, %v5823_v18  ;;  %v3745_v39 = vmul.f32 %v3712_v2, %v5839_v63  ;;  %v3742_v43 = vmul.f32 %v3709_v40, %v5826_v17  ;;  %v3744_v5 = vmul.f32 %v3711_v46, %v5835_v55 }
 0x791   :  { %v3739_v60 = vsub.f32 %v3725_v0, %v3714_v19  ;;  %v3741_v3 = vsub.f32 %v3733_v1, %v3716_v61  ;;  %v3738_v47 = vsub.f32 %v3721_v20, %v3713_v58  ;;  %v3740_v4 = vsub.f32 %v3729_v21, %v3715_v54 }
 0x793   :  { %v3747_v6 = vadd.f32 %v3743_v52, %v3739_v60  ;;  %v3749_v36 = vadd.f32 %v3745_v39, %v3741_v3  ;;  %v3746_v7 = vadd.f32 %v3742_v43, %v3738_v47  ;;  %v3748_v37 = vadd.f32 %v3744_v5, %v3740_v4 }
 0x795   :  { %v3751_v8 = vpack.c.bf16 %v3747_v6, %v3747_v6  ;;  %v3753_v9 = vpack.c.bf16 %v3749_v36, %v3749_v36  ;;  %v3750_v10 = vpack.c.bf16 %v3746_v7, %v3746_v7  ;;  %v3752_v11 = vpack.c.bf16 %v3748_v37, %v3748_v37 }
 0x797   :  { %v4578_v12 = vmul.bf16 3216621497, %v3751_v8  ;;  %v4580_v13 = vmul.bf16 3216621497, %v3753_v9  ;;  %v4577_v18 = vmul.bf16 3216621497, %v3750_v10 }
 0x798   :  { %v4579_v14 = vmul.bf16 3216621497, %v3752_v11 }
 0x799   :  { %5384 = vpow.bf16 %v4578_v12 }
 0x79a   :  { %5386 = vpow.bf16 %v4580_v13 }
 0x79b   :  { %5388 = vpow.bf16 %v4577_v18 }
 0x79c   :  { %5390 = vpow.bf16 %v4579_v14 }
 0x7a7   :  { %v5385_v17 = vpop.eup %5384 }
 0x7a8   :  { %v5387_v63 = vpop.eup %5386  ;;  %v3771_v15 = vadd.bf16 1065369472, %v5385_v17 }
 0x7a9   :  { %v5389_v55 = vpop.eup %5388  ;;  %v3773_v22 = vadd.bf16 1065369472, %v5387_v63 }
 0x7aa   :  { %v5391_v23 = vpop.eup %5390  ;;  %5392 = vrcp.bf16 %v3771_v15  ;;  %v3770_v24 = vadd.bf16 1065369472, %v5389_v55 }
 0x7ab   :  { %5394 = vrcp.bf16 %v3773_v22  ;;  %v3772_v25 = vadd.bf16 1065369472, %v5391_v23 }
 0x7ac   :  { %5396 = vrcp.bf16 %v3770_v24 }
 0x7ad   :  { %5398 = vrcp.bf16 %v3772_v25 }
 0x7b8   :  { %v5393_v26 = vpop.eup %5392 }
 0x7b9   :  { %v5395_v27 = vpop.eup %5394  ;;  %v3777_v28 = vmul.bf16 1065369472, %v5393_v26 }
 0x7ba   :  { %v5397_v29 = vpop.eup %5396  ;;  %v3781_v30 = vmul.bf16 1065369472, %v5395_v27 }
 0x7bb   :  { %v5399_v31 = vpop.eup %5398  ;;  %v3783_v32 = vmul.bf16 %v3777_v28, %v3751_v8  ;;  %v3775_v33 = vmul.bf16 1065369472, %v5397_v29 }
 0x7bc   :  { %v3785_v34 = vmul.bf16 %v3781_v30, %v3753_v9  ;;  %v3779_v35 = vmul.bf16 1065369472, %v5399_v31 }
 0x7bd   :  { %4081 = vmatprep.mubr.bf16.mxu0 %v3783_v32  ;;  %v3782_v38 = vmul.bf16 %v3775_v33, %v3750_v10 }
 0x7be   :  { %4121 = vmatprep.mubr.bf16.mxu1 %v3785_v34  ;;  %v3784_v16 = vmul.bf16 %v3779_v35, %v3752_v11 }
 0x7bf   :  { %4082 = vmatmul.mubr.bf16.vlgmr.msra.gmra.mxu0 %v3782_v38 }
 0x7c0   :  { %4122 = vmatmul.mubr.bf16.vlgmr.msra.gmra.mxu1 %v3784_v16 }
 0x87f   :  { %v4630_v41 = vpop.f32.mrf.mxu0 }
 0x880   :  { %v4652_v42 = vpop.f32.mrf.mxu1 }
 0x881   :  { %v4631_v45 = vpop.f32.mrf.mxu0 }
 0x882   :  { %v4632_v48 = vadd.f32 %v4631_v45, %v4630_v41  ;;  %v4653_v49 = vpop.f32.mrf.mxu1 }
 0x883   :  { %v4633_v51 = vpop.f32.mrf.mxu0  ;;  %v4654_v56 = vadd.f32 %v4653_v49, %v4652_v42 }
 0x884   :  { %v4084_v53 = vadd.f32 %v4632_v48, %v4581_v44  ;;  %v4655_v57 = vpop.f32.mrf.mxu1 }
 0x885   :  { %v4634_v59 = vpop.f32.mrf.mxu0 }
 0x886   :  { %v4124_v62 = vadd.f32 %v4654_v56, %v4084_v53  ;;  %v4656_v0 = vpop.f32.mrf.mxu1 }
 0x888   :  { %4129 = vst [vmem:[#allocation16] sm:$0xff] %v4124_v62 }
 0x889   :  { %5571 = shalt.err (!%p5568_p2)
}
 0x88a   :  { %4139 = dma.vmem_to_hbm [thread:$0]  %s4137_s7, 128, %s5868_s8, [#allocation4]  }
 0x88b   :  { %5590 = dma.done.wait [#allocation4], 128  }
 0x88c   :  { %5591 = vsyncadd [#allocation4], 4294967168 }
 0x88d   :  { %4143 = vsyncpa [#allocation3], 1 }
 0x88e   :  { %4144 = vsyncpa [#allocation6], 1 }
 0x88f   :  { %4145 = vsyncpa [#allocation9], 1 }
 0x890   :  { %4146 = vsyncpa [#allocation12], 1 }
 0x891   :  { %4147 = vsyncpa [#allocation15], 1 }
 0x892   :  { %4148 = vsyncpa [#allocation4], 1 }

</bundles_post_ra>
